<compile_context>
chip_gen: v7x
topology: tpu7x:2x2x1
jax: 0.10.0
libtpu: 0.0.40
codegen_flags: <defaults>
</compile_context>

<pallas_src>
import functools

import jax
import jax.numpy as jnp
from jax.experimental import pallas as pl
from jax.experimental.pallas import tpu as pltpu


def _round_up(x, m):
    return ((x + m - 1) // m) * m


def _pad_gates_last(w, h, h_pad):
    """Pad the trailing (3*h) gate axis of `w` to (3*h_pad), gate by gate."""
    if h_pad == h:
        return w
    lead = w.shape[:-1]
    w3 = w.reshape(*lead, 3, h)
    w3 = jnp.pad(w3, [(0, 0)] * (len(lead) + 1) + [(0, h_pad - h)])
    return w3.reshape(*lead, 3 * h_pad)


# ----------------------------------------------------------------------------
# Kernel: one time-block of the fused, interleaved bidirectional GRU
# ----------------------------------------------------------------------------
def _dgru_kernel(xf_ref, xb_ref, kf_ref, kb_ref, wih_ref, whh_ref, bih_ref,
                 bhn_ref, of_ref, ob_ref, hf_ref, hb_ref, gif_ref, gib_ref, *,
                 t_blk, hidden):
    """Refs per grid step (B = padded batch, H = padded hidden, I = input dim):
    xf_ref/xb_ref : (t_blk*B, I)   X block, forward / backward time order
    kf_ref/kb_ref : (t_blk, B, 1)  keep = 1-D[t] (fwd) / 1-D[t+1] (bwd)
    wih_ref       : (2, I, 3H)     W_ih^T per direction (VMEM resident)
    whh_ref       : (2, H, 3H)     W_hh^T per direction (VMEM resident)
    bih_ref       : (2, 1, 3H)     b_ih with b_hr/b_hz folded in
    bhn_ref       : (2, 1, H)      b_hn (stays inside the r-gated term)
    of_ref/ob_ref : (t_blk, B, H)  per-direction output blocks
    hf_ref/hb_ref : (B, H) VMEM    carried hidden state per direction
    gif_ref/gib_ref:(t_blk*B, 3H)  VMEM scratch for the block input projection
    """
    s = pl.program_id(0)

    @pl.when(s == 0)
    def _():
        hf_ref[...] = jnp.zeros_like(hf_ref)
        hb_ref[...] = jnp.zeros_like(hb_ref)

    H = hidden
    B = kf_ref.shape[1]

    # ---- hoisted input projection: one wide matmul per direction per block
    # (M = t_blk*B rows fills the MXU, unlike the per-step M=B recurrence).
    gif_ref[...] = jnp.dot(xf_ref[...], wih_ref[0],
                           preferred_element_type=jnp.float32) + bih_ref[0]
    gib_ref[...] = jnp.dot(xb_ref[...], wih_ref[1],
                           preferred_element_type=jnp.float32) + bih_ref[1]

    # ---- recurrent weights stay stationary across the unrolled time loop ----
    whh_f = whh_ref[0]
    whh_b = whh_ref[1]
    bhn_f = bhn_ref[0]
    bhn_b = bhn_ref[1]

    def cell(gi, gh, h_in, bhn):
        # PyTorch GRUCell gate order (r, z, n); slices are 128-lane aligned.
        r = jax.nn.sigmoid(gi[:, 0:H] + gh[:, 0:H])
        z = jax.nn.sigmoid(gi[:, H:2 * H] + gh[:, H:2 * H])
        n = jnp.tanh(gi[:, 2 * H:3 * H] + r * (gh[:, 2 * H:3 * H] + bhn))
        return (1.0 - z) * n + z * h_in

    def step(j, carry):
        h_f, h_b = carry
        # Two independent recurrences (fwd chain + bwd chain) are interleaved
        # so each fills the other's MXU->EUP->VPU latency bubbles.

        # forward: row j of its block
        hf_in = kf_ref[j] * h_f                        # discontinuity reset
        gh_f = jnp.dot(hf_in, whh_f, preferred_element_type=jnp.float32)
        gi_f = gif_ref[pl.ds(pl.multiple_of(j * B, B), B), :]
        h_f = cell(gi_f, gh_f, hf_in, bhn_f)
        of_ref[j] = h_f.astype(of_ref.dtype)

        # backward: row t_blk-1-j of its block (block walks back-to-front)
        jb = t_blk - 1 - j
        hb_in = kb_ref[jb] * h_b
        gh_b = jnp.dot(hb_in, whh_b, preferred_element_type=jnp.float32)
        gi_b = gib_ref[pl.ds(pl.multiple_of(jb * B, B), B), :]
        h_b = cell(gi_b, gh_b, hb_in, bhn_b)
        ob_ref[jb] = h_b.astype(ob_ref.dtype)
        return (h_f, h_b)

    h_f, h_b = jax.lax.fori_loop(0, t_blk, step, (hf_ref[...], hb_ref[...]),
                                 unroll=True)
    hf_ref[...] = h_f
    hb_ref[...] = h_b


# ----------------------------------------------------------------------------
# Wrapper: fused bidirectional discontinued GRU
# ----------------------------------------------------------------------------
@functools.partial(jax.jit, static_argnames=("time_block",))
def discontinued_gru(X, D, params, *, time_block=16):
    """X: (T, B, I) f32, D: (T, B) f32 in {0,1}. Returns (T, B, 2H):
    forward hidden states in [..., :H], backward in [..., H:]."""
    T, B, I = X.shape
    H = params["whh_f"].shape[1]
    out_dtype = X.dtype
    f32 = jnp.float32

    H_pad = _round_up(H, 128)          # lane-align gates, hh-matmul and stores
    B_pad = _round_up(B, 8)            # fill f32 sublanes
    t_blk = max(1, min(int(time_block), T))
    T_pad = _round_up(T, t_blk)
    n_blk = T_pad // t_blk

    # ---- weights: transpose, pad gate-wise to H_pad, fold biases, stack -----
    def prep(wih, whh, bih, bhh):
        wih_t = _pad_gates_last(wih.astype(f32).T, H, H_pad)          # (I, 3Hp)
        whh_t = _pad_gates_last(whh.astype(f32).T, H, H_pad)          # (H, 3Hp)
        whh_t = jnp.pad(whh_t, ((0, H_pad - H), (0, 0)))              # (Hp, 3Hp)
        bih32 = bih.astype(f32)
        bhh32 = bhh.astype(f32)
        # Fold b_hr / b_hz into the hoisted input bias; keep b_hn separate
        # (it must stay inside the r-gated term, matching torch.nn.GRU).
        bih_fold = bih32.at[:2 * H].add(bhh32[:2 * H])
        bih_p = _pad_gates_last(bih_fold, H, H_pad)                   # (3Hp,)
        bhn_p = jnp.pad(bhh32[2 * H:], (0, H_pad - H))                # (Hp,)
        return wih_t, whh_t, bih_p, bhn_p

    wf, whf, bf, nf = prep(params["wih_f"], params["whh_f"],
                           params["bih_f"], params["bhh_f"])
    wb, whb, bb, nb = prep(params["wih_b"], params["whh_b"],
                           params["bih_b"], params["bhh_b"])
    wih_stack = jnp.stack([wf, wb])                   # (2, I, 3Hp)
    whh_stack = jnp.stack([whf, whb])                 # (2, Hp, 3Hp)
    bih_stack = jnp.stack([bf, bb])[:, None, :]       # (2, 1, 3Hp)
    bhn_stack = jnp.stack([nf, nb])[:, None, :]       # (2, 1, Hp)

    # ---- activations: pad T (block multiple) and B (sublane multiple) -------
    Xp = jnp.pad(X.astype(f32), ((0, T_pad - T), (0, B_pad - B), (0, 0)))
    Xf = Xp.reshape(T_pad * B_pad, I)                 # flat, time-major
    # Pad D with 1 ("discontinuity") so padded timesteps can never leak.
    Dp = jnp.pad(D.astype(f32), ((0, T_pad - T), (0, B_pad - B)),
                 constant_values=1.0)
    keep_f = (1.0 - Dp)[..., None]                    # fwd reset uses D[t]
    # Backward reset uses D[t+1]; force a reset at the last *real* timestep so
    # garbage from T-padding (processed first by the backward pass) is dropped.
    d_next = jnp.concatenate([Dp[1:], jnp.ones((1, B_pad), f32)], axis=0)
    d_next = d_next.at[T - 1:].set(1.0)
    keep_b = (1.0 - d_next)[..., None]                # (Tp, Bp, 1)

    # ---- block specs ---------------------------------------------------------
    # Flattened X: block s covers rows [s*t_blk*B, (s+1)*t_blk*B) = time block s.
    x_spec_f = pl.BlockSpec((t_blk * B_pad, I), lambda s: (s, 0))
    x_spec_b = pl.BlockSpec((t_blk * B_pad, I), lambda s: (n_blk - 1 - s, 0))
    k_spec_f = pl.BlockSpec((t_blk, B_pad, 1), lambda s: (s, 0, 0))
    k_spec_b = pl.BlockSpec((t_blk, B_pad, 1), lambda s: (n_blk - 1 - s, 0, 0))
    # Constant index maps -> weights/biases stay VMEM-resident across the grid.
    wih_spec = pl.BlockSpec((2, I, 3 * H_pad), lambda s: (0, 0, 0))
    whh_spec = pl.BlockSpec((2, H_pad, 3 * H_pad), lambda s: (0, 0, 0))
    bih_spec = pl.BlockSpec((2, 1, 3 * H_pad), lambda s: (0, 0, 0))
    bhn_spec = pl.BlockSpec((2, 1, H_pad), lambda s: (0, 0, 0))
    out_spec_f = pl.BlockSpec((t_blk, B_pad, H_pad), lambda s: (s, 0, 0))
    out_spec_b = pl.BlockSpec((t_blk, B_pad, H_pad),
                              lambda s: (n_blk - 1 - s, 0, 0))

    kernel = functools.partial(_dgru_kernel, t_blk=t_blk, hidden=H_pad)
    out_f, out_b = pl.pallas_call(
        kernel,
        out_shape=(jax.ShapeDtypeStruct((T_pad, B_pad, H_pad), f32),
                   jax.ShapeDtypeStruct((T_pad, B_pad, H_pad), f32)),
        grid_spec=pltpu.PrefetchScalarGridSpec(
            num_scalar_prefetch=0,
            grid=(n_blk,),                            # time blocks (recurrence)
            in_specs=[x_spec_f, x_spec_b, k_spec_f, k_spec_b,
                      wih_spec, whh_spec, bih_spec, bhn_spec],
            out_specs=[out_spec_f, out_spec_b],
            scratch_shapes=[
                pltpu.VMEM((B_pad, H_pad), jnp.float32),            # h_fwd
                pltpu.VMEM((B_pad, H_pad), jnp.float32),            # h_bwd
                pltpu.VMEM((t_blk * B_pad, 3 * H_pad), jnp.float32),  # gi_fwd
                pltpu.VMEM((t_blk * B_pad, 3 * H_pad), jnp.float32),  # gi_bwd
            ]),
        compiler_params=pltpu.CompilerParams(
            dimension_semantics=("arbitrary",),       # true recurrence over time
            vmem_limit_bytes=32 * 1024 * 1024,
        ),
    )(Xf, Xf, keep_f, keep_b, wih_stack, whh_stack, bih_stack, bhn_stack)

    # TODO(synk): when H_pad != H the padded columns are provably zero; they
    # could be folded into the downstream w_out matmul instead of sliced here.
    res = jnp.concatenate([out_f[:T, :B, :H], out_b[:T, :B, :H]], axis=-1)
    return res.astype(out_dtype)


# ----------------------------------------------------------------------------
# Seq2SeqModel.forward glue around the Pallas encoder
# ----------------------------------------------------------------------------
def seq2seq_forward(token_ids, embedding_table, encoder_params, w_out, b_out):
    """Mirrors Seq2SeqModel.forward; the dominant sequential work (the encoder
    recurrence) runs in the Pallas kernel, the rest is memory-light XLA glue."""
    # P = torch.ones(*X.shape[:-1]) in the PyTorch code; handed straight to the
    # encoder as its (all-ones) second argument.
    P = jnp.ones(token_ids.shape, dtype=jnp.float32)
    embedded = jnp.take(embedding_table, token_ids, axis=0)       # (T, B, E)
    encoded = discontinued_gru(embedded, P, encoder_params)        # (T, B, 2H)
    # TODO(synk): `decoder` is an injected sub-module not defined in the spec;
    # identity passthrough here.
    decoded = encoded
    scores = decoded @ w_out.T + b_out
    probas = jax.nn.softmax(scores, axis=-1)
    return jnp.swapaxes(probas, 0, 1)


# ----------------------------------------------------------------------------
# Pure-JAX reference (mirrors the PyTorch forward exactly)
# ----------------------------------------------------------------------------
def _gru_cell_ref(x, h, wih, whh, bih, bhh):
    H = whh.shape[1]
    gi = x @ wih.T + bih
    gh = h @ whh.T + bhh
    r = jax.nn.sigmoid(gi[:, :H] + gh[:, :H])
    z = jax.nn.sigmoid(gi[:, H:2 * H] + gh[:, H:2 * H])
    n = jnp.tanh(gi[:, 2 * H:] + r * gh[:, 2 * H:])
    return (1.0 - z) * n + z * h


def discontinued_gru_ref(X, D, p):
    T, B, _ = X.shape
    H = p["whh_f"].shape[1]
    hs = []
    hprev = jnp.zeros((B, H), X.dtype)
    for t in range(T):
        h_in = (1.0 - D[t])[:, None] * hprev if t > 0 else jnp.zeros((B, H), X.dtype)
        hprev = _gru_cell_ref(X[t], h_in, p["wih_f"], p["whh_f"],
                              p["bih_f"], p["bhh_f"])
        hs.append(hprev)
    hbs = [None] * T
    hprev = jnp.zeros((B, H), X.dtype)
    for t in reversed(range(T)):
        h_in = (1.0 - D[t + 1])[:, None] * hprev if t < T - 1 else jnp.zeros((B, H), X.dtype)
        hprev = _gru_cell_ref(X[t], h_in, p["wih_b"], p["whh_b"],
                              p["bih_b"], p["bhh_b"])
        hbs[t] = hprev
    return jnp.concatenate([jnp.stack(hs), jnp.stack(hbs)], axis=2)


# ----------------------------------------------------------------------------
if __name__ == "__main__":
    key = jax.random.PRNGKey(0)

    def make_params(k, in_dim, hidden):
        ks = jax.random.split(k, 8)
        bound = 1.0 / (hidden ** 0.5)
        u = lambda kk, shape: jax.random.uniform(kk, shape, jnp.float32,
                                                 -bound, bound)
        return {
            "wih_f": u(ks[0], (3 * hidden, in_dim)),
            "whh_f": u(ks[1], (3 * hidden, hidden)),
            "bih_f": u(ks[2], (3 * hidden,)),
            "bhh_f": u(ks[3], (3 * hidden,)),
            "wih_b": u(ks[4], (3 * hidden, in_dim)),
            "whh_b": u(ks[5], (3 * hidden, hidden)),
            "bih_b": u(ks[6], (3 * hidden,)),
            "bhh_b": u(ks[7], (3 * hidden,)),
        }

    # Config 1: lane/sublane-aligned (H = module default 128), two time blocks.
    # Config 2: T-padding path (T=24, t_blk=16 -> T_pad=32) with multi-block carry.
    # Config 3: small unaligned shapes exercising the B/H padding paths.
    for (T, B, I, H, tb) in [(16, 8, 32, 128, 8),
                             (24, 8, 32, 128, 16),
                             (12, 5, 16, 32, 16)]:
        key, kx, kd, kp = jax.random.split(key, 4)
        X = jax.random.normal(kx, (T, B, I), dtype=jnp.float32)
        D = jax.random.bernoulli(kd, 0.3, (T, B)).astype(jnp.float32)
        params = make_params(kp, I, H)

        out = jax.block_until_ready(discontinued_gru(X, D, params, time_block=tb))
        ref = discontinued_gru_ref(X, D, params)
        assert out.shape == (T, B, 2 * H), out.shape
        err = float(jnp.max(jnp.abs(out - ref)))
        assert err < 2e-3, f"T={T} B={B} I={I} H={H}: max abs err {err}"

    # Full Seq2SeqModel forward (embedding -> encoder -> decoder -> linear ->
    # softmax -> transpose) with the Pallas encoder.
    key, kt, ke, kw, kb, kp = jax.random.split(key, 6)
    T2, B2, V, E, H2, C = 12, 5, 64, 16, 32, 6
    token_ids = jax.random.randint(kt, (T2, B2), 0, V)
    emb_table = jax.random.normal(ke, (V, E), dtype=jnp.float32)
    enc_params = make_params(kp, E, H2)
    w_out = 0.1 * jax.random.normal(kw, (C, 2 * H2), dtype=jnp.float32)
    b_out = 0.1 * jax.random.normal(kb, (C,), dtype=jnp.float32)
    probas = jax.block_until_ready(
        seq2seq_forward(token_ids, emb_table, enc_params, w_out, b_out))
    assert probas.shape == (B2, T2, C), probas.shape
    assert bool(jnp.all(jnp.isfinite(probas)))

    print("KERNEL_OK")
</pallas_src>

<mosaic_0001>
module attributes {stable_mosaic.version = 11 : i64} {
  func.func @_dgru_kernel(%arg0: i32, %arg1: memref<64x32xf32, #tpu.memory_space<vmem>>, %arg2: memref<64x32xf32, #tpu.memory_space<vmem>>, %arg3: memref<8x8x1xf32, #tpu.memory_space<vmem>>, %arg4: memref<8x8x1xf32, #tpu.memory_space<vmem>>, %arg5: memref<2x32x384xf32, #tpu.memory_space<vmem>>, %arg6: memref<2x128x384xf32, #tpu.memory_space<vmem>>, %arg7: memref<2x1x384xf32, #tpu.memory_space<vmem>>, %arg8: memref<2x1x128xf32, #tpu.memory_space<vmem>>, %arg9: memref<8x8x128xf32, #tpu.memory_space<vmem>>, %arg10: memref<8x8x128xf32, #tpu.memory_space<vmem>>, %arg11: memref<8x128xf32, #tpu.memory_space<vmem>>, %arg12: memref<8x128xf32, #tpu.memory_space<vmem>>, %arg13: memref<64x384xf32, #tpu.memory_space<vmem>>, %arg14: memref<64x384xf32, #tpu.memory_space<vmem>>) attributes {dimension_semantics = [#tpu.dimension_semantics<arbitrary>], iteration_bounds = array<i64: 2>, scalar_prefetch = 0 : i64, scratch_operands = 4 : i64, tpu.core_type = #tpu.core_type<tc>, window_params = [{transform_indices = @transform_0, window_bounds = array<i64: 64, 32>}, {transform_indices = @transform_1, window_bounds = array<i64: 64, 32>}, {transform_indices = @transform_2, window_bounds = array<i64: 8, 8, 1>}, {transform_indices = @transform_3, window_bounds = array<i64: 8, 8, 1>}, {pipeline_mode = #tpu.pipeline_mode<synchronous>, transform_indices = @transform_4, window_bounds = array<i64: 2, 32, 384>}, {pipeline_mode = #tpu.pipeline_mode<synchronous>, transform_indices = @transform_5, window_bounds = array<i64: 2, 128, 384>}, {pipeline_mode = #tpu.pipeline_mode<synchronous>, transform_indices = @transform_6, window_bounds = array<i64: 2, 1, 384>}, {pipeline_mode = #tpu.pipeline_mode<synchronous>, transform_indices = @transform_7, window_bounds = array<i64: 2, 1, 128>}, {transform_indices = @transform_8, window_bounds = array<i64: 8, 8, 128>}, {transform_indices = @transform_9, window_bounds = array<i64: 8, 8, 128>}]} {
    %c0_i32 = arith.constant 0 : i32
    %0 = arith.cmpi eq, %arg0, %c0_i32 : i32
    %1 = arith.extui %0 : i1 to i32
    %c0_i32_0 = arith.constant 0 : i32
    %2 = arith.cmpi ne, %1, %c0_i32_0 : i32
    scf.if %2 {
      %cst_209 = arith.constant 0.000000e+00 : f32
      %713 = vector.broadcast %cst_209 : f32 to vector<8x128xf32>
      %c0_210 = arith.constant 0 : index
      %c0_211 = arith.constant 0 : index
      %714 = vector.load %arg11[%c0_210, %c0_211] : memref<8x128xf32, #tpu.memory_space<vmem>>, vector<8x128xf32>
      tpu.vector_store %arg11[%c0_210, %c0_211], %713 {strides = array<i32>} : memref<8x128xf32, #tpu.memory_space<vmem>>, vector<8x128xf32>,
      %cst_212 = arith.constant 0.000000e+00 : f32
      %715 = vector.broadcast %cst_212 : f32 to vector<8x128xf32>
      %c0_213 = arith.constant 0 : index
      %c0_214 = arith.constant 0 : index
      %716 = vector.load %arg12[%c0_213, %c0_214] : memref<8x128xf32, #tpu.memory_space<vmem>>, vector<8x128xf32>
      tpu.vector_store %arg12[%c0_213, %c0_214], %715 {strides = array<i32>} : memref<8x128xf32, #tpu.memory_space<vmem>>, vector<8x128xf32>,
    } else {
    }
    %c0 = arith.constant 0 : index
    %c0_1 = arith.constant 0 : index
    %3 = vector.load %arg1[%c0, %c0_1] : memref<64x32xf32, #tpu.memory_space<vmem>>, vector<64x32xf32>
    %c0_2 = arith.constant 0 : index
    %c0_3 = arith.constant 0 : index
    %c0_4 = arith.constant 0 : index
    %4 = vector.load %arg5[%c0_2, %c0_3, %c0_4] : memref<2x32x384xf32, #tpu.memory_space<vmem>>, vector<1x32x384xf32>
    %5 = vector.shape_cast %4 : vector<1x32x384xf32> to vector<32x384xf32>
    %cst = arith.constant dense<0.000000e+00> : vector<64x384xf32>
    %6 = tpu.matmul %3, %5, %cst {dimension_numbers = #tpu.dot_dimension_numbers<[1], [0], [0], [1], [0, 0, 1, 1], [], []>} : vector<64x32xf32>, vector<32x384xf32>, vector<64x384xf32> -> vector<64x384xf32>
    %c0_5 = arith.constant 0 : index
    %c0_6 = arith.constant 0 : index
    %c0_7 = arith.constant 0 : index
    %7 = vector.load %arg7[%c0_5, %c0_6, %c0_7] : memref<2x1x384xf32, #tpu.memory_space<vmem>>, vector<1x1x384xf32>
    %8 = vector.shape_cast %7 : vector<1x1x384xf32> to vector<1x384xf32>
    %9 = vector.broadcast %8 : vector<1x384xf32> to vector<64x384xf32>
    %10 = arith.addf %6, %9 : vector<64x384xf32>
    %c0_8 = arith.constant 0 : index
    %c0_9 = arith.constant 0 : index
    %11 = vector.load %arg13[%c0_8, %c0_9] : memref<64x384xf32, #tpu.memory_space<vmem>>, vector<64x384xf32>
    tpu.vector_store %arg13[%c0_8, %c0_9], %10 {strides = array<i32>} : memref<64x384xf32, #tpu.memory_space<vmem>>, vector<64x384xf32>,
    %c0_10 = arith.constant 0 : index
    %c0_11 = arith.constant 0 : index
    %12 = vector.load %arg2[%c0_10, %c0_11] : memref<64x32xf32, #tpu.memory_space<vmem>>, vector<64x32xf32>
    %c1 = arith.constant 1 : index
    %c0_12 = arith.constant 0 : index
    %c0_13 = arith.constant 0 : index
    %13 = vector.load %arg5[%c1, %c0_12, %c0_13] : memref<2x32x384xf32, #tpu.memory_space<vmem>>, vector<1x32x384xf32>
    %14 = vector.shape_cast %13 : vector<1x32x384xf32> to vector<32x384xf32>
    %cst_14 = arith.constant dense<0.000000e+00> : vector<64x384xf32>
    %15 = tpu.matmul %12, %14, %cst_14 {dimension_numbers = #tpu.dot_dimension_numbers<[1], [0], [0], [1], [0, 0, 1, 1], [], []>} : vector<64x32xf32>, vector<32x384xf32>, vector<64x384xf32> -> vector<64x384xf32>
    %c1_15 = arith.constant 1 : index
    %c0_16 = arith.constant 0 : index
    %c0_17 = arith.constant 0 : index
    %16 = vector.load %arg7[%c1_15, %c0_16, %c0_17] : memref<2x1x384xf32, #tpu.memory_space<vmem>>, vector<1x1x384xf32>
    %17 = vector.shape_cast %16 : vector<1x1x384xf32> to vector<1x384xf32>
    %18 = vector.broadcast %17 : vector<1x384xf32> to vector<64x384xf32>
    %19 = arith.addf %15, %18 : vector<64x384xf32>
    %c0_18 = arith.constant 0 : index
    %c0_19 = arith.constant 0 : index
    %20 = vector.load %arg14[%c0_18, %c0_19] : memref<64x384xf32, #tpu.memory_space<vmem>>, vector<64x384xf32>
    tpu.vector_store %arg14[%c0_18, %c0_19], %19 {strides = array<i32>} : memref<64x384xf32, #tpu.memory_space<vmem>>, vector<64x384xf32>,
    %c0_20 = arith.constant 0 : index
    %c0_21 = arith.constant 0 : index
    %c0_22 = arith.constant 0 : index
    %21 = vector.load %arg6[%c0_20, %c0_21, %c0_22] : memref<2x128x384xf32, #tpu.memory_space<vmem>>, vector<1x128x384xf32>
    %22 = vector.shape_cast %21 : vector<1x128x384xf32> to vector<128x384xf32>
    %c1_23 = arith.constant 1 : index
    %c0_24 = arith.constant 0 : index
    %c0_25 = arith.constant 0 : index
    %23 = vector.load %arg6[%c1_23, %c0_24, %c0_25] : memref<2x128x384xf32, #tpu.memory_space<vmem>>, vector<1x128x384xf32>
    %24 = vector.shape_cast %23 : vector<1x128x384xf32> to vector<128x384xf32>
    %c0_26 = arith.constant 0 : index
    %c0_27 = arith.constant 0 : index
    %c0_28 = arith.constant 0 : index
    %25 = vector.load %arg8[%c0_26, %c0_27, %c0_28] : memref<2x1x128xf32, #tpu.memory_space<vmem>>, vector<1x1x128xf32>
    %26 = vector.shape_cast %25 : vector<1x1x128xf32> to vector<1x128xf32>
    %c1_29 = arith.constant 1 : index
    %c0_30 = arith.constant 0 : index
    %c0_31 = arith.constant 0 : index
    %27 = vector.load %arg8[%c1_29, %c0_30, %c0_31] : memref<2x1x128xf32, #tpu.memory_space<vmem>>, vector<1x1x128xf32>
    %28 = vector.shape_cast %27 : vector<1x1x128xf32> to vector<1x128xf32>
    %c0_32 = arith.constant 0 : index
    %c0_33 = arith.constant 0 : index
    %29 = vector.load %arg11[%c0_32, %c0_33] : memref<8x128xf32, #tpu.memory_space<vmem>>, vector<8x128xf32>
    %c0_34 = arith.constant 0 : index
    %c0_35 = arith.constant 0 : index
    %30 = vector.load %arg12[%c0_34, %c0_35] : memref<8x128xf32, #tpu.memory_space<vmem>>, vector<8x128xf32>
    %c0_i32_36 = arith.constant 0 : i32
    %31 = arith.index_cast %c0_i32_36 : i32 to index
    %c0_37 = arith.constant 0 : index
    %c0_38 = arith.constant 0 : index
    %32 = vector.load %arg3[%31, %c0_37, %c0_38] : memref<8x8x1xf32, #tpu.memory_space<vmem>>, vector<1x8x1xf32>
    %33 = vector.shape_cast %32 : vector<1x8x1xf32> to vector<8x1xf32>
    %34 = vector.broadcast %33 : vector<8x1xf32> to vector<8x128xf32>
    %35 = arith.mulf %34, %29 : vector<8x128xf32>
    %cst_39 = arith.constant dense<0.000000e+00> : vector<8x384xf32>
    %36 = tpu.matmul %35, %22, %cst_39 {dimension_numbers = #tpu.dot_dimension_numbers<[1], [0], [0], [1], [0, 0, 1, 1], [], []>} : vector<8x128xf32>, vector<128x384xf32>, vector<8x384xf32> -> vector<8x384xf32>
    %c8_i32 = arith.constant 8 : i32
    %37 = arith.muli %c0_i32_36, %c8_i32 : i32
    %38 = tpu.assume_multiple %37, 8 : i32
    %39 = arith.index_cast %38 : i32 to index
    %c0_40 = arith.constant 0 : index
    %40 = vector.load %arg13[%39, %c0_40] : memref<64x384xf32, #tpu.memory_space<vmem>>, vector<8x384xf32>
    %41 = vector.extract_strided_slice %40 {offsets = [0, 0], sizes = [8, 128], strides = [1, 1]} : vector<8x384xf32> to vector<8x128xf32>
    %42 = vector.extract_strided_slice %36 {offsets = [0, 0], sizes = [8, 128], strides = [1, 1]} : vector<8x384xf32> to vector<8x128xf32>
    %43 = arith.addf %41, %42 : vector<8x128xf32>
    %44 = arith.negf %43 : vector<8x128xf32>
    %45 = math.exp %44 : vector<8x128xf32>
    %cst_41 = arith.constant 1.000000e+00 : f32
    %46 = vector.broadcast %cst_41 : f32 to vector<8x128xf32>
    %47 = arith.addf %46, %45 : vector<8x128xf32>
    %48 = arith.divf %46, %47 : vector<8x128xf32>
    %49 = vector.extract_strided_slice %40 {offsets = [0, 128], sizes = [8, 128], strides = [1, 1]} : vector<8x384xf32> to vector<8x128xf32>
    %50 = vector.extract_strided_slice %36 {offsets = [0, 128], sizes = [8, 128], strides = [1, 1]} : vector<8x384xf32> to vector<8x128xf32>
    %51 = arith.addf %49, %50 : vector<8x128xf32>
    %52 = arith.negf %51 : vector<8x128xf32>
    %53 = math.exp %52 : vector<8x128xf32>
    %cst_42 = arith.constant 1.000000e+00 : f32
    %54 = vector.broadcast %cst_42 : f32 to vector<8x128xf32>
    %55 = arith.addf %54, %53 : vector<8x128xf32>
    %56 = arith.divf %54, %55 : vector<8x128xf32>
    %57 = vector.extract_strided_slice %40 {offsets = [0, 256], sizes = [8, 128], strides = [1, 1]} : vector<8x384xf32> to vector<8x128xf32>
    %58 = vector.extract_strided_slice %36 {offsets = [0, 256], sizes = [8, 128], strides = [1, 1]} : vector<8x384xf32> to vector<8x128xf32>
    %59 = vector.broadcast %26 : vector<1x128xf32> to vector<8x128xf32>
    %60 = arith.addf %58, %59 : vector<8x128xf32>
    %61 = arith.mulf %48, %60 : vector<8x128xf32>
    %62 = arith.addf %57, %61 : vector<8x128xf32>
    %63 = math.tanh %62 : vector<8x128xf32>
    %cst_43 = arith.constant 1.000000e+00 : f32
    %64 = vector.broadcast %cst_43 : f32 to vector<8x128xf32>
    %65 = arith.subf %64, %56 : vector<8x128xf32>
    %66 = arith.mulf %65, %63 : vector<8x128xf32>
    %67 = arith.mulf %56, %35 : vector<8x128xf32>
    %68 = arith.addf %66, %67 : vector<8x128xf32>
    %69 = arith.index_cast %c0_i32_36 : i32 to index
    %c0_44 = arith.constant 0 : index
    %c0_45 = arith.constant 0 : index
    %70 = vector.load %arg9[%69, %c0_44, %c0_45] : memref<8x8x128xf32, #tpu.memory_space<vmem>>, vector<1x8x128xf32>
    %71 = vector.shape_cast %70 : vector<1x8x128xf32> to vector<8x128xf32>
    %72 = vector.shape_cast %68 : vector<8x128xf32> to vector<1x8x128xf32>
    tpu.vector_store %arg9[%69, %c0_44, %c0_45], %72 {strides = array<i32>} : memref<8x8x128xf32, #tpu.memory_space<vmem>>, vector<1x8x128xf32>,
    %c7_i32 = arith.constant 7 : i32
    %73 = arith.subi %c7_i32, %c0_i32_36 : i32
    %74 = arith.index_cast %73 : i32 to index
    %c0_46 = arith.constant 0 : index
    %c0_47 = arith.constant 0 : index
    %75 = vector.load %arg4[%74, %c0_46, %c0_47] : memref<8x8x1xf32, #tpu.memory_space<vmem>>, vector<1x8x1xf32>
    %76 = vector.shape_cast %75 : vector<1x8x1xf32> to vector<8x1xf32>
    %77 = vector.broadcast %76 : vector<8x1xf32> to vector<8x128xf32>
    %78 = arith.mulf %77, %30 : vector<8x128xf32>
    %cst_48 = arith.constant dense<0.000000e+00> : vector<8x384xf32>
    %79 = tpu.matmul %78, %24, %cst_48 {dimension_numbers = #tpu.dot_dimension_numbers<[1], [0], [0], [1], [0, 0, 1, 1], [], []>} : vector<8x128xf32>, vector<128x384xf32>, vector<8x384xf32> -> vector<8x384xf32>
    %c8_i32_49 = arith.constant 8 : i32
    %80 = arith.muli %73, %c8_i32_49 : i32
    %81 = tpu.assume_multiple %80, 8 : i32
    %82 = arith.index_cast %81 : i32 to index
    %c0_50 = arith.constant 0 : index
    %83 = vector.load %arg14[%82, %c0_50] : memref<64x384xf32, #tpu.memory_space<vmem>>, vector<8x384xf32>
    %84 = vector.extract_strided_slice %83 {offsets = [0, 0], sizes = [8, 128], strides = [1, 1]} : vector<8x384xf32> to vector<8x128xf32>
    %85 = vector.extract_strided_slice %79 {offsets = [0, 0], sizes = [8, 128], strides = [1, 1]} : vector<8x384xf32> to vector<8x128xf32>
    %86 = arith.addf %84, %85 : vector<8x128xf32>
    %87 = arith.negf %86 : vector<8x128xf32>
    %88 = math.exp %87 : vector<8x128xf32>
    %cst_51 = arith.constant 1.000000e+00 : f32
    %89 = vector.broadcast %cst_51 : f32 to vector<8x128xf32>
    %90 = arith.addf %89, %88 : vector<8x128xf32>
    %91 = arith.divf %89, %90 : vector<8x128xf32>
    %92 = vector.extract_strided_slice %83 {offsets = [0, 128], sizes = [8, 128], strides = [1, 1]} : vector<8x384xf32> to vector<8x128xf32>
    %93 = vector.extract_strided_slice %79 {offsets = [0, 128], sizes = [8, 128], strides = [1, 1]} : vector<8x384xf32> to vector<8x128xf32>
    %94 = arith.addf %92, %93 : vector<8x128xf32>
    %95 = arith.negf %94 : vector<8x128xf32>
    %96 = math.exp %95 : vector<8x128xf32>
    %cst_52 = arith.constant 1.000000e+00 : f32
    %97 = vector.broadcast %cst_52 : f32 to vector<8x128xf32>
    %98 = arith.addf %97, %96 : vector<8x128xf32>
    %99 = arith.divf %97, %98 : vector<8x128xf32>
    %100 = vector.extract_strided_slice %83 {offsets = [0, 256], sizes = [8, 128], strides = [1, 1]} : vector<8x384xf32> to vector<8x128xf32>
    %101 = vector.extract_strided_slice %79 {offsets = [0, 256], sizes = [8, 128], strides = [1, 1]} : vector<8x384xf32> to vector<8x128xf32>
    %102 = vector.broadcast %28 : vector<1x128xf32> to vector<8x128xf32>
    %103 = arith.addf %101, %102 : vector<8x128xf32>
    %104 = arith.mulf %91, %103 : vector<8x128xf32>
    %105 = arith.addf %100, %104 : vector<8x128xf32>
    %106 = math.tanh %105 : vector<8x128xf32>
    %cst_53 = arith.constant 1.000000e+00 : f32
    %107 = vector.broadcast %cst_53 : f32 to vector<8x128xf32>
    %108 = arith.subf %107, %99 : vector<8x128xf32>
    %109 = arith.mulf %108, %106 : vector<8x128xf32>
    %110 = arith.mulf %99, %78 : vector<8x128xf32>
    %111 = arith.addf %109, %110 : vector<8x128xf32>
    %112 = arith.index_cast %73 : i32 to index
    %c0_54 = arith.constant 0 : index
    %c0_55 = arith.constant 0 : index
    %113 = vector.load %arg10[%112, %c0_54, %c0_55] : memref<8x8x128xf32, #tpu.memory_space<vmem>>, vector<1x8x128xf32>
    %114 = vector.shape_cast %113 : vector<1x8x128xf32> to vector<8x128xf32>
    %115 = vector.shape_cast %111 : vector<8x128xf32> to vector<1x8x128xf32>
    tpu.vector_store %arg10[%112, %c0_54, %c0_55], %115 {strides = array<i32>} : memref<8x8x128xf32, #tpu.memory_space<vmem>>, vector<1x8x128xf32>,
    %c1_i32 = arith.constant 1 : i32
    %116 = arith.index_cast %c1_i32 : i32 to index
    %c0_56 = arith.constant 0 : index
    %c0_57 = arith.constant 0 : index
    %117 = vector.load %arg3[%116, %c0_56, %c0_57] : memref<8x8x1xf32, #tpu.memory_space<vmem>>, vector<1x8x1xf32>
    %118 = vector.shape_cast %117 : vector<1x8x1xf32> to vector<8x1xf32>
    %119 = vector.broadcast %118 : vector<8x1xf32> to vector<8x128xf32>
    %120 = arith.mulf %119, %68 : vector<8x128xf32>
    %cst_58 = arith.constant dense<0.000000e+00> : vector<8x384xf32>
    %121 = tpu.matmul %120, %22, %cst_58 {dimension_numbers = #tpu.dot_dimension_numbers<[1], [0], [0], [1], [0, 0, 1, 1], [], []>} : vector<8x128xf32>, vector<128x384xf32>, vector<8x384xf32> -> vector<8x384xf32>
    %c8_i32_59 = arith.constant 8 : i32
    %122 = arith.muli %c1_i32, %c8_i32_59 : i32
    %123 = tpu.assume_multiple %122, 8 : i32
    %124 = arith.index_cast %123 : i32 to index
    %c0_60 = arith.constant 0 : index
    %125 = vector.load %arg13[%124, %c0_60] : memref<64x384xf32, #tpu.memory_space<vmem>>, vector<8x384xf32>
    %126 = vector.extract_strided_slice %125 {offsets = [0, 0], sizes = [8, 128], strides = [1, 1]} : vector<8x384xf32> to vector<8x128xf32>
    %127 = vector.extract_strided_slice %121 {offsets = [0, 0], sizes = [8, 128], strides = [1, 1]} : vector<8x384xf32> to vector<8x128xf32>
    %128 = arith.addf %126, %127 : vector<8x128xf32>
    %129 = arith.negf %128 : vector<8x128xf32>
    %130 = math.exp %129 : vector<8x128xf32>
    %cst_61 = arith.constant 1.000000e+00 : f32
    %131 = vector.broadcast %cst_61 : f32 to vector<8x128xf32>
    %132 = arith.addf %131, %130 : vector<8x128xf32>
    %133 = arith.divf %131, %132 : vector<8x128xf32>
    %134 = vector.extract_strided_slice %125 {offsets = [0, 128], sizes = [8, 128], strides = [1, 1]} : vector<8x384xf32> to vector<8x128xf32>
    %135 = vector.extract_strided_slice %121 {offsets = [0, 128], sizes = [8, 128], strides = [1, 1]} : vector<8x384xf32> to vector<8x128xf32>
    %136 = arith.addf %134, %135 : vector<8x128xf32>
    %137 = arith.negf %136 : vector<8x128xf32>
    %138 = math.exp %137 : vector<8x128xf32>
    %cst_62 = arith.constant 1.000000e+00 : f32
    %139 = vector.broadcast %cst_62 : f32 to vector<8x128xf32>
    %140 = arith.addf %139, %138 : vector<8x128xf32>
    %141 = arith.divf %139, %140 : vector<8x128xf32>
    %142 = vector.extract_strided_slice %125 {offsets = [0, 256], sizes = [8, 128], strides = [1, 1]} : vector<8x384xf32> to vector<8x128xf32>
    %143 = vector.extract_strided_slice %121 {offsets = [0, 256], sizes = [8, 128], strides = [1, 1]} : vector<8x384xf32> to vector<8x128xf32>
    %144 = vector.broadcast %26 : vector<1x128xf32> to vector<8x128xf32>
    %145 = arith.addf %143, %144 : vector<8x128xf32>
    %146 = arith.mulf %133, %145 : vector<8x128xf32>
    %147 = arith.addf %142, %146 : vector<8x128xf32>
    %148 = math.tanh %147 : vector<8x128xf32>
    %cst_63 = arith.constant 1.000000e+00 : f32
    %149 = vector.broadcast %cst_63 : f32 to vector<8x128xf32>
    %150 = arith.subf %149, %141 : vector<8x128xf32>
    %151 = arith.mulf %150, %148 : vector<8x128xf32>
    %152 = arith.mulf %141, %120 : vector<8x128xf32>
    %153 = arith.addf %151, %152 : vector<8x128xf32>
    %154 = arith.index_cast %c1_i32 : i32 to index
    %c0_64 = arith.constant 0 : index
    %c0_65 = arith.constant 0 : index
    %155 = vector.load %arg9[%154, %c0_64, %c0_65] : memref<8x8x128xf32, #tpu.memory_space<vmem>>, vector<1x8x128xf32>
    %156 = vector.shape_cast %155 : vector<1x8x128xf32> to vector<8x128xf32>
    %157 = vector.shape_cast %153 : vector<8x128xf32> to vector<1x8x128xf32>
    tpu.vector_store %arg9[%154, %c0_64, %c0_65], %157 {strides = array<i32>} : memref<8x8x128xf32, #tpu.memory_space<vmem>>, vector<1x8x128xf32>,
    %c7_i32_66 = arith.constant 7 : i32
    %158 = arith.subi %c7_i32_66, %c1_i32 : i32
    %159 = arith.index_cast %158 : i32 to index
    %c0_67 = arith.constant 0 : index
    %c0_68 = arith.constant 0 : index
    %160 = vector.load %arg4[%159, %c0_67, %c0_68] : memref<8x8x1xf32, #tpu.memory_space<vmem>>, vector<1x8x1xf32>
    %161 = vector.shape_cast %160 : vector<1x8x1xf32> to vector<8x1xf32>
    %162 = vector.broadcast %161 : vector<8x1xf32> to vector<8x128xf32>
    %163 = arith.mulf %162, %111 : vector<8x128xf32>
    %cst_69 = arith.constant dense<0.000000e+00> : vector<8x384xf32>
    %164 = tpu.matmul %163, %24, %cst_69 {dimension_numbers = #tpu.dot_dimension_numbers<[1], [0], [0], [1], [0, 0, 1, 1], [], []>} : vector<8x128xf32>, vector<128x384xf32>, vector<8x384xf32> -> vector<8x384xf32>
    %c8_i32_70 = arith.constant 8 : i32
    %165 = arith.muli %158, %c8_i32_70 : i32
    %166 = tpu.assume_multiple %165, 8 : i32
    %167 = arith.index_cast %166 : i32 to index
    %c0_71 = arith.constant 0 : index
    %168 = vector.load %arg14[%167, %c0_71] : memref<64x384xf32, #tpu.memory_space<vmem>>, vector<8x384xf32>
    %169 = vector.extract_strided_slice %168 {offsets = [0, 0], sizes = [8, 128], strides = [1, 1]} : vector<8x384xf32> to vector<8x128xf32>
    %170 = vector.extract_strided_slice %164 {offsets = [0, 0], sizes = [8, 128], strides = [1, 1]} : vector<8x384xf32> to vector<8x128xf32>
    %171 = arith.addf %169, %170 : vector<8x128xf32>
    %172 = arith.negf %171 : vector<8x128xf32>
    %173 = math.exp %172 : vector<8x128xf32>
    %cst_72 = arith.constant 1.000000e+00 : f32
    %174 = vector.broadcast %cst_72 : f32 to vector<8x128xf32>
    %175 = arith.addf %174, %173 : vector<8x128xf32>
    %176 = arith.divf %174, %175 : vector<8x128xf32>
    %177 = vector.extract_strided_slice %168 {offsets = [0, 128], sizes = [8, 128], strides = [1, 1]} : vector<8x384xf32> to vector<8x128xf32>
    %178 = vector.extract_strided_slice %164 {offsets = [0, 128], sizes = [8, 128], strides = [1, 1]} : vector<8x384xf32> to vector<8x128xf32>
    %179 = arith.addf %177, %178 : vector<8x128xf32>
    %180 = arith.negf %179 : vector<8x128xf32>
    %181 = math.exp %180 : vector<8x128xf32>
    %cst_73 = arith.constant 1.000000e+00 : f32
    %182 = vector.broadcast %cst_73 : f32 to vector<8x128xf32>
    %183 = arith.addf %182, %181 : vector<8x128xf32>
    %184 = arith.divf %182, %183 : vector<8x128xf32>
    %185 = vector.extract_strided_slice %168 {offsets = [0, 256], sizes = [8, 128], strides = [1, 1]} : vector<8x384xf32> to vector<8x128xf32>
    %186 = vector.extract_strided_slice %164 {offsets = [0, 256], sizes = [8, 128], strides = [1, 1]} : vector<8x384xf32> to vector<8x128xf32>
    %187 = vector.broadcast %28 : vector<1x128xf32> to vector<8x128xf32>
    %188 = arith.addf %186, %187 : vector<8x128xf32>
    %189 = arith.mulf %176, %188 : vector<8x128xf32>
    %190 = arith.addf %185, %189 : vector<8x128xf32>
    %191 = math.tanh %190 : vector<8x128xf32>
    %cst_74 = arith.constant 1.000000e+00 : f32
    %192 = vector.broadcast %cst_74 : f32 to vector<8x128xf32>
    %193 = arith.subf %192, %184 : vector<8x128xf32>
    %194 = arith.mulf %193, %191 : vector<8x128xf32>
    %195 = arith.mulf %184, %163 : vector<8x128xf32>
    %196 = arith.addf %194, %195 : vector<8x128xf32>
    %197 = arith.index_cast %158 : i32 to index
    %c0_75 = arith.constant 0 : index
    %c0_76 = arith.constant 0 : index
    %198 = vector.load %arg10[%197, %c0_75, %c0_76] : memref<8x8x128xf32, #tpu.memory_space<vmem>>, vector<1x8x128xf32>
    %199 = vector.shape_cast %198 : vector<1x8x128xf32> to vector<8x128xf32>
    %200 = vector.shape_cast %196 : vector<8x128xf32> to vector<1x8x128xf32>
    tpu.vector_store %arg10[%197, %c0_75, %c0_76], %200 {strides = array<i32>} : memref<8x8x128xf32, #tpu.memory_space<vmem>>, vector<1x8x128xf32>,
    %c2_i32 = arith.constant 2 : i32
    %201 = arith.index_cast %c2_i32 : i32 to index
    %c0_77 = arith.constant 0 : index
    %c0_78 = arith.constant 0 : index
    %202 = vector.load %arg3[%201, %c0_77, %c0_78] : memref<8x8x1xf32, #tpu.memory_space<vmem>>, vector<1x8x1xf32>
    %203 = vector.shape_cast %202 : vector<1x8x1xf32> to vector<8x1xf32>
    %204 = vector.broadcast %203 : vector<8x1xf32> to vector<8x128xf32>
    %205 = arith.mulf %204, %153 : vector<8x128xf32>
    %cst_79 = arith.constant dense<0.000000e+00> : vector<8x384xf32>
    %206 = tpu.matmul %205, %22, %cst_79 {dimension_numbers = #tpu.dot_dimension_numbers<[1], [0], [0], [1], [0, 0, 1, 1], [], []>} : vector<8x128xf32>, vector<128x384xf32>, vector<8x384xf32> -> vector<8x384xf32>
    %c8_i32_80 = arith.constant 8 : i32
    %207 = arith.muli %c2_i32, %c8_i32_80 : i32
    %208 = tpu.assume_multiple %207, 8 : i32
    %209 = arith.index_cast %208 : i32 to index
    %c0_81 = arith.constant 0 : index
    %210 = vector.load %arg13[%209, %c0_81] : memref<64x384xf32, #tpu.memory_space<vmem>>, vector<8x384xf32>
    %211 = vector.extract_strided_slice %210 {offsets = [0, 0], sizes = [8, 128], strides = [1, 1]} : vector<8x384xf32> to vector<8x128xf32>
    %212 = vector.extract_strided_slice %206 {offsets = [0, 0], sizes = [8, 128], strides = [1, 1]} : vector<8x384xf32> to vector<8x128xf32>
    %213 = arith.addf %211, %212 : vector<8x128xf32>
    %214 = arith.negf %213 : vector<8x128xf32>
    %215 = math.exp %214 : vector<8x128xf32>
    %cst_82 = arith.constant 1.000000e+00 : f32
    %216 = vector.broadcast %cst_82 : f32 to vector<8x128xf32>
    %217 = arith.addf %216, %215 : vector<8x128xf32>
    %218 = arith.divf %216, %217 : vector<8x128xf32>
    %219 = vector.extract_strided_slice %210 {offsets = [0, 128], sizes = [8, 128], strides = [1, 1]} : vector<8x384xf32> to vector<8x128xf32>
    %220 = vector.extract_strided_slice %206 {offsets = [0, 128], sizes = [8, 128], strides = [1, 1]} : vector<8x384xf32> to vector<8x128xf32>
    %221 = arith.addf %219, %220 : vector<8x128xf32>
    %222 = arith.negf %221 : vector<8x128xf32>
    %223 = math.exp %222 : vector<8x128xf32>
    %cst_83 = arith.constant 1.000000e+00 : f32
    %224 = vector.broadcast %cst_83 : f32 to vector<8x128xf32>
    %225 = arith.addf %224, %223 : vector<8x128xf32>
    %226 = arith.divf %224, %225 : vector<8x128xf32>
    %227 = vector.extract_strided_slice %210 {offsets = [0, 256], sizes = [8, 128], strides = [1, 1]} : vector<8x384xf32> to vector<8x128xf32>
    %228 = vector.extract_strided_slice %206 {offsets = [0, 256], sizes = [8, 128], strides = [1, 1]} : vector<8x384xf32> to vector<8x128xf32>
    %229 = vector.broadcast %26 : vector<1x128xf32> to vector<8x128xf32>
    %230 = arith.addf %228, %229 : vector<8x128xf32>
    %231 = arith.mulf %218, %230 : vector<8x128xf32>
    %232 = arith.addf %227, %231 : vector<8x128xf32>
    %233 = math.tanh %232 : vector<8x128xf32>
    %cst_84 = arith.constant 1.000000e+00 : f32
    %234 = vector.broadcast %cst_84 : f32 to vector<8x128xf32>
    %235 = arith.subf %234, %226 : vector<8x128xf32>
    %236 = arith.mulf %235, %233 : vector<8x128xf32>
    %237 = arith.mulf %226, %205 : vector<8x128xf32>
    %238 = arith.addf %236, %237 : vector<8x128xf32>
    %239 = arith.index_cast %c2_i32 : i32 to index
    %c0_85 = arith.constant 0 : index
    %c0_86 = arith.constant 0 : index
    %240 = vector.load %arg9[%239, %c0_85, %c0_86] : memref<8x8x128xf32, #tpu.memory_space<vmem>>, vector<1x8x128xf32>
    %241 = vector.shape_cast %240 : vector<1x8x128xf32> to vector<8x128xf32>
    %242 = vector.shape_cast %238 : vector<8x128xf32> to vector<1x8x128xf32>
    tpu.vector_store %arg9[%239, %c0_85, %c0_86], %242 {strides = array<i32>} : memref<8x8x128xf32, #tpu.memory_space<vmem>>, vector<1x8x128xf32>,
    %c7_i32_87 = arith.constant 7 : i32
    %243 = arith.subi %c7_i32_87, %c2_i32 : i32
    %244 = arith.index_cast %243 : i32 to index
    %c0_88 = arith.constant 0 : index
    %c0_89 = arith.constant 0 : index
    %245 = vector.load %arg4[%244, %c0_88, %c0_89] : memref<8x8x1xf32, #tpu.memory_space<vmem>>, vector<1x8x1xf32>
    %246 = vector.shape_cast %245 : vector<1x8x1xf32> to vector<8x1xf32>
    %247 = vector.broadcast %246 : vector<8x1xf32> to vector<8x128xf32>
    %248 = arith.mulf %247, %196 : vector<8x128xf32>
    %cst_90 = arith.constant dense<0.000000e+00> : vector<8x384xf32>
    %249 = tpu.matmul %248, %24, %cst_90 {dimension_numbers = #tpu.dot_dimension_numbers<[1], [0], [0], [1], [0, 0, 1, 1], [], []>} : vector<8x128xf32>, vector<128x384xf32>, vector<8x384xf32> -> vector<8x384xf32>
    %c8_i32_91 = arith.constant 8 : i32
    %250 = arith.muli %243, %c8_i32_91 : i32
    %251 = tpu.assume_multiple %250, 8 : i32
    %252 = arith.index_cast %251 : i32 to index
    %c0_92 = arith.constant 0 : index
    %253 = vector.load %arg14[%252, %c0_92] : memref<64x384xf32, #tpu.memory_space<vmem>>, vector<8x384xf32>
    %254 = vector.extract_strided_slice %253 {offsets = [0, 0], sizes = [8, 128], strides = [1, 1]} : vector<8x384xf32> to vector<8x128xf32>
    %255 = vector.extract_strided_slice %249 {offsets = [0, 0], sizes = [8, 128], strides = [1, 1]} : vector<8x384xf32> to vector<8x128xf32>
    %256 = arith.addf %254, %255 : vector<8x128xf32>
    %257 = arith.negf %256 : vector<8x128xf32>
    %258 = math.exp %257 : vector<8x128xf32>
    %cst_93 = arith.constant 1.000000e+00 : f32
    %259 = vector.broadcast %cst_93 : f32 to vector<8x128xf32>
    %260 = arith.addf %259, %258 : vector<8x128xf32>
    %261 = arith.divf %259, %260 : vector<8x128xf32>
    %262 = vector.extract_strided_slice %253 {offsets = [0, 128], sizes = [8, 128], strides = [1, 1]} : vector<8x384xf32> to vector<8x128xf32>
    %263 = vector.extract_strided_slice %249 {offsets = [0, 128], sizes = [8, 128], strides = [1, 1]} : vector<8x384xf32> to vector<8x128xf32>
    %264 = arith.addf %262, %263 : vector<8x128xf32>
    %265 = arith.negf %264 : vector<8x128xf32>
    %266 = math.exp %265 : vector<8x128xf32>
    %cst_94 = arith.constant 1.000000e+00 : f32
    %267 = vector.broadcast %cst_94 : f32 to vector<8x128xf32>
    %268 = arith.addf %267, %266 : vector<8x128xf32>
    %269 = arith.divf %267, %268 : vector<8x128xf32>
    %270 = vector.extract_strided_slice %253 {offsets = [0, 256], sizes = [8, 128], strides = [1, 1]} : vector<8x384xf32> to vector<8x128xf32>
    %271 = vector.extract_strided_slice %249 {offsets = [0, 256], sizes = [8, 128], strides = [1, 1]} : vector<8x384xf32> to vector<8x128xf32>
    %272 = vector.broadcast %28 : vector<1x128xf32> to vector<8x128xf32>
    %273 = arith.addf %271, %272 : vector<8x128xf32>
    %274 = arith.mulf %261, %273 : vector<8x128xf32>
    %275 = arith.addf %270, %274 : vector<8x128xf32>
    %276 = math.tanh %275 : vector<8x128xf32>
    %cst_95 = arith.constant 1.000000e+00 : f32
    %277 = vector.broadcast %cst_95 : f32 to vector<8x128xf32>
    %278 = arith.subf %277, %269 : vector<8x128xf32>
    %279 = arith.mulf %278, %276 : vector<8x128xf32>
    %280 = arith.mulf %269, %248 : vector<8x128xf32>
    %281 = arith.addf %279, %280 : vector<8x128xf32>
    %282 = arith.index_cast %243 : i32 to index
    %c0_96 = arith.constant 0 : index
    %c0_97 = arith.constant 0 : index
    %283 = vector.load %arg10[%282, %c0_96, %c0_97] : memref<8x8x128xf32, #tpu.memory_space<vmem>>, vector<1x8x128xf32>
    %284 = vector.shape_cast %283 : vector<1x8x128xf32> to vector<8x128xf32>
    %285 = vector.shape_cast %281 : vector<8x128xf32> to vector<1x8x128xf32>
    tpu.vector_store %arg10[%282, %c0_96, %c0_97], %285 {strides = array<i32>} : memref<8x8x128xf32, #tpu.memory_space<vmem>>, vector<1x8x128xf32>,
    %c3_i32 = arith.constant 3 : i32
    %286 = arith.index_cast %c3_i32 : i32 to index
    %c0_98 = arith.constant 0 : index
    %c0_99 = arith.constant 0 : index
    %287 = vector.load %arg3[%286, %c0_98, %c0_99] : memref<8x8x1xf32, #tpu.memory_space<vmem>>, vector<1x8x1xf32>
    %288 = vector.shape_cast %287 : vector<1x8x1xf32> to vector<8x1xf32>
    %289 = vector.broadcast %288 : vector<8x1xf32> to vector<8x128xf32>
    %290 = arith.mulf %289, %238 : vector<8x128xf32>
    %cst_100 = arith.constant dense<0.000000e+00> : vector<8x384xf32>
    %291 = tpu.matmul %290, %22, %cst_100 {dimension_numbers = #tpu.dot_dimension_numbers<[1], [0], [0], [1], [0, 0, 1, 1], [], []>} : vector<8x128xf32>, vector<128x384xf32>, vector<8x384xf32> -> vector<8x384xf32>
    %c8_i32_101 = arith.constant 8 : i32
    %292 = arith.muli %c3_i32, %c8_i32_101 : i32
    %293 = tpu.assume_multiple %292, 8 : i32
    %294 = arith.index_cast %293 : i32 to index
    %c0_102 = arith.constant 0 : index
    %295 = vector.load %arg13[%294, %c0_102] : memref<64x384xf32, #tpu.memory_space<vmem>>, vector<8x384xf32>
    %296 = vector.extract_strided_slice %295 {offsets = [0, 0], sizes = [8, 128], strides = [1, 1]} : vector<8x384xf32> to vector<8x128xf32>
    %297 = vector.extract_strided_slice %291 {offsets = [0, 0], sizes = [8, 128], strides = [1, 1]} : vector<8x384xf32> to vector<8x128xf32>
    %298 = arith.addf %296, %297 : vector<8x128xf32>
    %299 = arith.negf %298 : vector<8x128xf32>
    %300 = math.exp %299 : vector<8x128xf32>
    %cst_103 = arith.constant 1.000000e+00 : f32
    %301 = vector.broadcast %cst_103 : f32 to vector<8x128xf32>
    %302 = arith.addf %301, %300 : vector<8x128xf32>
    %303 = arith.divf %301, %302 : vector<8x128xf32>
    %304 = vector.extract_strided_slice %295 {offsets = [0, 128], sizes = [8, 128], strides = [1, 1]} : vector<8x384xf32> to vector<8x128xf32>
    %305 = vector.extract_strided_slice %291 {offsets = [0, 128], sizes = [8, 128], strides = [1, 1]} : vector<8x384xf32> to vector<8x128xf32>
    %306 = arith.addf %304, %305 : vector<8x128xf32>
    %307 = arith.negf %306 : vector<8x128xf32>
    %308 = math.exp %307 : vector<8x128xf32>
    %cst_104 = arith.constant 1.000000e+00 : f32
    %309 = vector.broadcast %cst_104 : f32 to vector<8x128xf32>
    %310 = arith.addf %309, %308 : vector<8x128xf32>
    %311 = arith.divf %309, %310 : vector<8x128xf32>
    %312 = vector.extract_strided_slice %295 {offsets = [0, 256], sizes = [8, 128], strides = [1, 1]} : vector<8x384xf32> to vector<8x128xf32>
    %313 = vector.extract_strided_slice %291 {offsets = [0, 256], sizes = [8, 128], strides = [1, 1]} : vector<8x384xf32> to vector<8x128xf32>
    %314 = vector.broadcast %26 : vector<1x128xf32> to vector<8x128xf32>
    %315 = arith.addf %313, %314 : vector<8x128xf32>
    %316 = arith.mulf %303, %315 : vector<8x128xf32>
    %317 = arith.addf %312, %316 : vector<8x128xf32>
    %318 = math.tanh %317 : vector<8x128xf32>
    %cst_105 = arith.constant 1.000000e+00 : f32
    %319 = vector.broadcast %cst_105 : f32 to vector<8x128xf32>
    %320 = arith.subf %319, %311 : vector<8x128xf32>
    %321 = arith.mulf %320, %318 : vector<8x128xf32>
    %322 = arith.mulf %311, %290 : vector<8x128xf32>
    %323 = arith.addf %321, %322 : vector<8x128xf32>
    %324 = arith.index_cast %c3_i32 : i32 to index
    %c0_106 = arith.constant 0 : index
    %c0_107 = arith.constant 0 : index
    %325 = vector.load %arg9[%324, %c0_106, %c0_107] : memref<8x8x128xf32, #tpu.memory_space<vmem>>, vector<1x8x128xf32>
    %326 = vector.shape_cast %325 : vector<1x8x128xf32> to vector<8x128xf32>
    %327 = vector.shape_cast %323 : vector<8x128xf32> to vector<1x8x128xf32>
    tpu.vector_store %arg9[%324, %c0_106, %c0_107], %327 {strides = array<i32>} : memref<8x8x128xf32, #tpu.memory_space<vmem>>, vector<1x8x128xf32>,
    %c7_i32_108 = arith.constant 7 : i32
    %328 = arith.subi %c7_i32_108, %c3_i32 : i32
    %329 = arith.index_cast %328 : i32 to index
    %c0_109 = arith.constant 0 : index
    %c0_110 = arith.constant 0 : index
    %330 = vector.load %arg4[%329, %c0_109, %c0_110] : memref<8x8x1xf32, #tpu.memory_space<vmem>>, vector<1x8x1xf32>
    %331 = vector.shape_cast %330 : vector<1x8x1xf32> to vector<8x1xf32>
    %332 = vector.broadcast %331 : vector<8x1xf32> to vector<8x128xf32>
    %333 = arith.mulf %332, %281 : vector<8x128xf32>
    %cst_111 = arith.constant dense<0.000000e+00> : vector<8x384xf32>
    %334 = tpu.matmul %333, %24, %cst_111 {dimension_numbers = #tpu.dot_dimension_numbers<[1], [0], [0], [1], [0, 0, 1, 1], [], []>} : vector<8x128xf32>, vector<128x384xf32>, vector<8x384xf32> -> vector<8x384xf32>
    %c8_i32_112 = arith.constant 8 : i32
    %335 = arith.muli %328, %c8_i32_112 : i32
    %336 = tpu.assume_multiple %335, 8 : i32
    %337 = arith.index_cast %336 : i32 to index
    %c0_113 = arith.constant 0 : index
    %338 = vector.load %arg14[%337, %c0_113] : memref<64x384xf32, #tpu.memory_space<vmem>>, vector<8x384xf32>
    %339 = vector.extract_strided_slice %338 {offsets = [0, 0], sizes = [8, 128], strides = [1, 1]} : vector<8x384xf32> to vector<8x128xf32>
    %340 = vector.extract_strided_slice %334 {offsets = [0, 0], sizes = [8, 128], strides = [1, 1]} : vector<8x384xf32> to vector<8x128xf32>
    %341 = arith.addf %339, %340 : vector<8x128xf32>
    %342 = arith.negf %341 : vector<8x128xf32>
    %343 = math.exp %342 : vector<8x128xf32>
    %cst_114 = arith.constant 1.000000e+00 : f32
    %344 = vector.broadcast %cst_114 : f32 to vector<8x128xf32>
    %345 = arith.addf %344, %343 : vector<8x128xf32>
    %346 = arith.divf %344, %345 : vector<8x128xf32>
    %347 = vector.extract_strided_slice %338 {offsets = [0, 128], sizes = [8, 128], strides = [1, 1]} : vector<8x384xf32> to vector<8x128xf32>
    %348 = vector.extract_strided_slice %334 {offsets = [0, 128], sizes = [8, 128], strides = [1, 1]} : vector<8x384xf32> to vector<8x128xf32>
    %349 = arith.addf %347, %348 : vector<8x128xf32>
    %350 = arith.negf %349 : vector<8x128xf32>
    %351 = math.exp %350 : vector<8x128xf32>
    %cst_115 = arith.constant 1.000000e+00 : f32
    %352 = vector.broadcast %cst_115 : f32 to vector<8x128xf32>
    %353 = arith.addf %352, %351 : vector<8x128xf32>
    %354 = arith.divf %352, %353 : vector<8x128xf32>
    %355 = vector.extract_strided_slice %338 {offsets = [0, 256], sizes = [8, 128], strides = [1, 1]} : vector<8x384xf32> to vector<8x128xf32>
    %356 = vector.extract_strided_slice %334 {offsets = [0, 256], sizes = [8, 128], strides = [1, 1]} : vector<8x384xf32> to vector<8x128xf32>
    %357 = vector.broadcast %28 : vector<1x128xf32> to vector<8x128xf32>
    %358 = arith.addf %356, %357 : vector<8x128xf32>
    %359 = arith.mulf %346, %358 : vector<8x128xf32>
    %360 = arith.addf %355, %359 : vector<8x128xf32>
    %361 = math.tanh %360 : vector<8x128xf32>
    %cst_116 = arith.constant 1.000000e+00 : f32
    %362 = vector.broadcast %cst_116 : f32 to vector<8x128xf32>
    %363 = arith.subf %362, %354 : vector<8x128xf32>
    %364 = arith.mulf %363, %361 : vector<8x128xf32>
    %365 = arith.mulf %354, %333 : vector<8x128xf32>
    %366 = arith.addf %364, %365 : vector<8x128xf32>
    %367 = arith.index_cast %328 : i32 to index
    %c0_117 = arith.constant 0 : index
    %c0_118 = arith.constant 0 : index
    %368 = vector.load %arg10[%367, %c0_117, %c0_118] : memref<8x8x128xf32, #tpu.memory_space<vmem>>, vector<1x8x128xf32>
    %369 = vector.shape_cast %368 : vector<1x8x128xf32> to vector<8x128xf32>
    %370 = vector.shape_cast %366 : vector<8x128xf32> to vector<1x8x128xf32>
    tpu.vector_store %arg10[%367, %c0_117, %c0_118], %370 {strides = array<i32>} : memref<8x8x128xf32, #tpu.memory_space<vmem>>, vector<1x8x128xf32>,
    %c4_i32 = arith.constant 4 : i32
    %371 = arith.index_cast %c4_i32 : i32 to index
    %c0_119 = arith.constant 0 : index
    %c0_120 = arith.constant 0 : index
    %372 = vector.load %arg3[%371, %c0_119, %c0_120] : memref<8x8x1xf32, #tpu.memory_space<vmem>>, vector<1x8x1xf32>
    %373 = vector.shape_cast %372 : vector<1x8x1xf32> to vector<8x1xf32>
    %374 = vector.broadcast %373 : vector<8x1xf32> to vector<8x128xf32>
    %375 = arith.mulf %374, %323 : vector<8x128xf32>
    %cst_121 = arith.constant dense<0.000000e+00> : vector<8x384xf32>
    %376 = tpu.matmul %375, %22, %cst_121 {dimension_numbers = #tpu.dot_dimension_numbers<[1], [0], [0], [1], [0, 0, 1, 1], [], []>} : vector<8x128xf32>, vector<128x384xf32>, vector<8x384xf32> -> vector<8x384xf32>
    %c8_i32_122 = arith.constant 8 : i32
    %377 = arith.muli %c4_i32, %c8_i32_122 : i32
    %378 = tpu.assume_multiple %377, 8 : i32
    %379 = arith.index_cast %378 : i32 to index
    %c0_123 = arith.constant 0 : index
    %380 = vector.load %arg13[%379, %c0_123] : memref<64x384xf32, #tpu.memory_space<vmem>>, vector<8x384xf32>
    %381 = vector.extract_strided_slice %380 {offsets = [0, 0], sizes = [8, 128], strides = [1, 1]} : vector<8x384xf32> to vector<8x128xf32>
    %382 = vector.extract_strided_slice %376 {offsets = [0, 0], sizes = [8, 128], strides = [1, 1]} : vector<8x384xf32> to vector<8x128xf32>
    %383 = arith.addf %381, %382 : vector<8x128xf32>
    %384 = arith.negf %383 : vector<8x128xf32>
    %385 = math.exp %384 : vector<8x128xf32>
    %cst_124 = arith.constant 1.000000e+00 : f32
    %386 = vector.broadcast %cst_124 : f32 to vector<8x128xf32>
    %387 = arith.addf %386, %385 : vector<8x128xf32>
    %388 = arith.divf %386, %387 : vector<8x128xf32>
    %389 = vector.extract_strided_slice %380 {offsets = [0, 128], sizes = [8, 128], strides = [1, 1]} : vector<8x384xf32> to vector<8x128xf32>
    %390 = vector.extract_strided_slice %376 {offsets = [0, 128], sizes = [8, 128], strides = [1, 1]} : vector<8x384xf32> to vector<8x128xf32>
    %391 = arith.addf %389, %390 : vector<8x128xf32>
    %392 = arith.negf %391 : vector<8x128xf32>
    %393 = math.exp %392 : vector<8x128xf32>
    %cst_125 = arith.constant 1.000000e+00 : f32
    %394 = vector.broadcast %cst_125 : f32 to vector<8x128xf32>
    %395 = arith.addf %394, %393 : vector<8x128xf32>
    %396 = arith.divf %394, %395 : vector<8x128xf32>
    %397 = vector.extract_strided_slice %380 {offsets = [0, 256], sizes = [8, 128], strides = [1, 1]} : vector<8x384xf32> to vector<8x128xf32>
    %398 = vector.extract_strided_slice %376 {offsets = [0, 256], sizes = [8, 128], strides = [1, 1]} : vector<8x384xf32> to vector<8x128xf32>
    %399 = vector.broadcast %26 : vector<1x128xf32> to vector<8x128xf32>
    %400 = arith.addf %398, %399 : vector<8x128xf32>
    %401 = arith.mulf %388, %400 : vector<8x128xf32>
    %402 = arith.addf %397, %401 : vector<8x128xf32>
    %403 = math.tanh %402 : vector<8x128xf32>
    %cst_126 = arith.constant 1.000000e+00 : f32
    %404 = vector.broadcast %cst_126 : f32 to vector<8x128xf32>
    %405 = arith.subf %404, %396 : vector<8x128xf32>
    %406 = arith.mulf %405, %403 : vector<8x128xf32>
    %407 = arith.mulf %396, %375 : vector<8x128xf32>
    %408 = arith.addf %406, %407 : vector<8x128xf32>
    %409 = arith.index_cast %c4_i32 : i32 to index
    %c0_127 = arith.constant 0 : index
    %c0_128 = arith.constant 0 : index
    %410 = vector.load %arg9[%409, %c0_127, %c0_128] : memref<8x8x128xf32, #tpu.memory_space<vmem>>, vector<1x8x128xf32>
    %411 = vector.shape_cast %410 : vector<1x8x128xf32> to vector<8x128xf32>
    %412 = vector.shape_cast %408 : vector<8x128xf32> to vector<1x8x128xf32>
    tpu.vector_store %arg9[%409, %c0_127, %c0_128], %412 {strides = array<i32>} : memref<8x8x128xf32, #tpu.memory_space<vmem>>, vector<1x8x128xf32>,
    %c7_i32_129 = arith.constant 7 : i32
    %413 = arith.subi %c7_i32_129, %c4_i32 : i32
    %414 = arith.index_cast %413 : i32 to index
    %c0_130 = arith.constant 0 : index
    %c0_131 = arith.constant 0 : index
    %415 = vector.load %arg4[%414, %c0_130, %c0_131] : memref<8x8x1xf32, #tpu.memory_space<vmem>>, vector<1x8x1xf32>
    %416 = vector.shape_cast %415 : vector<1x8x1xf32> to vector<8x1xf32>
    %417 = vector.broadcast %416 : vector<8x1xf32> to vector<8x128xf32>
    %418 = arith.mulf %417, %366 : vector<8x128xf32>
    %cst_132 = arith.constant dense<0.000000e+00> : vector<8x384xf32>
    %419 = tpu.matmul %418, %24, %cst_132 {dimension_numbers = #tpu.dot_dimension_numbers<[1], [0], [0], [1], [0, 0, 1, 1], [], []>} : vector<8x128xf32>, vector<128x384xf32>, vector<8x384xf32> -> vector<8x384xf32>
    %c8_i32_133 = arith.constant 8 : i32
    %420 = arith.muli %413, %c8_i32_133 : i32
    %421 = tpu.assume_multiple %420, 8 : i32
    %422 = arith.index_cast %421 : i32 to index
    %c0_134 = arith.constant 0 : index
    %423 = vector.load %arg14[%422, %c0_134] : memref<64x384xf32, #tpu.memory_space<vmem>>, vector<8x384xf32>
    %424 = vector.extract_strided_slice %423 {offsets = [0, 0], sizes = [8, 128], strides = [1, 1]} : vector<8x384xf32> to vector<8x128xf32>
    %425 = vector.extract_strided_slice %419 {offsets = [0, 0], sizes = [8, 128], strides = [1, 1]} : vector<8x384xf32> to vector<8x128xf32>
    %426 = arith.addf %424, %425 : vector<8x128xf32>
    %427 = arith.negf %426 : vector<8x128xf32>
    %428 = math.exp %427 : vector<8x128xf32>
    %cst_135 = arith.constant 1.000000e+00 : f32
    %429 = vector.broadcast %cst_135 : f32 to vector<8x128xf32>
    %430 = arith.addf %429, %428 : vector<8x128xf32>
    %431 = arith.divf %429, %430 : vector<8x128xf32>
    %432 = vector.extract_strided_slice %423 {offsets = [0, 128], sizes = [8, 128], strides = [1, 1]} : vector<8x384xf32> to vector<8x128xf32>
    %433 = vector.extract_strided_slice %419 {offsets = [0, 128], sizes = [8, 128], strides = [1, 1]} : vector<8x384xf32> to vector<8x128xf32>
    %434 = arith.addf %432, %433 : vector<8x128xf32>
    %435 = arith.negf %434 : vector<8x128xf32>
    %436 = math.exp %435 : vector<8x128xf32>
    %cst_136 = arith.constant 1.000000e+00 : f32
    %437 = vector.broadcast %cst_136 : f32 to vector<8x128xf32>
    %438 = arith.addf %437, %436 : vector<8x128xf32>
    %439 = arith.divf %437, %438 : vector<8x128xf32>
    %440 = vector.extract_strided_slice %423 {offsets = [0, 256], sizes = [8, 128], strides = [1, 1]} : vector<8x384xf32> to vector<8x128xf32>
    %441 = vector.extract_strided_slice %419 {offsets = [0, 256], sizes = [8, 128], strides = [1, 1]} : vector<8x384xf32> to vector<8x128xf32>
    %442 = vector.broadcast %28 : vector<1x128xf32> to vector<8x128xf32>
    %443 = arith.addf %441, %442 : vector<8x128xf32>
    %444 = arith.mulf %431, %443 : vector<8x128xf32>
    %445 = arith.addf %440, %444 : vector<8x128xf32>
    %446 = math.tanh %445 : vector<8x128xf32>
    %cst_137 = arith.constant 1.000000e+00 : f32
    %447 = vector.broadcast %cst_137 : f32 to vector<8x128xf32>
    %448 = arith.subf %447, %439 : vector<8x128xf32>
    %449 = arith.mulf %448, %446 : vector<8x128xf32>
    %450 = arith.mulf %439, %418 : vector<8x128xf32>
    %451 = arith.addf %449, %450 : vector<8x128xf32>
    %452 = arith.index_cast %413 : i32 to index
    %c0_138 = arith.constant 0 : index
    %c0_139 = arith.constant 0 : index
    %453 = vector.load %arg10[%452, %c0_138, %c0_139] : memref<8x8x128xf32, #tpu.memory_space<vmem>>, vector<1x8x128xf32>
    %454 = vector.shape_cast %453 : vector<1x8x128xf32> to vector<8x128xf32>
    %455 = vector.shape_cast %451 : vector<8x128xf32> to vector<1x8x128xf32>
    tpu.vector_store %arg10[%452, %c0_138, %c0_139], %455 {strides = array<i32>} : memref<8x8x128xf32, #tpu.memory_space<vmem>>, vector<1x8x128xf32>,
    %c5_i32 = arith.constant 5 : i32
    %456 = arith.index_cast %c5_i32 : i32 to index
    %c0_140 = arith.constant 0 : index
    %c0_141 = arith.constant 0 : index
    %457 = vector.load %arg3[%456, %c0_140, %c0_141] : memref<8x8x1xf32, #tpu.memory_space<vmem>>, vector<1x8x1xf32>
    %458 = vector.shape_cast %457 : vector<1x8x1xf32> to vector<8x1xf32>
    %459 = vector.broadcast %458 : vector<8x1xf32> to vector<8x128xf32>
    %460 = arith.mulf %459, %408 : vector<8x128xf32>
    %cst_142 = arith.constant dense<0.000000e+00> : vector<8x384xf32>
    %461 = tpu.matmul %460, %22, %cst_142 {dimension_numbers = #tpu.dot_dimension_numbers<[1], [0], [0], [1], [0, 0, 1, 1], [], []>} : vector<8x128xf32>, vector<128x384xf32>, vector<8x384xf32> -> vector<8x384xf32>
    %c8_i32_143 = arith.constant 8 : i32
    %462 = arith.muli %c5_i32, %c8_i32_143 : i32
    %463 = tpu.assume_multiple %462, 8 : i32
    %464 = arith.index_cast %463 : i32 to index
    %c0_144 = arith.constant 0 : index
    %465 = vector.load %arg13[%464, %c0_144] : memref<64x384xf32, #tpu.memory_space<vmem>>, vector<8x384xf32>
    %466 = vector.extract_strided_slice %465 {offsets = [0, 0], sizes = [8, 128], strides = [1, 1]} : vector<8x384xf32> to vector<8x128xf32>
    %467 = vector.extract_strided_slice %461 {offsets = [0, 0], sizes = [8, 128], strides = [1, 1]} : vector<8x384xf32> to vector<8x128xf32>
    %468 = arith.addf %466, %467 : vector<8x128xf32>
    %469 = arith.negf %468 : vector<8x128xf32>
    %470 = math.exp %469 : vector<8x128xf32>
    %cst_145 = arith.constant 1.000000e+00 : f32
    %471 = vector.broadcast %cst_145 : f32 to vector<8x128xf32>
    %472 = arith.addf %471, %470 : vector<8x128xf32>
    %473 = arith.divf %471, %472 : vector<8x128xf32>
    %474 = vector.extract_strided_slice %465 {offsets = [0, 128], sizes = [8, 128], strides = [1, 1]} : vector<8x384xf32> to vector<8x128xf32>
    %475 = vector.extract_strided_slice %461 {offsets = [0, 128], sizes = [8, 128], strides = [1, 1]} : vector<8x384xf32> to vector<8x128xf32>
    %476 = arith.addf %474, %475 : vector<8x128xf32>
    %477 = arith.negf %476 : vector<8x128xf32>
    %478 = math.exp %477 : vector<8x128xf32>
    %cst_146 = arith.constant 1.000000e+00 : f32
    %479 = vector.broadcast %cst_146 : f32 to vector<8x128xf32>
    %480 = arith.addf %479, %478 : vector<8x128xf32>
    %481 = arith.divf %479, %480 : vector<8x128xf32>
    %482 = vector.extract_strided_slice %465 {offsets = [0, 256], sizes = [8, 128], strides = [1, 1]} : vector<8x384xf32> to vector<8x128xf32>
    %483 = vector.extract_strided_slice %461 {offsets = [0, 256], sizes = [8, 128], strides = [1, 1]} : vector<8x384xf32> to vector<8x128xf32>
    %484 = vector.broadcast %26 : vector<1x128xf32> to vector<8x128xf32>
    %485 = arith.addf %483, %484 : vector<8x128xf32>
    %486 = arith.mulf %473, %485 : vector<8x128xf32>
    %487 = arith.addf %482, %486 : vector<8x128xf32>
    %488 = math.tanh %487 : vector<8x128xf32>
    %cst_147 = arith.constant 1.000000e+00 : f32
    %489 = vector.broadcast %cst_147 : f32 to vector<8x128xf32>
    %490 = arith.subf %489, %481 : vector<8x128xf32>
    %491 = arith.mulf %490, %488 : vector<8x128xf32>
    %492 = arith.mulf %481, %460 : vector<8x128xf32>
    %493 = arith.addf %491, %492 : vector<8x128xf32>
    %494 = arith.index_cast %c5_i32 : i32 to index
    %c0_148 = arith.constant 0 : index
    %c0_149 = arith.constant 0 : index
    %495 = vector.load %arg9[%494, %c0_148, %c0_149] : memref<8x8x128xf32, #tpu.memory_space<vmem>>, vector<1x8x128xf32>
    %496 = vector.shape_cast %495 : vector<1x8x128xf32> to vector<8x128xf32>
    %497 = vector.shape_cast %493 : vector<8x128xf32> to vector<1x8x128xf32>
    tpu.vector_store %arg9[%494, %c0_148, %c0_149], %497 {strides = array<i32>} : memref<8x8x128xf32, #tpu.memory_space<vmem>>, vector<1x8x128xf32>,
    %c7_i32_150 = arith.constant 7 : i32
    %498 = arith.subi %c7_i32_150, %c5_i32 : i32
    %499 = arith.index_cast %498 : i32 to index
    %c0_151 = arith.constant 0 : index
    %c0_152 = arith.constant 0 : index
    %500 = vector.load %arg4[%499, %c0_151, %c0_152] : memref<8x8x1xf32, #tpu.memory_space<vmem>>, vector<1x8x1xf32>
    %501 = vector.shape_cast %500 : vector<1x8x1xf32> to vector<8x1xf32>
    %502 = vector.broadcast %501 : vector<8x1xf32> to vector<8x128xf32>
    %503 = arith.mulf %502, %451 : vector<8x128xf32>
    %cst_153 = arith.constant dense<0.000000e+00> : vector<8x384xf32>
    %504 = tpu.matmul %503, %24, %cst_153 {dimension_numbers = #tpu.dot_dimension_numbers<[1], [0], [0], [1], [0, 0, 1, 1], [], []>} : vector<8x128xf32>, vector<128x384xf32>, vector<8x384xf32> -> vector<8x384xf32>
    %c8_i32_154 = arith.constant 8 : i32
    %505 = arith.muli %498, %c8_i32_154 : i32
    %506 = tpu.assume_multiple %505, 8 : i32
    %507 = arith.index_cast %506 : i32 to index
    %c0_155 = arith.constant 0 : index
    %508 = vector.load %arg14[%507, %c0_155] : memref<64x384xf32, #tpu.memory_space<vmem>>, vector<8x384xf32>
    %509 = vector.extract_strided_slice %508 {offsets = [0, 0], sizes = [8, 128], strides = [1, 1]} : vector<8x384xf32> to vector<8x128xf32>
    %510 = vector.extract_strided_slice %504 {offsets = [0, 0], sizes = [8, 128], strides = [1, 1]} : vector<8x384xf32> to vector<8x128xf32>
    %511 = arith.addf %509, %510 : vector<8x128xf32>
    %512 = arith.negf %511 : vector<8x128xf32>
    %513 = math.exp %512 : vector<8x128xf32>
    %cst_156 = arith.constant 1.000000e+00 : f32
    %514 = vector.broadcast %cst_156 : f32 to vector<8x128xf32>
    %515 = arith.addf %514, %513 : vector<8x128xf32>
    %516 = arith.divf %514, %515 : vector<8x128xf32>
    %517 = vector.extract_strided_slice %508 {offsets = [0, 128], sizes = [8, 128], strides = [1, 1]} : vector<8x384xf32> to vector<8x128xf32>
    %518 = vector.extract_strided_slice %504 {offsets = [0, 128], sizes = [8, 128], strides = [1, 1]} : vector<8x384xf32> to vector<8x128xf32>
    %519 = arith.addf %517, %518 : vector<8x128xf32>
    %520 = arith.negf %519 : vector<8x128xf32>
    %521 = math.exp %520 : vector<8x128xf32>
    %cst_157 = arith.constant 1.000000e+00 : f32
    %522 = vector.broadcast %cst_157 : f32 to vector<8x128xf32>
    %523 = arith.addf %522, %521 : vector<8x128xf32>
    %524 = arith.divf %522, %523 : vector<8x128xf32>
    %525 = vector.extract_strided_slice %508 {offsets = [0, 256], sizes = [8, 128], strides = [1, 1]} : vector<8x384xf32> to vector<8x128xf32>
    %526 = vector.extract_strided_slice %504 {offsets = [0, 256], sizes = [8, 128], strides = [1, 1]} : vector<8x384xf32> to vector<8x128xf32>
    %527 = vector.broadcast %28 : vector<1x128xf32> to vector<8x128xf32>
    %528 = arith.addf %526, %527 : vector<8x128xf32>
    %529 = arith.mulf %516, %528 : vector<8x128xf32>
    %530 = arith.addf %525, %529 : vector<8x128xf32>
    %531 = math.tanh %530 : vector<8x128xf32>
    %cst_158 = arith.constant 1.000000e+00 : f32
    %532 = vector.broadcast %cst_158 : f32 to vector<8x128xf32>
    %533 = arith.subf %532, %524 : vector<8x128xf32>
    %534 = arith.mulf %533, %531 : vector<8x128xf32>
    %535 = arith.mulf %524, %503 : vector<8x128xf32>
    %536 = arith.addf %534, %535 : vector<8x128xf32>
    %537 = arith.index_cast %498 : i32 to index
    %c0_159 = arith.constant 0 : index
    %c0_160 = arith.constant 0 : index
    %538 = vector.load %arg10[%537, %c0_159, %c0_160] : memref<8x8x128xf32, #tpu.memory_space<vmem>>, vector<1x8x128xf32>
    %539 = vector.shape_cast %538 : vector<1x8x128xf32> to vector<8x128xf32>
    %540 = vector.shape_cast %536 : vector<8x128xf32> to vector<1x8x128xf32>
    tpu.vector_store %arg10[%537, %c0_159, %c0_160], %540 {strides = array<i32>} : memref<8x8x128xf32, #tpu.memory_space<vmem>>, vector<1x8x128xf32>,
    %c6_i32 = arith.constant 6 : i32
    %541 = arith.index_cast %c6_i32 : i32 to index
    %c0_161 = arith.constant 0 : index
    %c0_162 = arith.constant 0 : index
    %542 = vector.load %arg3[%541, %c0_161, %c0_162] : memref<8x8x1xf32, #tpu.memory_space<vmem>>, vector<1x8x1xf32>
    %543 = vector.shape_cast %542 : vector<1x8x1xf32> to vector<8x1xf32>
    %544 = vector.broadcast %543 : vector<8x1xf32> to vector<8x128xf32>
    %545 = arith.mulf %544, %493 : vector<8x128xf32>
    %cst_163 = arith.constant dense<0.000000e+00> : vector<8x384xf32>
    %546 = tpu.matmul %545, %22, %cst_163 {dimension_numbers = #tpu.dot_dimension_numbers<[1], [0], [0], [1], [0, 0, 1, 1], [], []>} : vector<8x128xf32>, vector<128x384xf32>, vector<8x384xf32> -> vector<8x384xf32>
    %c8_i32_164 = arith.constant 8 : i32
    %547 = arith.muli %c6_i32, %c8_i32_164 : i32
    %548 = tpu.assume_multiple %547, 8 : i32
    %549 = arith.index_cast %548 : i32 to index
    %c0_165 = arith.constant 0 : index
    %550 = vector.load %arg13[%549, %c0_165] : memref<64x384xf32, #tpu.memory_space<vmem>>, vector<8x384xf32>
    %551 = vector.extract_strided_slice %550 {offsets = [0, 0], sizes = [8, 128], strides = [1, 1]} : vector<8x384xf32> to vector<8x128xf32>
    %552 = vector.extract_strided_slice %546 {offsets = [0, 0], sizes = [8, 128], strides = [1, 1]} : vector<8x384xf32> to vector<8x128xf32>
    %553 = arith.addf %551, %552 : vector<8x128xf32>
    %554 = arith.negf %553 : vector<8x128xf32>
    %555 = math.exp %554 : vector<8x128xf32>
    %cst_166 = arith.constant 1.000000e+00 : f32
    %556 = vector.broadcast %cst_166 : f32 to vector<8x128xf32>
    %557 = arith.addf %556, %555 : vector<8x128xf32>
    %558 = arith.divf %556, %557 : vector<8x128xf32>
    %559 = vector.extract_strided_slice %550 {offsets = [0, 128], sizes = [8, 128], strides = [1, 1]} : vector<8x384xf32> to vector<8x128xf32>
    %560 = vector.extract_strided_slice %546 {offsets = [0, 128], sizes = [8, 128], strides = [1, 1]} : vector<8x384xf32> to vector<8x128xf32>
    %561 = arith.addf %559, %560 : vector<8x128xf32>
    %562 = arith.negf %561 : vector<8x128xf32>
    %563 = math.exp %562 : vector<8x128xf32>
    %cst_167 = arith.constant 1.000000e+00 : f32
    %564 = vector.broadcast %cst_167 : f32 to vector<8x128xf32>
    %565 = arith.addf %564, %563 : vector<8x128xf32>
    %566 = arith.divf %564, %565 : vector<8x128xf32>
    %567 = vector.extract_strided_slice %550 {offsets = [0, 256], sizes = [8, 128], strides = [1, 1]} : vector<8x384xf32> to vector<8x128xf32>
    %568 = vector.extract_strided_slice %546 {offsets = [0, 256], sizes = [8, 128], strides = [1, 1]} : vector<8x384xf32> to vector<8x128xf32>
    %569 = vector.broadcast %26 : vector<1x128xf32> to vector<8x128xf32>
    %570 = arith.addf %568, %569 : vector<8x128xf32>
    %571 = arith.mulf %558, %570 : vector<8x128xf32>
    %572 = arith.addf %567, %571 : vector<8x128xf32>
    %573 = math.tanh %572 : vector<8x128xf32>
    %cst_168 = arith.constant 1.000000e+00 : f32
    %574 = vector.broadcast %cst_168 : f32 to vector<8x128xf32>
    %575 = arith.subf %574, %566 : vector<8x128xf32>
    %576 = arith.mulf %575, %573 : vector<8x128xf32>
    %577 = arith.mulf %566, %545 : vector<8x128xf32>
    %578 = arith.addf %576, %577 : vector<8x128xf32>
    %579 = arith.index_cast %c6_i32 : i32 to index
    %c0_169 = arith.constant 0 : index
    %c0_170 = arith.constant 0 : index
    %580 = vector.load %arg9[%579, %c0_169, %c0_170] : memref<8x8x128xf32, #tpu.memory_space<vmem>>, vector<1x8x128xf32>
    %581 = vector.shape_cast %580 : vector<1x8x128xf32> to vector<8x128xf32>
    %582 = vector.shape_cast %578 : vector<8x128xf32> to vector<1x8x128xf32>
    tpu.vector_store %arg9[%579, %c0_169, %c0_170], %582 {strides = array<i32>} : memref<8x8x128xf32, #tpu.memory_space<vmem>>, vector<1x8x128xf32>,
    %c7_i32_171 = arith.constant 7 : i32
    %583 = arith.subi %c7_i32_171, %c6_i32 : i32
    %584 = arith.index_cast %583 : i32 to index
    %c0_172 = arith.constant 0 : index
    %c0_173 = arith.constant 0 : index
    %585 = vector.load %arg4[%584, %c0_172, %c0_173] : memref<8x8x1xf32, #tpu.memory_space<vmem>>, vector<1x8x1xf32>
    %586 = vector.shape_cast %585 : vector<1x8x1xf32> to vector<8x1xf32>
    %587 = vector.broadcast %586 : vector<8x1xf32> to vector<8x128xf32>
    %588 = arith.mulf %587, %536 : vector<8x128xf32>
    %cst_174 = arith.constant dense<0.000000e+00> : vector<8x384xf32>
    %589 = tpu.matmul %588, %24, %cst_174 {dimension_numbers = #tpu.dot_dimension_numbers<[1], [0], [0], [1], [0, 0, 1, 1], [], []>} : vector<8x128xf32>, vector<128x384xf32>, vector<8x384xf32> -> vector<8x384xf32>
    %c8_i32_175 = arith.constant 8 : i32
    %590 = arith.muli %583, %c8_i32_175 : i32
    %591 = tpu.assume_multiple %590, 8 : i32
    %592 = arith.index_cast %591 : i32 to index
    %c0_176 = arith.constant 0 : index
    %593 = vector.load %arg14[%592, %c0_176] : memref<64x384xf32, #tpu.memory_space<vmem>>, vector<8x384xf32>
    %594 = vector.extract_strided_slice %593 {offsets = [0, 0], sizes = [8, 128], strides = [1, 1]} : vector<8x384xf32> to vector<8x128xf32>
    %595 = vector.extract_strided_slice %589 {offsets = [0, 0], sizes = [8, 128], strides = [1, 1]} : vector<8x384xf32> to vector<8x128xf32>
    %596 = arith.addf %594, %595 : vector<8x128xf32>
    %597 = arith.negf %596 : vector<8x128xf32>
    %598 = math.exp %597 : vector<8x128xf32>
    %cst_177 = arith.constant 1.000000e+00 : f32
    %599 = vector.broadcast %cst_177 : f32 to vector<8x128xf32>
    %600 = arith.addf %599, %598 : vector<8x128xf32>
    %601 = arith.divf %599, %600 : vector<8x128xf32>
    %602 = vector.extract_strided_slice %593 {offsets = [0, 128], sizes = [8, 128], strides = [1, 1]} : vector<8x384xf32> to vector<8x128xf32>
    %603 = vector.extract_strided_slice %589 {offsets = [0, 128], sizes = [8, 128], strides = [1, 1]} : vector<8x384xf32> to vector<8x128xf32>
    %604 = arith.addf %602, %603 : vector<8x128xf32>
    %605 = arith.negf %604 : vector<8x128xf32>
    %606 = math.exp %605 : vector<8x128xf32>
    %cst_178 = arith.constant 1.000000e+00 : f32
    %607 = vector.broadcast %cst_178 : f32 to vector<8x128xf32>
    %608 = arith.addf %607, %606 : vector<8x128xf32>
    %609 = arith.divf %607, %608 : vector<8x128xf32>
    %610 = vector.extract_strided_slice %593 {offsets = [0, 256], sizes = [8, 128], strides = [1, 1]} : vector<8x384xf32> to vector<8x128xf32>
    %611 = vector.extract_strided_slice %589 {offsets = [0, 256], sizes = [8, 128], strides = [1, 1]} : vector<8x384xf32> to vector<8x128xf32>
    %612 = vector.broadcast %28 : vector<1x128xf32> to vector<8x128xf32>
    %613 = arith.addf %611, %612 : vector<8x128xf32>
    %614 = arith.mulf %601, %613 : vector<8x128xf32>
    %615 = arith.addf %610, %614 : vector<8x128xf32>
    %616 = math.tanh %615 : vector<8x128xf32>
    %cst_179 = arith.constant 1.000000e+00 : f32
    %617 = vector.broadcast %cst_179 : f32 to vector<8x128xf32>
    %618 = arith.subf %617, %609 : vector<8x128xf32>
    %619 = arith.mulf %618, %616 : vector<8x128xf32>
    %620 = arith.mulf %609, %588 : vector<8x128xf32>
    %621 = arith.addf %619, %620 : vector<8x128xf32>
    %622 = arith.index_cast %583 : i32 to index
    %c0_180 = arith.constant 0 : index
    %c0_181 = arith.constant 0 : index
    %623 = vector.load %arg10[%622, %c0_180, %c0_181] : memref<8x8x128xf32, #tpu.memory_space<vmem>>, vector<1x8x128xf32>
    %624 = vector.shape_cast %623 : vector<1x8x128xf32> to vector<8x128xf32>
    %625 = vector.shape_cast %621 : vector<8x128xf32> to vector<1x8x128xf32>
    tpu.vector_store %arg10[%622, %c0_180, %c0_181], %625 {strides = array<i32>} : memref<8x8x128xf32, #tpu.memory_space<vmem>>, vector<1x8x128xf32>,
    %c7_i32_182 = arith.constant 7 : i32
    %626 = arith.index_cast %c7_i32_182 : i32 to index
    %c0_183 = arith.constant 0 : index
    %c0_184 = arith.constant 0 : index
    %627 = vector.load %arg3[%626, %c0_183, %c0_184] : memref<8x8x1xf32, #tpu.memory_space<vmem>>, vector<1x8x1xf32>
    %628 = vector.shape_cast %627 : vector<1x8x1xf32> to vector<8x1xf32>
    %629 = vector.broadcast %628 : vector<8x1xf32> to vector<8x128xf32>
    %630 = arith.mulf %629, %578 : vector<8x128xf32>
    %cst_185 = arith.constant dense<0.000000e+00> : vector<8x384xf32>
    %631 = tpu.matmul %630, %22, %cst_185 {dimension_numbers = #tpu.dot_dimension_numbers<[1], [0], [0], [1], [0, 0, 1, 1], [], []>} : vector<8x128xf32>, vector<128x384xf32>, vector<8x384xf32> -> vector<8x384xf32>
    %c8_i32_186 = arith.constant 8 : i32
    %632 = arith.muli %c7_i32_182, %c8_i32_186 : i32
    %633 = tpu.assume_multiple %632, 8 : i32
    %634 = arith.index_cast %633 : i32 to index
    %c0_187 = arith.constant 0 : index
    %635 = vector.load %arg13[%634, %c0_187] : memref<64x384xf32, #tpu.memory_space<vmem>>, vector<8x384xf32>
    %636 = vector.extract_strided_slice %635 {offsets = [0, 0], sizes = [8, 128], strides = [1, 1]} : vector<8x384xf32> to vector<8x128xf32>
    %637 = vector.extract_strided_slice %631 {offsets = [0, 0], sizes = [8, 128], strides = [1, 1]} : vector<8x384xf32> to vector<8x128xf32>
    %638 = arith.addf %636, %637 : vector<8x128xf32>
    %639 = arith.negf %638 : vector<8x128xf32>
    %640 = math.exp %639 : vector<8x128xf32>
    %cst_188 = arith.constant 1.000000e+00 : f32
    %641 = vector.broadcast %cst_188 : f32 to vector<8x128xf32>
    %642 = arith.addf %641, %640 : vector<8x128xf32>
    %643 = arith.divf %641, %642 : vector<8x128xf32>
    %644 = vector.extract_strided_slice %635 {offsets = [0, 128], sizes = [8, 128], strides = [1, 1]} : vector<8x384xf32> to vector<8x128xf32>
    %645 = vector.extract_strided_slice %631 {offsets = [0, 128], sizes = [8, 128], strides = [1, 1]} : vector<8x384xf32> to vector<8x128xf32>
    %646 = arith.addf %644, %645 : vector<8x128xf32>
    %647 = arith.negf %646 : vector<8x128xf32>
    %648 = math.exp %647 : vector<8x128xf32>
    %cst_189 = arith.constant 1.000000e+00 : f32
    %649 = vector.broadcast %cst_189 : f32 to vector<8x128xf32>
    %650 = arith.addf %649, %648 : vector<8x128xf32>
    %651 = arith.divf %649, %650 : vector<8x128xf32>
    %652 = vector.extract_strided_slice %635 {offsets = [0, 256], sizes = [8, 128], strides = [1, 1]} : vector<8x384xf32> to vector<8x128xf32>
    %653 = vector.extract_strided_slice %631 {offsets = [0, 256], sizes = [8, 128], strides = [1, 1]} : vector<8x384xf32> to vector<8x128xf32>
    %654 = vector.broadcast %26 : vector<1x128xf32> to vector<8x128xf32>
    %655 = arith.addf %653, %654 : vector<8x128xf32>
    %656 = arith.mulf %643, %655 : vector<8x128xf32>
    %657 = arith.addf %652, %656 : vector<8x128xf32>
    %658 = math.tanh %657 : vector<8x128xf32>
    %cst_190 = arith.constant 1.000000e+00 : f32
    %659 = vector.broadcast %cst_190 : f32 to vector<8x128xf32>
    %660 = arith.subf %659, %651 : vector<8x128xf32>
    %661 = arith.mulf %660, %658 : vector<8x128xf32>
    %662 = arith.mulf %651, %630 : vector<8x128xf32>
    %663 = arith.addf %661, %662 : vector<8x128xf32>
    %664 = arith.index_cast %c7_i32_182 : i32 to index
    %c0_191 = arith.constant 0 : index
    %c0_192 = arith.constant 0 : index
    %665 = vector.load %arg9[%664, %c0_191, %c0_192] : memref<8x8x128xf32, #tpu.memory_space<vmem>>, vector<1x8x128xf32>
    %666 = vector.shape_cast %665 : vector<1x8x128xf32> to vector<8x128xf32>
    %667 = vector.shape_cast %663 : vector<8x128xf32> to vector<1x8x128xf32>
    tpu.vector_store %arg9[%664, %c0_191, %c0_192], %667 {strides = array<i32>} : memref<8x8x128xf32, #tpu.memory_space<vmem>>, vector<1x8x128xf32>,
    %c7_i32_193 = arith.constant 7 : i32
    %668 = arith.subi %c7_i32_193, %c7_i32_182 : i32
    %669 = arith.index_cast %668 : i32 to index
    %c0_194 = arith.constant 0 : index
    %c0_195 = arith.constant 0 : index
    %670 = vector.load %arg4[%669, %c0_194, %c0_195] : memref<8x8x1xf32, #tpu.memory_space<vmem>>, vector<1x8x1xf32>
    %671 = vector.shape_cast %670 : vector<1x8x1xf32> to vector<8x1xf32>
    %672 = vector.broadcast %671 : vector<8x1xf32> to vector<8x128xf32>
    %673 = arith.mulf %672, %621 : vector<8x128xf32>
    %cst_196 = arith.constant dense<0.000000e+00> : vector<8x384xf32>
    %674 = tpu.matmul %673, %24, %cst_196 {dimension_numbers = #tpu.dot_dimension_numbers<[1], [0], [0], [1], [0, 0, 1, 1], [], []>} : vector<8x128xf32>, vector<128x384xf32>, vector<8x384xf32> -> vector<8x384xf32>
    %c8_i32_197 = arith.constant 8 : i32
    %675 = arith.muli %668, %c8_i32_197 : i32
    %676 = tpu.assume_multiple %675, 8 : i32
    %677 = arith.index_cast %676 : i32 to index
    %c0_198 = arith.constant 0 : index
    %678 = vector.load %arg14[%677, %c0_198] : memref<64x384xf32, #tpu.memory_space<vmem>>, vector<8x384xf32>
    %679 = vector.extract_strided_slice %678 {offsets = [0, 0], sizes = [8, 128], strides = [1, 1]} : vector<8x384xf32> to vector<8x128xf32>
    %680 = vector.extract_strided_slice %674 {offsets = [0, 0], sizes = [8, 128], strides = [1, 1]} : vector<8x384xf32> to vector<8x128xf32>
    %681 = arith.addf %679, %680 : vector<8x128xf32>
    %682 = arith.negf %681 : vector<8x128xf32>
    %683 = math.exp %682 : vector<8x128xf32>
    %cst_199 = arith.constant 1.000000e+00 : f32
    %684 = vector.broadcast %cst_199 : f32 to vector<8x128xf32>
    %685 = arith.addf %684, %683 : vector<8x128xf32>
    %686 = arith.divf %684, %685 : vector<8x128xf32>
    %687 = vector.extract_strided_slice %678 {offsets = [0, 128], sizes = [8, 128], strides = [1, 1]} : vector<8x384xf32> to vector<8x128xf32>
    %688 = vector.extract_strided_slice %674 {offsets = [0, 128], sizes = [8, 128], strides = [1, 1]} : vector<8x384xf32> to vector<8x128xf32>
    %689 = arith.addf %687, %688 : vector<8x128xf32>
    %690 = arith.negf %689 : vector<8x128xf32>
    %691 = math.exp %690 : vector<8x128xf32>
    %cst_200 = arith.constant 1.000000e+00 : f32
    %692 = vector.broadcast %cst_200 : f32 to vector<8x128xf32>
    %693 = arith.addf %692, %691 : vector<8x128xf32>
    %694 = arith.divf %692, %693 : vector<8x128xf32>
    %695 = vector.extract_strided_slice %678 {offsets = [0, 256], sizes = [8, 128], strides = [1, 1]} : vector<8x384xf32> to vector<8x128xf32>
    %696 = vector.extract_strided_slice %674 {offsets = [0, 256], sizes = [8, 128], strides = [1, 1]} : vector<8x384xf32> to vector<8x128xf32>
    %697 = vector.broadcast %28 : vector<1x128xf32> to vector<8x128xf32>
    %698 = arith.addf %696, %697 : vector<8x128xf32>
    %699 = arith.mulf %686, %698 : vector<8x128xf32>
    %700 = arith.addf %695, %699 : vector<8x128xf32>
    %701 = math.tanh %700 : vector<8x128xf32>
    %cst_201 = arith.constant 1.000000e+00 : f32
    %702 = vector.broadcast %cst_201 : f32 to vector<8x128xf32>
    %703 = arith.subf %702, %694 : vector<8x128xf32>
    %704 = arith.mulf %703, %701 : vector<8x128xf32>
    %705 = arith.mulf %694, %673 : vector<8x128xf32>
    %706 = arith.addf %704, %705 : vector<8x128xf32>
    %707 = arith.index_cast %668 : i32 to index
    %c0_202 = arith.constant 0 : index
    %c0_203 = arith.constant 0 : index
    %708 = vector.load %arg10[%707, %c0_202, %c0_203] : memref<8x8x128xf32, #tpu.memory_space<vmem>>, vector<1x8x128xf32>
    %709 = vector.shape_cast %708 : vector<1x8x128xf32> to vector<8x128xf32>
    %710 = vector.shape_cast %706 : vector<8x128xf32> to vector<1x8x128xf32>
    tpu.vector_store %arg10[%707, %c0_202, %c0_203], %710 {strides = array<i32>} : memref<8x8x128xf32, #tpu.memory_space<vmem>>, vector<1x8x128xf32>,
    %c8_i32_204 = arith.constant 8 : i32
    %c0_205 = arith.constant 0 : index
    %c0_206 = arith.constant 0 : index
    %711 = vector.load %arg11[%c0_205, %c0_206] : memref<8x128xf32, #tpu.memory_space<vmem>>, vector<8x128xf32>
    tpu.vector_store %arg11[%c0_205, %c0_206], %663 {strides = array<i32>} : memref<8x128xf32, #tpu.memory_space<vmem>>, vector<8x128xf32>,
    %c0_207 = arith.constant 0 : index
    %c0_208 = arith.constant 0 : index
    %712 = vector.load %arg12[%c0_207, %c0_208] : memref<8x128xf32, #tpu.memory_space<vmem>>, vector<8x128xf32>
    tpu.vector_store %arg12[%c0_207, %c0_208], %706 {strides = array<i32>} : memref<8x128xf32, #tpu.memory_space<vmem>>, vector<8x128xf32>,
    return
  }
  func.func @transform_0(%arg0: i32) -> (i32, i32) {
    %c0_i32 = arith.constant 0 : i32
    %c0_i32_0 = arith.constant 0 : i32
    return %arg0, %c0_i32 : i32, i32
  }
  func.func @transform_1(%arg0: i32) -> (i32, i32) {
    %c1_i32 = arith.constant 1 : i32
    %0 = arith.subi %c1_i32, %arg0 : i32
    %c0_i32 = arith.constant 0 : i32
    %c0_i32_0 = arith.constant 0 : i32
    return %0, %c0_i32 : i32, i32
  }
  func.func @transform_2(%arg0: i32) -> (i32, i32, i32) {
    %c0_i32 = arith.constant 0 : i32
    %c0_i32_0 = arith.constant 0 : i32
    %c0_i32_1 = arith.constant 0 : i32
    return %arg0, %c0_i32, %c0_i32_0 : i32, i32, i32
  }
  func.func @transform_3(%arg0: i32) -> (i32, i32, i32) {
    %c1_i32 = arith.constant 1 : i32
    %0 = arith.subi %c1_i32, %arg0 : i32
    %c0_i32 = arith.constant 0 : i32
    %c0_i32_0 = arith.constant 0 : i32
    %c0_i32_1 = arith.constant 0 : i32
    return %0, %c0_i32, %c0_i32_0 : i32, i32, i32
  }
  func.func @transform_4(%arg0: i32) -> (i32, i32, i32) {
    %c0_i32 = arith.constant 0 : i32
    %c0_i32_0 = arith.constant 0 : i32
    %c0_i32_1 = arith.constant 0 : i32
    %c0_i32_2 = arith.constant 0 : i32
    return %c0_i32, %c0_i32_0, %c0_i32_1 : i32, i32, i32
  }
  func.func @transform_5(%arg0: i32) -> (i32, i32, i32) {
    %c0_i32 = arith.constant 0 : i32
    %c0_i32_0 = arith.constant 0 : i32
    %c0_i32_1 = arith.constant 0 : i32
    %c0_i32_2 = arith.constant 0 : i32
    return %c0_i32, %c0_i32_0, %c0_i32_1 : i32, i32, i32
  }
  func.func @transform_6(%arg0: i32) -> (i32, i32, i32) {
    %c0_i32 = arith.constant 0 : i32
    %c0_i32_0 = arith.constant 0 : i32
    %c0_i32_1 = arith.constant 0 : i32
    %c0_i32_2 = arith.constant 0 : i32
    return %c0_i32, %c0_i32_0, %c0_i32_1 : i32, i32, i32
  }
  func.func @transform_7(%arg0: i32) -> (i32, i32, i32) {
    %c0_i32 = arith.constant 0 : i32
    %c0_i32_0 = arith.constant 0 : i32
    %c0_i32_1 = arith.constant 0 : i32
    %c0_i32_2 = arith.constant 0 : i32
    return %c0_i32, %c0_i32_0, %c0_i32_1 : i32, i32, i32
  }
  func.func @transform_8(%arg0: i32) -> (i32, i32, i32) {
    %c0_i32 = arith.constant 0 : i32
    %c0_i32_0 = arith.constant 0 : i32
    %c0_i32_1 = arith.constant 0 : i32
    return %arg0, %c0_i32, %c0_i32_0 : i32, i32, i32
  }
  func.func @transform_9(%arg0: i32) -> (i32, i32, i32) {
    %c1_i32 = arith.constant 1 : i32
    %0 = arith.subi %c1_i32, %arg0 : i32
    %c0_i32 = arith.constant 0 : i32
    %c0_i32_0 = arith.constant 0 : i32
    %c0_i32_1 = arith.constant 0 : i32
    return %0, %c0_i32, %c0_i32_0 : i32, i32, i32
  }
}

</mosaic_0001>

<bundles_post_ra>
// kernel: discontinued_gru.1
= control target key start
LH: loop header
LB: loop body
LE: loop exit
PB: predicated region body
PF: predicated region fallthrough
CT: control target
= control target key end

     0   :  { %s6469_s30 = smov 0   ;;  %s7855_s0 = inlined_call_operand.vmem [shape: f32[128,32], index: 0, kind: input, shape index: {}, may-alias: {0,1}]   ;;  %s7856_s1 = inlined_call_operand.vmem [shape: f32[128,32], index: 1, kind: input, shape index: {}, may-alias: {0,1}]   ;;  %s7857_s2 = inlined_call_operand.vmem [shape: f32[16,8,1], index: 2, kind: input, shape index: {}]   ;;  %s7858_s3 = inlined_call_operand.vmem [shape: f32[16,8,1], index: 3, kind: input, shape index: {}]   ;;  %s7859_s4 = inlined_call_operand.vmem [shape: f32[2,32,384], index: 4, kind: input, shape index: {}]   ;;  %s7860_s5 = inlined_call_operand.vmem [shape: f32[2,128,384], index: 5, kind: input, shape index: {}]   ;;  %s7861_s6 = inlined_call_operand.vmem [shape: f32[2,1,384], index: 6, kind: input, shape index: {}]   ;;  %s7862_s7 = inlined_call_operand.vmem [shape: f32[2,1,128], index: 7, kind: input, shape index: {}]   ;;  %s7863_s8 = inlined_call_operand.vmem [shape: f32[16,8,128], index: 8, kind: output, shape index: {0}]   ;;  %s7864_s9 = inlined_call_operand.vmem [shape: f32[16,8,128], index: 9, kind: output, shape index: {1}]  }
   0x1 LB: > { %s4161_s10 = sadd.s32 4294967295, %s6412_s30   ;;  %p4165_p0 = scmp.ge.s32.totalorder %s6412_s30, 1  ;;  %s6412_s30 = sphi %s6469_s30, %s20_s30  }
   0x2   : > { %p334_p1 = scmp.lt.s32.totalorder %s6412_s30, 3 }
   0x4   : > { %p335_p2 = pnand %p4165_p0, %p334_p1 }
   0x6   : > { %338 = sbr.rel (%p335_p2) target bundleno = 2279 (0x8e7), region = 52 }
   0xd   : > { %s4166_s11 = sshll.u32 %s4161_s10, 3  ;;  %s399_s12 = ssub.s32 1, %s4161_s10 }
   0xe   : > { %p394_p3 = scmp.lt.s32.totalorder %s4166_s11, 15  ;;  %s4168_s13 = sshll.u32 %s399_s12, 3 }
   0xf   : > { %p401_p4 = scmp.lt.s32.totalorder %s4168_s13, 15  ;;  %p4178_p5 = scmp.ne.s32.totalorder %s4161_s10, 0 }
  0x10   : > { %s8016_s11 = smov (!%p394_p3, %s4166_s11), 15  ;;  %v6414_v0 = vmov (!%p4178_p5), 0.0  }
  0x11   : > { %s8018_s13 = smov (!%p401_p4, %s4168_s13), 15  ;;  %s4167_s14 = sshll.u32 %s8016_s11, 3  ;;  %439 = vst [vmem:[#allocation2] sm:$0xff] (!%p4178_p5), %v6414_v0  ;;  %440 = vst [vmem:[#allocation3] sm:$0xff] (!%p4178_p5), %v6414_v0 }
  0x12   : > { %s6480_s17 = scalar_lea.vmem %s7855_s0, %s4167_s14  ;;  %s4169_s18 = sshll.u32 %s8018_s13, 3 }
  0x13   : > { %s6485_s21 = scalar_lea.vmem %s7856_s1, %s4169_s18  ;;  %s6490_s24 = scalar_lea.vmem %s7857_s2, %s4167_s14 }
  0x14   : > { %s6495_s27 = scalar_lea.vmem %s7858_s3, %s4169_s18  ;;  %s6500_s11 = scalar_lea.vmem %s7863_s8, %s4167_s14 }
  0x15   : > { %s6505_s15 = scalar_lea.vmem %s7864_s9, %s4169_s18  ;;  %438 = sbr.rel (%p4178_p5) target bundleno = 28 (0x1c), region = 56 }
  0x1c PF: > { %v1152_v1 = vld [vmem:[%s6490_s24] sm:$0xff]  ;;  %v6415_v2 = vmov 0   ;;  %v7865_v3 = vmov 0.0   ;;  %v4276_v4 = vld [vmem:[%s6495_s27 + $0x38] sm:$0xff]  ;;  %v450_v5 = vld [vmem:[%s7859_s4 + $0x8] sm:$0xff]  ;;  %vm478_vm0 = vcmask 261120  }
  0x1d   : > { %6242 = vset.pattern.permute.xlu0 %v6415_v2  ;;  %603 = vmatprep.mubr.f32.mxu1 %v7865_v3  ;;  %v453_v6 = vld [vmem:[%s7859_s4 + $0x20] sm:$0xff]  ;;  %v452_v8 = vld [vmem:[%s7859_s4 + $0x18] sm:$0xff]  ;;  %v459_v12 = vld [vmem:[%s7859_s4 + $0x50] sm:$0xff]  ;;  %v7867_v58 = vmov 0.0|0.0   ;;  %vm6418_vm1 = vmmov 0  }
  0x1e   : > { %1155 = vperm.xlu0 %6242, %v1152_v1   ;;  %567 = vmatprep.mubr.f32.mxu0 %v7865_v3  ;;  %v449_v7 = vld [vmem:[%s7859_s4] sm:$0xff]  ;;  %v5233_v9 = vpack.c.bf16 %v453_v6, %v450_v5  ;;  %v456_v11 = vld [vmem:[%s7859_s4 + $0x38] sm:$0xff]  ;;  %v455_v13 = vld [vmem:[%s7859_s4 + $0x30] sm:$0xff] }
  0x1f   : > { %6243 = vset.pattern.permute.xlu1 %v6415_v2  ;;  %v5235_v10 = vpack.c.bf16 %v452_v8, %v449_v7  ;;  %v5237_v14 = vpack.c.bf16 %v459_v12, %v456_v11  ;;  %v458_v15 = vld [vmem:[%s7859_s4 + $0x48] sm:$0xff]  ;;  %v451_v16 = vld [vmem:[%s7859_s4 + $0x10] sm:$0xff]  ;;  %v457_v24 = vld [vmem:[%s7859_s4 + $0x40] sm:$0xff] }
  0x20   : > { %6161 = vmatprep.subr.bf16.mxu1 %v5233_v9  ;;  %v454_v17 = vld [vmem:[%s7859_s4 + $0x28] sm:$0xff]  ;;  %v4197_v18 = vld [vmem:[%s7859_s4 + $0x70] sm:$0xff]  ;;  %5234 = vmatprep.subr.bf16.mxu0 %v5233_v9  ;;  %v5239_v20 = vpack.c.bf16 %v458_v15, %v455_v13  ;;  %v460_v25 = vld [vmem:[%s7859_s4 + $0x58] sm:$0xff] }
  0x21   : > { %v4289_v19 = vld [vmem:[%s6490_s24 + $0x10] sm:$0xff]  ;;  %6163 = vmatpush1.bf16.msra.mxu1 %v5235_v10  ;;  %v4200_v21 = vld [vmem:[%s7859_s4 + $0x88] sm:$0xff]  ;;  %5236 = vmatpush1.bf16.msra.mxu0 %v5235_v10  ;;  %v5241_v22 = vpack.c.bf16 %v454_v17, %v451_v16  ;;  %v4297_v26 = vld [vmem:[%s6490_s24 + $0x18] sm:$0xff]  ;;  %v5245_v29 = vpack.c.bf16 %v460_v25, %v457_v24 }
  0x22   : > { %1339 = vperm.xlu0 %6242, %v4276_v4   ;;  %6162 = vmatprep.subr.bf16.mxu1 %v5237_v14  ;;  %v5257_v23 = vpack.c.bf16 %v4200_v21, %v4197_v18  ;;  %v6556_v27 = vld [vmem:[%s6480_s17 + $0x30] sm:$0xff]  ;;  %v441_v28 = vld [vmem:[%s6480_s17] sm:$0xff]  ;;  %v4196_v30 = vld [vmem:[%s7859_s4 + $0x68] sm:$0xff] }
  0x23   : > { %5238 = vmatprep.subr.bf16.mxu0 %v5237_v14  ;;  %v4199_v31 = vld [vmem:[%s7859_s4 + $0x80] sm:$0xff]  ;;  %v4206_v33 = vld [vmem:[%s7859_s4 + $0xb8] sm:$0xff]  ;;  %v442_v36 = vld [vmem:[%s6480_s17 + $0x8] sm:$0xff] }
  0x24   : > { %v4203_v32 = vld [vmem:[%s7859_s4 + $0xa0] sm:$0xff]  ;;  %v448_v35 = vld [vmem:[%s6480_s17 + $0x38] sm:$0xff]  ;;  %v5249_v39 = vpack.c.bf16 %v4199_v31, %v4196_v30  ;;  %v4205_v42 = vld [vmem:[%s7859_s4 + $0xb0] sm:$0xff] }
  0x25   : > { %6164 = vmatpush1.bf16.msra.mxu1 %v5239_v20  ;;  %5240 = vmatpush1.bf16.msra.mxu0 %v5239_v20  ;;  %v4305_v34 = vld [vmem:[%s6490_s24 + $0x20] sm:$0xff]  ;;  %v4198_v38 = vld [vmem:[%s7859_s4 + $0x78] sm:$0xff]  ;;  %v5261_v40 = vpack.c.bf16 %v4206_v33, %v4203_v32  ;;  %v4313_v43 = vld [vmem:[%s6490_s24 + $0x28] sm:$0xff] }
  0x26   : > { %1882 = vperm.xlu0 %6242, %v4289_v19   ;;  %5242 = vmatprep.subr.bf16.mxu1 %v5241_v22  ;;  %v4195_v37 = vld [vmem:[%s7859_s4 + $0x60] sm:$0xff]  ;;  %v4202_v41 = vld [vmem:[%s7859_s4 + $0x98] sm:$0xff]  ;;  %v443_v45 = vld [vmem:[%s6480_s17 + $0x10] sm:$0xff] }
  0x27   : > { %5258 = vmatprep.subr.bf16.mxu0 %v5257_v23  ;;  %v5251_v44 = vpack.c.bf16 %v4198_v38, %v4195_v37  ;;  %v5253_v46 = vpack.c.bf16 %v4205_v42, %v4202_v41  ;;  %v4201_v47 = vld [vmem:[%s7859_s4 + $0x90] sm:$0xff]  ;;  %v4204_v48 = vld [vmem:[%s7859_s4 + $0xa8] sm:$0xff]  ;;  %v1054_v50 = vld [vmem:[%s7860_s5 + $0x20] sm:$0xff] }
  0x28   : > { %4185 = vmatmul.mubr.msk.f32.vlgmr.msra.gmra.mrb[0].mxu1 %vm478_vm0, %v6556_v27  ;;  %4179 = vmatmul.mubr.msk.f32.vlgmr.msra.gmra.mrb[0].mxu0 %vm478_vm0, %v441_v28  ;;  %v1051_v49 = vld [vmem:[%s7860_s5 + $0x8] sm:$0xff]  ;;  %v4321_v51 = vld [vmem:[%s6490_s24 + $0x30] sm:$0xff]  ;;  %v444_v52 = vld [vmem:[%s6480_s17 + $0x18] sm:$0xff]  ;;  %v5255_v54 = vpack.c.bf16 %v4204_v48, %v4201_v47 }
  0x29   : > { %5244 = vmatpush3.bf16.msra.mxu1 %v5241_v22  ;;  %5260 = vmatpush3.bf16.msra.mxu0 %v5257_v23  ;;  %v445_v53 = vld [vmem:[%s6480_s17 + $0x20] sm:$0xff]  ;;  %v6616_v55 = vpack.c.bf16 %v1054_v50, %v1051_v49  ;;  %v4329_v56 = vld [vmem:[%s6490_s24 + $0x38] sm:$0xff]  ;;  %v446_v57 = vld [vmem:[%s6480_s17 + $0x28] sm:$0xff] }
  0x2a   : > { %2240 = vperm.xlu0 %6242, %v4297_v26   ;;  %609 = vmatprep.mubr.f32.mxu1 %v7865_v3  ;;  %v1052_v59 = vld [vmem:[%s7860_s5 + $0x10] sm:$0xff]  ;;  %v1055_v60 = vld [vmem:[%s7860_s5 + $0x28] sm:$0xff]  ;;  %v745_v61 = vld [vmem:[%s6485_s21] sm:$0xff] }
  0x2b   : > { %573 = vmatprep.mubr.f32.mxu0 %v7865_v3  ;;  %5246 = vmatprep.subr.bf16.mxu1 %v5245_v29  ;;  %v1050_v62 = vld [vmem:[%s7860_s5] sm:$0xff]  ;;  %v1053_v63 = vld [vmem:[%s7860_s5 + $0x18] sm:$0xff]  ;;  %v1060_v1 = vld [vmem:[%s7860_s5 + $0x50] sm:$0xff]  ;;  %v6653_v2 = vpack.c.bf16 %v1055_v60, %v1052_v59 }
  0x2c   : > { %4186 = vmatmul.mubr.msk.f32.gmra.mrb[2].mxu1 %vm478_vm0, %v448_v35  ;;  %4180 = vmatmul.mubr.msk.f32.gmra.mrb[2].mxu0 %vm478_vm0, %v442_v36  ;;  %v1057_v0 = vld [vmem:[%s7860_s5 + $0x38] sm:$0xff]  ;;  %v746_v4 = vld [vmem:[%s6485_s21 + $0x8] sm:$0xff]  ;;  %v6657_v5 = vpack.c.bf16 %v1053_v63, %v1050_v62  ;;  %v1058_v6 = vld [vmem:[%s7860_s5 + $0x40] sm:$0xff] }
  0x2d   : > { %5248 = vmatpush3.bf16.msra.mxu1 %v5245_v29  ;;  %4641 = vmatprep.mubr.msk.f32.mxu1 %vm478_vm0, %v441_v28  ;;  %v1061_v7 = vld [vmem:[%s7860_s5 + $0x58] sm:$0xff]  ;;  %v6665_v8 = vpack.c.bf16 %v1060_v1, %v1057_v0  ;;  %v1056_v9 = vld [vmem:[%s7860_s5 + $0x30] sm:$0xff]  ;;  %v1059_v10 = vld [vmem:[%s7860_s5 + $0x48] sm:$0xff] }
  0x2e   : > { %2598 = vperm.xlu0 %6242, %v4305_v34   ;;  %579 = vmatprep.mubr.f32.mxu0 %v7865_v3  ;;  %v1063_v11 = vld [vmem:[%s7860_s5 + $0x68] sm:$0xff]  ;;  %v1066_v12 = vld [vmem:[%s7860_s5 + $0x80] sm:$0xff]  ;;  %v6682_v13 = vpack.c.bf16 %v1061_v7, %v1058_v6  ;;  %v6686_v14 = vpack.c.bf16 %v1059_v10, %v1056_v9  ;;  %v1064_v15 = vld [vmem:[%s7860_s5 + $0x70] sm:$0xff] }
  0x2f   : > { %5250 = vmatprep.subr.bf16.mxu1 %v5249_v39  ;;  %5262 = vmatprep.subr.bf16.mxu0 %v5261_v40  ;;  %v1067_v16 = vld [vmem:[%s7860_s5 + $0x88] sm:$0xff]  ;;  %v6696_v17 = vpack.c.bf16 %v1066_v12, %v1063_v11  ;;  %v747_v18 = vld [vmem:[%s6485_s21 + $0x10] sm:$0xff]  ;;  %v1062_v19 = vld [vmem:[%s7860_s5 + $0x60] sm:$0xff] }
  0x30   : > { %4642 = vmatmul.mubr.msk.f32.vlgmr.msra.gmra.mrb[4].mxu1 %vm478_vm0, %v442_v36  ;;  %4181 = vmatmul.mubr.msk.f32.gmra.mrb[4].mxu0 %vm478_vm0, %v443_v45  ;;  %v1065_v20 = vld [vmem:[%s7860_s5 + $0x78] sm:$0xff]  ;;  %v1072_v22 = vld [vmem:[%s7860_s5 + $0xb0] sm:$0xff]  ;;  %v6715_v23 = vpack.c.bf16 %v1067_v16, %v1064_v15  ;;  %v1070_v26 = vld [vmem:[%s7860_s5 + $0xa0] sm:$0xff] }
  0x31   : > { %5252 = vmatpush1.bf16.msra.mxu1 %v5251_v44  ;;  %4644 = vmatprep.mubr.msk.f32.mxu1 %vm478_vm0, %v443_v45  ;;  %v1069_v21 = vld [vmem:[%s7860_s5 + $0x98] sm:$0xff]  ;;  %v6719_v24 = vpack.c.bf16 %v1065_v20, %v1062_v19  ;;  %v1068_v29 = vld [vmem:[%s7860_s5 + $0x90] sm:$0xff]  ;;  %v1071_v30 = vld [vmem:[%s7860_s5 + $0xa8] sm:$0xff] }
  0x32   : > { %2954 = vperm.xlu0 %6242, %v4313_v43   ;;  %585 = vmatprep.mubr.f32.mxu0 %v7865_v3  ;;  %v748_v25 = vld [vmem:[%s6485_s21 + $0x18] sm:$0xff]  ;;  %v6729_v28 = vpack.c.bf16 %v1072_v22, %v1069_v21  ;;  %v749_v31 = vld [vmem:[%s6485_s21 + $0x20] sm:$0xff]  ;;  %v1075_v32 = vld [vmem:[%s7860_s5 + $0xc8] sm:$0xff] }
  0x33   : > { %5264 = vmatpush3.bf16.msra.mxu0 %v5261_v40  ;;  %5254 = vmatprep.subr.bf16.mxu1 %v5253_v46  ;;  %v1078_v33 = vld [vmem:[%s7860_s5 + $0xe0] sm:$0xff]  ;;  %v1076_v36 = vld [vmem:[%s7860_s5 + $0xd0] sm:$0xff]  ;;  %v1079_v37 = vld [vmem:[%s7860_s5 + $0xe8] sm:$0xff] }
  0x34   : > { %4645 = vmatmul.mubr.msk.f32.gmra.mrb[6].mxu1 %vm478_vm0, %v444_v52  ;;  %4182 = vmatmul.mubr.msk.f32.gmra.mrb[6].mxu0 %vm478_vm0, %v444_v52  ;;  %v750_v38 = vld [vmem:[%s6485_s21 + $0x28] sm:$0xff]  ;;  %v6763_v39 = vpack.c.bf16 %v1078_v33, %v1075_v32  ;;  %v1074_v40 = vld [vmem:[%s7860_s5 + $0xc0] sm:$0xff]  ;;  %v1077_v41 = vld [vmem:[%s7860_s5 + $0xd8] sm:$0xff]  ;;  %v6784_v46 = vpack.c.bf16 %v1079_v37, %v1076_v36 }
  0x35   : > { %4647 = vmatprep.mubr.msk.f32.mxu1 %vm478_vm0, %v445_v53  ;;  %591 = vmatprep.mubr.f32.mxu0 %v7865_v3  ;;  %v751_v42 = vld [vmem:[%s6485_s21 + $0x30] sm:$0xff]  ;;  %v1081_v43 = vld [vmem:[%s7860_s5 + $0xf8] sm:$0xff]  ;;  %v6788_v47 = vpack.c.bf16 %v1077_v41, %v1074_v40  ;;  %v1082_v48 = vld [vmem:[%s7860_s5 + $0x100] sm:$0xff] }
  0x36   : > { %3310 = vperm.xlu0 %6242, %v4321_v51   ;;  %5256 = vmatpush1.bf16.msra.mxu1 %v5255_v54  ;;  %v1084_v44 = vld [vmem:[%s7860_s5 + $0x110] sm:$0xff]  ;;  %v752_v45 = vld [vmem:[%s6485_s21 + $0x38] sm:$0xff]  ;;  %v1083_v52 = vld [vmem:[%s7860_s5 + $0x108] sm:$0xff] }
  0x37   : > { %5266 = vmatprep.subr.bf16.mxu0 %v6616_v55  ;;  %5297 = vmatprep.subr.bf16.mxu1 %v7867_v58  ;;  %v1085_v49 = vld [vmem:[%s7860_s5 + $0x118] sm:$0xff]  ;;  %v6797_v50 = vpack.c.bf16 %v1084_v44, %v1081_v43  ;;  %v1080_v51 = vld [vmem:[%s7860_s5 + $0xf0] sm:$0xff]  ;;  %v1090_v54 = vld [vmem:[%s7860_s5 + $0x140] sm:$0xff] }
  0x38   : > { %4648 = vmatmul.mubr.msk.f32.gmra.mrb[8].mxu1 %vm478_vm0, %v446_v57  ;;  %4183 = vmatmul.mubr.msk.f32.gmra.mrb[8].mxu0 %vm478_vm0, %v445_v53  ;;  %v1087_v53 = vld [vmem:[%s7860_s5 + $0x128] sm:$0xff]  ;;  %v6821_v59 = vpack.c.bf16 %v1083_v52, %v1080_v51  ;;  %v1088_v60 = vld [vmem:[%s7860_s5 + $0x130] sm:$0xff]  ;;  %v1086_v63 = vld [vmem:[%s7860_s5 + $0x120] sm:$0xff] }
  0x39   : > { %4650 = vmatprep.mubr.msk.f32.mxu1 %vm478_vm0, %v6556_v27  ;;  %597 = vmatprep.mubr.f32.mxu0 %v7865_v3  ;;  %v1073_v27 = vld [vmem:[%s7860_s5 + $0xb8] sm:$0xff]  ;;  %7899 = vst [vmem:[#allocation6_spill] sm:$0xff] %v6797_v50  ;;  %v6830_v62 = vpack.c.bf16 %v1090_v54, %v1087_v53  ;;  %v4285_v6 = vld [vmem:[%s6495_s27 + $0x30] sm:$0xff]  ;;  %v1094_v11 = vld [vmem:[%s7860_s5 + $0x160] sm:$0xff] }
  0x3a   : > { %3666 = vperm.xlu0 %6242, %v4329_v56   ;;  %v6749_v34 = vpack.c.bf16 %v1073_v27, %v1070_v26  ;;  %v4281_v56 = vld [vmem:[%s6490_s24 + $0x8] sm:$0xff]  ;;  %7901 = vst [vmem:[#allocation8_spill] sm:$0xff] %v6821_v59  ;;  %v1089_v0 = vld [vmem:[%s7860_s5 + $0x138] sm:$0xff]  ;;  %v1092_v10 = vld [vmem:[%s7860_s5 + $0x150] sm:$0xff] }
  0x3b   : > { %7902 = vst [vmem:[#allocation9_spill] sm:$0xff] %v6830_v62  ;;  %1524 = vperm.xlu1 %6243, %v4281_v56   ;;  %v1093_v1 = vld [vmem:[%s7860_s5 + $0x158] sm:$0xff]  ;;  %v6852_v9 = vpack.c.bf16 %v1089_v0, %v1086_v63  ;;  %v1095_v16 = vld [vmem:[%s7860_s5 + $0x168] sm:$0xff]  ;;  %v4228_v19 = vld [vmem:[%s7860_s5 + $0x1a0] sm:$0xff] }
  0x3c   : > { %4651 = vmatmul.mubr.msk.f32.gmra.mrb[10].mxu1 %vm478_vm0, %v448_v35  ;;  %4184 = vmatmul.mubr.msk.f32.gmra.mrb[10].mxu0 %vm478_vm0, %v446_v57  ;;  %v6753_v35 = vpack.c.bf16 %v1071_v30, %v1068_v29  ;;  %v6817_v57 = vpack.c.bf16 %v1085_v49, %v1082_v48  ;;  %v1097_v12 = vld [vmem:[%s7860_s5 + $0x178] sm:$0xff]  ;;  %v4293_v20 = vld [vmem:[%s6495_s27 + $0x28] sm:$0xff]  ;;  %v6883_v22 = vpack.c.bf16 %v1095_v16, %v1092_v10  ;;  %v4301_v26 = vld [vmem:[%s6495_s27 + $0x20] sm:$0xff] }
  0x3d   : > { %872 = vmatprep.mubr.f32.mxu1 %v7865_v3  ;;  %4661 = vmatprep.mubr.msk.f32.mxu0 %vm478_vm0, %v745_v61  ;;  %7904 = vst [vmem:[#allocation11_spill] sm:$0xff] %v6852_v9  ;;  %v6879_v21 = vpack.c.bf16 %v1097_v12, %v1094_v11  ;;  %v4309_v27 = vld [vmem:[%s6495_s27 + $0x18] sm:$0xff]  ;;  %v4317_v29 = vld [vmem:[%s6495_s27 + $0x10] sm:$0xff]  ;;  %v4325_v30 = vld [vmem:[%s6495_s27 + $0x8] sm:$0xff] }
  0x3e   : > { %7900 = vst [vmem:[#allocation7_spill] sm:$0xff] %v6817_v57  ;;  %7907 = vst [vmem:[#allocation14_spill] sm:$0xff] %v6883_v22  ;;  %v4224_v32 = vld [vmem:[%s7860_s5 + $0x180] sm:$0xff]  ;;  %v4227_v33 = vld [vmem:[%s7860_s5 + $0x198] sm:$0xff] }
  0x3f   : > { %1703 = vperm.xlu1 %6243, %v4285_v6   ;;  %7906 = vst [vmem:[#allocation13_spill] sm:$0xff] %v6879_v21  ;;  %v4226_v36 = vld [vmem:[%s7860_s5 + $0x190] sm:$0xff]  ;;  %v4229_v37 = vld [vmem:[%s7860_s5 + $0x1a8] sm:$0xff]  ;;  %v4231_v40 = vld [vmem:[%s7860_s5 + $0x1b8] sm:$0xff]  ;;  %v6918_v43 = vpack.c.bf16 %v4227_v33, %v4224_v32 }
  0x40   : > { %4208 = vmatmul.mubr.msk.f32.vlgmr.msra.gmra.mrb[12].mxu1 %vm478_vm0, %v745_v61  ;;  %4662 = vmatmul.mubr.msk.f32.vlgmr.msra.gmra.mrb[12].mxu0 %vm478_vm0, %v746_v4  ;;  %v1091_v61 = vld [vmem:[%s7860_s5 + $0x148] sm:$0xff]  ;;  %v4234_v41 = vld [vmem:[%s7860_s5 + $0x1d0] sm:$0xff]  ;;  %v6920_v44 = vpack.c.bf16 %v4229_v37, %v4226_v36  ;;  %v4232_v52 = vld [vmem:[%s7860_s5 + $0x1c0] sm:$0xff] }
  0x41   : > { %5299 = vmatpush3.bf16.msra.mxu1 %v6653_v2  ;;  %5268 = vmatpush1.bf16.msra.mxu0 %v6657_v5  ;;  %v6848_v7 = vpack.c.bf16 %v1091_v61, %v1088_v60  ;;  %v6927_v49 = vpack.c.bf16 %v4234_v41, %v4231_v40  ;;  %v4233_v51 = vld [vmem:[%s7860_s5 + $0x1c8] sm:$0xff]  ;;  %v4235_v53 = vld [vmem:[%s7860_s5 + $0x1d8] sm:$0xff]  ;;  %v4240_v56 = vld [vmem:[%s7860_s5 + $0x200] sm:$0xff] }
  0x42   : > { %878 = vmatprep.mubr.f32.mxu1 %v7865_v3  ;;  %5270 = vmatprep.subr.bf16.mxu0 %v6665_v8  ;;  %v4237_v54 = vld [vmem:[%s7860_s5 + $0x1e8] sm:$0xff]  ;;  %v6950_v61 = vpack.c.bf16 %v4235_v53, %v4232_v52  ;;  %v4236_v63 = vld [vmem:[%s7860_s5 + $0x1e0] sm:$0xff]  ;;  %v4243_v10 = vld [vmem:[%s7860_s5 + $0x218] sm:$0xff] }
  0x43   : > { %5300 = vmatprep.subr.bf16.mxu1 %v7867_v58  ;;  %4664 = vmatprep.mubr.msk.f32.mxu0 %vm478_vm0, %v747_v18  ;;  %7903 = vst [vmem:[#allocation10_spill] sm:$0xff] %v6848_v7  ;;  %v6957_v0 = vpack.c.bf16 %v4240_v56, %v4237_v54  ;;  %v4241_v6 = vld [vmem:[%s7860_s5 + $0x208] sm:$0xff]  ;;  %v4246_v11 = vld [vmem:[%s7860_s5 + $0x230] sm:$0xff]  ;;  %v4248_v33 = vld [vmem:[%s7860_s5 + $0x240] sm:$0xff] }
  0x44   : > { %4209 = vmatmul.mubr.msk.f32.gmra.mrb[14].mxu1 %vm478_vm0, %v746_v4  ;;  %4665 = vmatmul.mubr.msk.f32.gmra.mrb[14].mxu0 %vm478_vm0, %v748_v25  ;;  %v1096_v4 = vld [vmem:[%s7860_s5 + $0x170] sm:$0xff]  ;;  %v4251_v37 = vld [vmem:[%s7860_s5 + $0x258] sm:$0xff]  ;;  %v4253_v40 = vld [vmem:[%s7860_s5 + $0x268] sm:$0xff] }
  0x45   : > { %5302 = vmatpush3.bf16.msra.mxu1 %v6682_v13  ;;  %884 = vmatprep.mubr.f32.mxu1 %v7865_v3  ;;  %v6864_v15 = vpack.c.bf16 %v1096_v4, %v1093_v1  ;;  %v4239_v1 = vld [vmem:[%s7860_s5 + $0x1f8] sm:$0xff]  ;;  %v4238_v4 = vld [vmem:[%s7860_s5 + $0x1f0] sm:$0xff]  ;;  %v4257_v54 = vld [vmem:[%s7860_s5 + $0x288] sm:$0xff] }
  0x46   : > { %5272 = vmatpush1.bf16.msra.mxu0 %v6686_v14  ;;  %5303 = vmatprep.subr.bf16.mxu1 %v7867_v58  ;;  %v6979_v12 = vpack.c.bf16 %v4239_v1, %v4236_v63  ;;  %v6981_v16 = vpack.c.bf16 %v4241_v6, %v4238_v4  ;;  %v4255_v41 = vld [vmem:[%s7860_s5 + $0x278] sm:$0xff]  ;;  %v4254_v52 = vld [vmem:[%s7860_s5 + $0x270] sm:$0xff]  ;;  %v4256_v56 = vld [vmem:[%s7860_s5 + $0x280] sm:$0xff] }
  0x47   : > { %5274 = vmatprep.subr.bf16.mxu0 %v6696_v17  ;;  %4667 = vmatprep.mubr.msk.f32.mxu0 %vm478_vm0, %v749_v31  ;;  %7905 = vst [vmem:[#allocation12_spill] sm:$0xff] %v6864_v15  ;;  %v4259_v63 = vld [vmem:[%s7860_s5 + $0x298] sm:$0xff]  ;;  %v4261_v1 = vld [vmem:[%s7860_s5 + $0x2a8] sm:$0xff]  ;;  %v4264_v4 = vld [vmem:[%s7860_s5 + $0x2c0] sm:$0xff]  ;;  %v7063_v6 = vpack.c.bf16 %v4257_v54, %v4254_v52 }
  0x48   : > { %4210 = vmatmul.mubr.msk.f32.gmra.mrb[16].mxu1 %vm478_vm0, %v747_v18  ;;  %4668 = vmatmul.mubr.msk.f32.gmra.mrb[16].mxu0 %vm478_vm0, %v750_v38  ;;  %v4225_v18 = vld [vmem:[%s7860_s5 + $0x188] sm:$0xff]  ;;  %v4271_v52 = vld [vmem:[%s7860_s5 + $0x2f8] sm:$0xff] }
  0x49   : > { %5305 = vmatpush3.bf16.msra.mxu1 %v6715_v23  ;;  %890 = vmatprep.mubr.f32.mxu1 %v7865_v3 }
  0x4a   : > { %5276 = vmatpush1.bf16.msra.mxu0 %v6719_v24  ;;  %5306 = vmatprep.subr.bf16.mxu1 %v7867_v58 }
  0x4b   : > { %5278 = vmatprep.subr.bf16.mxu0 %v6729_v28  ;;  %4670 = vmatprep.mubr.msk.f32.mxu0 %vm478_vm0, %v751_v42 }
  0x4c   : > { %4211 = vmatmul.mubr.msk.f32.gmra.mrb[18].mxu1 %vm478_vm0, %v748_v25  ;;  %4671 = vmatmul.mubr.msk.f32.gmra.mrb[18].mxu0 %vm478_vm0, %v752_v45  ;;  %v6885_v25 = vpack.c.bf16 %v4228_v19, %v4225_v18  ;;  %v4242_v18 = vld [vmem:[%s7860_s5 + $0x210] sm:$0xff]  ;;  %v6988_v19 = vpack.c.bf16 %v4246_v11, %v4243_v10  ;;  %v7065_v10 = vpack.c.bf16 %v4259_v63, %v4256_v56  ;;  %v4260_v11 = vld [vmem:[%s7860_s5 + $0x2a0] sm:$0xff] }
  0x4d   : > { %5308 = vmatpush3.bf16.msra.mxu1 %v6749_v34  ;;  %896 = vmatprep.mubr.f32.mxu1 %v7865_v3 }
  0x4e   : > { %5280 = vmatpush1.bf16.msra.mxu0 %v6753_v35  ;;  %5309 = vmatprep.subr.bf16.mxu1 %v7867_v58  ;;  %7908 = vst [vmem:[#allocation15_spill] sm:$0xff] %v6885_v25 }
  0x4f   : > { %5282 = vmatprep.subr.bf16.mxu0 %v6763_v39  ;;  %1223 = vmatprep.mubr.f32.mxu0 %v7865_v3 }
  0x50   : > { %4212 = vmatmul.mubr.msk.f32.gmra.mrb[20].mxu1 %vm478_vm0, %v749_v31  ;;  %2061 = vperm.xlu1 %6243, %v4293_v20   ;;  %v3840_v31 = vld [vmem:[%s6495_s27] sm:$0xff]  ;;  %v4245_v20 = vld [vmem:[%s7860_s5 + $0x228] sm:$0xff] }
  0x51   : > { %5311 = vmatpush3.bf16.msra.mxu1 %v6784_v46  ;;  %902 = vmatprep.mubr.f32.mxu1 %v7865_v3 }
  0x52   : > { %5284 = vmatpush1.bf16.msra.mxu0 %v6788_v47  ;;  %5312 = vmatprep.subr.bf16.mxu1 %v7867_v58 }
  0x53   : > { %5286 = vmatprep.subr.bf16.mxu0 %v6797_v50 }
  0x54   : > { %4213 = vmatmul.mubr.msk.f32.gmra.mrb[22].mxu1 %vm478_vm0, %v750_v38  ;;  %2419 = vperm.xlu1 %6243, %v4301_v26   ;;  %v1150_v38 = vld [vmem:[#allocation2] sm:$0xff] }
  0x55   : > { %5314 = vmatpush3.bf16.msra.mxu1 %v6817_v57  ;;  %908 = vmatprep.mubr.f32.mxu1 %v7865_v3  ;;  %v4244_v26 = vld [vmem:[%s7860_s5 + $0x220] sm:$0xff] }
  0x56   : > { %5288 = vmatpush1.bf16.msra.mxu0 %v6821_v59  ;;  %5315 = vmatprep.subr.bf16.mxu1 %v7867_v58 }
  0x57   : > { %5290 = vmatprep.subr.bf16.mxu0 %v6830_v62 }
  0x58   : > { %4214 = vmatmul.mubr.msk.f32.gmra.mrb[24].mxu1 %vm478_vm0, %v751_v42  ;;  %2776 = vperm.xlu1 %6243, %v4309_v27   ;;  %v4247_v27 = vld [vmem:[%s7860_s5 + $0x238] sm:$0xff] }
  0x59   : > { %5317 = vmatpush3.bf16.msra.mxu1 %v6848_v7  ;;  %914 = vmatprep.mubr.f32.mxu1 %v7865_v3  ;;  %v7009_v32 = vpack.c.bf16 %v4247_v27, %v4244_v26  ;;  %v4262_v26 = vld [vmem:[%s7860_s5 + $0x2b0] sm:$0xff]  ;;  %v4265_v27 = vld [vmem:[%s7860_s5 + $0x2c8] sm:$0xff] }
  0x5a   : > { %5292 = vmatpush1.bf16.msra.mxu0 %v6852_v9  ;;  %5318 = vmatprep.subr.bf16.mxu1 %v7867_v58 }
  0x5b   : > { %5294 = vmatprep.subr.bf16.mxu0 %v6864_v15 }
  0x5c   : > { %4215 = vmatmul.mubr.msk.f32.gmra.mrb[26].mxu1 %vm478_vm0, %v752_v45  ;;  %3132 = vperm.xlu1 %6243, %v4317_v29   ;;  %v4230_v45 = vld [vmem:[%s7860_s5 + $0x1b0] sm:$0xff]  ;;  %v4249_v29 = vld [vmem:[%s7860_s5 + $0x248] sm:$0xff] }
  0x5d   : > { %5320 = vmatpush3.bf16.msra.mxu1 %v6879_v21  ;;  %4705 = vmatprep.mubr.msk.f32.mxu1 %vm6418_vm1, %v7865_v3  ;;  %v6948_v60 = vpack.c.bf16 %v4233_v51, %v4230_v45  ;;  %v7035_v45 = vpack.c.bf16 %v4251_v37, %v4248_v33  ;;  %v7093_v37 = vpack.c.bf16 %v4265_v27, %v4262_v26 }
  0x5e   : > { %5296 = vmatpush1.bf16.msra.mxu0 %v6883_v22  ;;  %5322 = vmatprep.subr.bf16.mxu1 %v6885_v25 }
  0x5f   : > { %5353 = vmatprep.subr.bf16.mxu0 %v7867_v58 }
  0x60   : > { %3488 = vperm.xlu1 %6243, %v4325_v30   ;;  %v4252_v30 = vld [vmem:[%s7860_s5 + $0x260] sm:$0xff] }
  0x61   : > { %v7016_v36 = vpack.c.bf16 %v4252_v30, %v4249_v29  ;;  %v4267_v29 = vld [vmem:[%s7860_s5 + $0x2d8] sm:$0xff]  ;;  %v4270_v30 = vld [vmem:[%s7860_s5 + $0x2f0] sm:$0xff] }
  0x64   : > { %3843 = vperm.xlu1 %6243, %v3840_v31   ;;  %v7007_v31 = vpack.c.bf16 %v4245_v20, %v4242_v18  ;;  %v7072_v18 = vpack.c.bf16 %v4264_v4, %v4261_v1  ;;  %v4263_v20 = vld [vmem:[%s7860_s5 + $0x2b8] sm:$0xff]  ;;  %v1151_v1 = vld [vmem:[#allocation3] sm:$0xff] }
  0x65   : > { %v7091_v33 = vpack.c.bf16 %v4263_v20, %v4260_v11  ;;  %v463_v11 = vlaneseq }
  0x67   : > { %v7162_v20 = vshrl.u32 %v463_v11, 7 }
  0x9d   : > { %v1156_v42 = vpop.permute.xlu0 %1155 }
  0x9e   : > { %v6925_v48 = vmul.f32 %v1156_v42, %v1150_v38  ;;  %v4250_v38 = vld [vmem:[%s7860_s5 + $0x250] sm:$0xff] }
  0x9f   : > { %v4258_v42 = vld [vmem:[%s7860_s5 + $0x290] sm:$0xff]  ;;  %v7037_v51 = vpack.c.bf16 %v4253_v40, %v4250_v38  ;;  %v7100_v40 = vpack.c.bf16 %v4270_v30, %v4267_v29  ;;  %v473_v29 = vsub.s32 2, %v7162_v20  ;;  %v461_v30 = vld [vmem:[%s7861_s6] sm:$0x7] }
  0xa0   : > { %1224 = vmatmul.mubr.f32.vlgmr.msra.gmra.mrb[0].mxu0 %v6925_v48  ;;  %4706 = vmatmul.mubr.f32.vlgmr.msra.gmra.mrb[28].mxu1 %v6925_v48  ;;  %v7044_v53 = vpack.c.bf16 %v4258_v42, %v4255_v41  ;;  %v4266_v38 = vld [vmem:[%s7860_s5 + $0x2d0] sm:$0xff]  ;;  %v4269_v41 = vld [vmem:[%s7860_s5 + $0x2e8] sm:$0xff]  ;;  %v4268_v42 = vld [vmem:[%s7860_s5 + $0x2e0] sm:$0xff] }
  0xa1   : > { %5324 = vmatpush1.bf16.msra.mxu1 %v6918_v43  ;;  %5355 = vmatpush3.bf16.msra.mxu0 %v6920_v44  ;;  %v7113_v54 = vpack.c.bf16 %v4269_v41, %v4266_v38  ;;  %v7115_v56 = vpack.c.bf16 %v4271_v52, %v4268_v42  ;;  %v1340_v63 = vpop.permute.xlu0 %1339  ;;  %v474_v42 = vrot.slane %v461_v30, %v473_v29 }
  0xa2   : > { %5326 = vmatprep.subr.bf16.mxu1 %v6927_v49  ;;  %5356 = vmatprep.subr.bf16.mxu0 %v7867_v58  ;;  %v7121_v4 = vmul.f32 %v1340_v63, %v1151_v1 }
  0xa3   : > { %1407 = vmatprep.mubr.f32.mxu1 %v7865_v3  ;;  %4740 = vmatprep.mubr.msk.f32.mxu0 %vm6418_vm1, %v7865_v3 }
  0xa5   : > { %5328 = vmatpush1.bf16.msra.mxu1 %v6948_v60  ;;  %5358 = vmatpush3.bf16.msra.mxu0 %v6950_v61 }
  0xa6   : > { %5330 = vmatprep.subr.bf16.mxu1 %v6957_v0  ;;  %5359 = vmatprep.subr.bf16.mxu0 %v7867_v58 }
  0xa9   : > { %5332 = vmatpush1.bf16.msra.mxu1 %v6979_v12  ;;  %5361 = vmatpush3.bf16.msra.mxu0 %v6981_v16 }
  0xaa   : > { %5334 = vmatprep.subr.bf16.mxu1 %v6988_v19  ;;  %5362 = vmatprep.subr.bf16.mxu0 %v7867_v58 }
  0xad   : > { %5336 = vmatpush1.bf16.msra.mxu1 %v7007_v31  ;;  %5364 = vmatpush3.bf16.msra.mxu0 %v7009_v32 }
  0xae   : > { %5338 = vmatprep.subr.bf16.mxu1 %v7016_v36  ;;  %5365 = vmatprep.subr.bf16.mxu0 %v7867_v58 }
  0xb1   : > { %5340 = vmatpush1.bf16.msra.mxu1 %v7035_v45  ;;  %5367 = vmatpush3.bf16.msra.mxu0 %v7037_v51 }
  0xb2   : > { %5342 = vmatprep.subr.bf16.mxu1 %v7044_v53  ;;  %5368 = vmatprep.subr.bf16.mxu0 %v7867_v58 }
  0xb5   : > { %5344 = vmatpush1.bf16.msra.mxu1 %v7063_v6  ;;  %5370 = vmatpush3.bf16.msra.mxu0 %v7065_v10 }
  0xb6   : > { %5346 = vmatprep.subr.bf16.mxu1 %v7072_v18  ;;  %5371 = vmatprep.subr.bf16.mxu0 %v7867_v58 }
  0xb9   : > { %5348 = vmatpush1.bf16.msra.mxu1 %v7091_v33  ;;  %5373 = vmatpush3.bf16.msra.mxu0 %v7093_v37 }
  0xba   : > { %5350 = vmatprep.subr.bf16.mxu1 %v7100_v40  ;;  %5374 = vmatprep.subr.bf16.mxu0 %v7867_v58 }
  0xbd   : > { %5352 = vmatpush1.bf16.msra.mxu1 %v7113_v54  ;;  %5376 = vmatpush3.bf16.msra.mxu0 %v7115_v56 }
  0xbe   : > { %5378 = vmatprep.subr.bf16.mxu0 %v6616_v55  ;;  %5409 = vmatprep.subr.bf16.mxu1 %v7867_v58 }
  0xc0   : > { %1408 = vmatmul.mubr.f32.vlgmr.msra.gmra.mrb[26].mxu1 %v7121_v4  ;;  %4741 = vmatmul.mubr.f32.vlgmr.msra.gmra.mrb[20].mxu0 %v7121_v4 }
  0xc1   : > { %5380 = vmatpush1.bf16.msra.mxu0 %v6657_v5  ;;  %5411 = vmatpush3.bf16.msra.mxu1 %v6653_v2 }
  0xc2   : > { %5382 = vmatprep.subr.bf16.mxu0 %v6665_v8  ;;  %5412 = vmatprep.subr.bf16.mxu1 %v7867_v58 }
  0xc3   : > { %1592 = vmatprep.mubr.f32.mxu0 %v7865_v3  ;;  %4775 = vmatprep.mubr.msk.f32.mxu1 %vm6418_vm1, %v7865_v3 }
  0xc5   : > { %5384 = vmatpush1.bf16.msra.mxu0 %v6686_v14  ;;  %5414 = vmatpush3.bf16.msra.mxu1 %v6682_v13 }
  0xc6   : > { %5386 = vmatprep.subr.bf16.mxu0 %v6696_v17  ;;  %5415 = vmatprep.subr.bf16.mxu1 %v7867_v58 }
  0xc9   : > { %5388 = vmatpush1.bf16.msra.mxu0 %v6719_v24  ;;  %5417 = vmatpush3.bf16.msra.mxu1 %v6715_v23 }
  0xca   : > { %5390 = vmatprep.subr.bf16.mxu0 %v6729_v28  ;;  %5418 = vmatprep.subr.bf16.mxu1 %v7867_v58 }
  0xcd   : > { %5392 = vmatpush1.bf16.msra.mxu0 %v6753_v35  ;;  %5420 = vmatpush3.bf16.msra.mxu1 %v6749_v34 }
  0xce   : > { %5394 = vmatprep.subr.bf16.mxu0 %v6763_v39  ;;  %5421 = vmatprep.subr.bf16.mxu1 %v7867_v58 }
  0xd1   : > { %5396 = vmatpush1.bf16.msra.mxu0 %v6788_v47  ;;  %5423 = vmatpush3.bf16.msra.mxu1 %v6784_v46 }
  0xd2   : > { %5398 = vmatprep.subr.bf16.mxu0 %v6797_v50  ;;  %5424 = vmatprep.subr.bf16.mxu1 %v7867_v58 }
  0xd5   : > { %5400 = vmatpush1.bf16.msra.mxu0 %v6821_v59  ;;  %5426 = vmatpush3.bf16.msra.mxu1 %v6817_v57  ;;  %v7229_v57 = vld [vmem:[%s7862_s7] ss:$0 sm:$0xff] }
  0xd6   : > { %5402 = vmatprep.subr.bf16.mxu0 %v6830_v62  ;;  %5427 = vmatprep.subr.bf16.mxu1 %v7867_v58 }
  0xd9   : > { %5404 = vmatpush1.bf16.msra.mxu0 %v6852_v9  ;;  %5429 = vmatpush3.bf16.msra.mxu1 %v6848_v7 }
  0xda   : > { %5406 = vmatprep.subr.bf16.mxu0 %v6864_v15  ;;  %5430 = vmatprep.subr.bf16.mxu1 %v7867_v58 }
  0xdd   : > { %5408 = vmatpush1.bf16.msra.mxu0 %v6883_v22  ;;  %5432 = vmatpush3.bf16.msra.mxu1 %v6879_v21 }
  0xde   : > { %5434 = vmatprep.subr.bf16.mxu1 %v6885_v25  ;;  %5465 = vmatprep.subr.bf16.mxu0 %v7867_v58 }
  0xfb   : > { %v7164_v26 = vpop.f32.mrb[0].mxu1 }
  0xfc   : > { %7909 = vst [vmem:[#allocation16_spill] sm:$0xff] %v7164_v26  ;;  %v7166_v27 = vpop.f32.mrb[1].mxu1 }
  0xfd   : > { %7910 = vst [vmem:[#allocation17_spill] sm:$0xff] %v7166_v27 }
  0xff   : > { %v7172_v38 = vpop.f32.mrb[2].mxu1 }
 0x100   : > { %7911 = vst [vmem:[#allocation18_spill] sm:$0xff] %v7172_v38  ;;  %v7174_v41 = vpop.f32.mrb[3].mxu1 }
 0x101   : > { %7912 = vst [vmem:[#allocation19_spill] sm:$0xff] %v7174_v41  ;;  %v4207_v41 = vld [vmem:[%s7861_s6 + $0x3] sm:$0x7] }
 0x103   : > { %v4643_v52 = vpop.f32.mrb[4].mxu1 }
 0x104   : > { %v7176_v63 = vadd.f32 %v4643_v52, %v474_v42  ;;  %v682_v1 = vpop.f32.mrb[5].mxu1 }
 0x106   : > { %7913 = vst [vmem:[#allocation20_spill] sm:$0xff] %v7176_v63 }
 0x107   : > { %v4646_v11 = vpop.f32.mrb[6].mxu1 }
 0x108   : > { %v7178_v3 = vadd.f32 %v4646_v11, %v474_v42  ;;  %v692_v58 = vpop.f32.mrb[7].mxu1  ;;  %v7193_v11 = vrot.slane %v4207_v41, %v473_v29 }
 0x109   : > { %v7180_v27 = vadd.f32 %v692_v58, %v474_v42 }
 0x10a   : > { %7914 = vst [vmem:[#allocation21_spill] sm:$0xff] %v7178_v3 }
 0x10b   : > { %7915 = vst [vmem:[#allocation22_spill] sm:$0xff] %v7180_v27  ;;  %v4649_v26 = vpop.f32.mrb[8].mxu1 }
 0x10c   : > { %v7182_v25 = vadd.f32 %v4649_v26, %v474_v42  ;;  %v702_v21 = vpop.f32.mrb[9].mxu1 }
 0x10d   : > { %v7184_v22 = vadd.f32 %v702_v21, %v474_v42 }
 0x10e   : > { %7916 = vst [vmem:[#allocation23_spill] sm:$0xff] %v7182_v25 }
 0x10f   : > { %7917 = vst [vmem:[#allocation24_spill] sm:$0xff] %v7184_v22  ;;  %v4652_v38 = vpop.f32.mrb[10].mxu1 }
 0x110   : > { %v7189_v52 = vadd.f32 %v4652_v38, %v474_v42  ;;  %v712_v63 = vpop.f32.mrb[11].mxu1 }
 0x111   : > { %v7191_v15 = vadd.f32 %v712_v63, %v474_v42 }
 0x112   : > { %7918 = vst [vmem:[#allocation25_spill] sm:$0xff] %v7189_v52 }
 0x113   : > { %7919 = vst [vmem:[#allocation26_spill] sm:$0xff] %v7191_v15  ;;  %v4663_v58 = vpop.f32.mrb[12].mxu0  ;;  %v469_v15 = vsub.s32 1, %v7162_v20 }
 0x114   : > { %v7196_v3 = vadd.f32 %v4663_v58, %v7193_v11  ;;  %v987_v26 = vpop.f32.mrb[13].mxu0 }
 0x115   : > { %v7199_v21 = vadd.f32 %v987_v26, %v7193_v11 }
 0x116   : > { %7920 = vst [vmem:[#allocation27_spill] sm:$0xff] %v7196_v3 }
 0x117   : > { %7921 = vst [vmem:[#allocation28_spill] sm:$0xff] %v7199_v21  ;;  %v4666_v25 = vpop.f32.mrb[14].mxu0 }
 0x118   : > { %v7202_v22 = vadd.f32 %v4666_v25, %v7193_v11  ;;  %v997_v27 = vpop.f32.mrb[15].mxu0  ;;  %v465_v25 = vsub.s32 0, %v7162_v20 }
 0x119   : > { %v7205_v38 = vadd.f32 %v997_v27, %v7193_v11 }
 0x11a   : > { %7922 = vst [vmem:[#allocation29_spill] sm:$0xff] %v7202_v22  ;;  %v7220_v27 = vrot.slane %v461_v30, %v465_v25 }
 0x11b   : > { %7923 = vst [vmem:[#allocation30_spill] sm:$0xff] %v7205_v38  ;;  %v4669_v63 = vpop.f32.mrb[16].mxu0 }
 0x11c   : > { %v7208_v29 = vadd.f32 %v4669_v63, %v7193_v11  ;;  %v1007_v52 = vpop.f32.mrb[17].mxu0  ;;  %7927 = vst [vmem:[#allocation34_spill] sm:$0xff] %v7220_v27 }
 0x11d   : > { %v7211_v58 = vadd.f32 %v1007_v52, %v7193_v11  ;;  %v7223_v52 = vrot.slane %v461_v30, %v469_v15 }
 0x11e   : > { %7924 = vst [vmem:[#allocation31_spill] sm:$0xff] %v7208_v29 }
 0x11f   : > { %7925 = vst [vmem:[#allocation32_spill] sm:$0xff] %v7211_v58  ;;  %v7213_v3 = vpop.f32.mrb[18].mxu0  ;;  %7928 = vst [vmem:[#allocation35_spill] sm:$0xff] %v7223_v52 }
 0x120   : > { %v1017_v26 = vpop.f32.mrb[19].mxu0 }
 0x121   : > { %v7216_v21 = vadd.f32 %v1017_v26, %v7193_v11 }
 0x123   : > { %7926 = vst [vmem:[#allocation33_spill] sm:$0xff] %v7216_v21 }
 0x173   : > { %v1225_v38 = vpop.f32.mrb[0].mxu0  ;;  %v1296_v22 = vpop.f32.mrb[28].mxu1 }
 0x174   : > { %v6165_v63 = vadd.f32 %v1225_v38, %v7220_v27  ;;  %v1227_v29 = vpop.f32.mrb[1].mxu0  ;;  %v4707_v7 = vpop.f32.mrb[29].mxu1  ;;  %v683_v27 = vadd.f32 %v682_v1, %v474_v42 }
 0x175   : > { %v6166_v9 = vadd.f32 %v1227_v29, %v7223_v52  ;;  %v1326_v7 = vadd.f32 %v7229_v57, %v1296_v22  ;;  %v7232_v29 = vrot.slane %v4207_v41, %v465_v25 }
 0x176   : > { %v4273_v58 = vmul.f32 -1.442695, %v6165_v63 }
 0x177   : > { %v4274_v26 = vmul.f32 -1.442695, %v6166_v9 }
 0x178   : > { %6244 = vpow2.f32 %v4273_v58 }
 0x179   : > { %6246 = vpow2.f32 %v4274_v26 }
 0x182   : > { %v6245_v21 = vpop.eup %6244 }
 0x183   : > { %v1310_v62 = vadd.f32 1.0, %v6245_v21  ;;  %v6247_v20 = vpop.eup %6246  ;;  %v7234_v21 = vrot.slane %v4207_v41, %v469_v15 }
 0x184   : > { %v1317_v38 = vadd.f32 1.0, %v6247_v20 }
 0x185   : > { %6248 = vrcp.f32 %v1310_v62 }
 0x186   : > { %6250 = vrcp.f32 %v1317_v38 }
 0x18f   : > { %v6249_v30 = vpop.eup %6248 }
 0x190   : > { %v1327_v63 = vmul.f32 %v6249_v30, %v1326_v7  ;;  %v6251_v42 = vpop.eup %6250  ;;  %v1525_v30 = vpop.permute.xlu1 %1524 }
 0x191   : > { %v1330_v38 = vsub.f32 1.0, %v6251_v42 }
 0x192   : > { %v1328_v9 = vadd.f32 %v1327_v63, %v683_v27  ;;  %v1332_v27 = vmul.f32 %v6251_v42, %v6925_v48  ;;  %v7930_v48 = vmov 0.0   ;;  %v1023_v42 = vadd.f32 %v7213_v3, %v7193_v11 }
 0x193   : > { %v1409_v58 = vpop.f32.mrb[26].mxu1  ;;  %v1480_v26 = vpop.f32.mrb[20].mxu0 }
 0x194   : > { %6252 = vtanh.f32 %v1328_v9  ;;  %v6199_v62 = vadd.f32 %v1409_v58, %v7232_v29  ;;  %v1411_v52 = vpop.f32.mrb[27].mxu1  ;;  %v4742_v59 = vpop.f32.mrb[21].mxu0  ;;  %v7256_v58 = vld [vmem:[%s7862_s7 + $0x1] ss:$0 sm:$0xff] }
 0x195   : > { %v6200_v22 = vadd.f32 %v1411_v52, %v7234_v21  ;;  %v7929_v59 = vmov 0.0|0.0  }
 0x196   : > { %v4277_v20 = vmul.f32 -1.442695, %v6199_v62 }
 0x197   : > { %v4278_v1 = vmul.f32 -1.442695, %v6200_v22 }
 0x198   : > { %6254 = vpow2.f32 %v4277_v20  ;;  %v1510_v20 = vadd.f32 %v7256_v58, %v1480_v26 }
 0x199   : > { %6256 = vpow2.f32 %v4278_v1 }
 0x19e   : > { %v6253_v25 = vpop.eup %6252 }
 0x19f   : > { %v1331_v7 = vmul.f32 %v6253_v25, %v1330_v38 }
 0x1a1   : > { %v1333_v15 = vadd.f32 %v1332_v27, %v1331_v7 }
 0x1a2   : > { %v6255_v41 = vpop.eup %6254 }
 0x1a3   : > { %1334 = vst [vmem:[%s6500_s11] sm:$0xff] %v1333_v15  ;;  %v7240_v63 = vmul.f32 %v1525_v30, %v1333_v15  ;;  %v1494_v9 = vadd.f32 1.0, %v6255_v41  ;;  %v6257_v52 = vpop.eup %6256  ;;  %v1704_v15 = vpop.permute.xlu1 %1703  ;;  %v7932_v30 = vld [vmem:[#allocation7_spill] sm:$0xff] }
 0x1a4   : > { %v1501_v62 = vadd.f32 1.0, %v6257_v52  ;;  %v7934_v52 = vld [vmem:[#allocation11_spill] sm:$0xff] }
 0x1a5   : > { %6258 = vrcp.f32 %v1494_v9  ;;  %1593 = vmatmul.mubr.f32.vlgmr.msra.gmra.mrb[2].mxu0 %v7240_v63  ;;  %4776 = vmatmul.mubr.f32.vlgmr.msra.gmra.mrb[30].mxu1 %v7240_v63  ;;  %v7933_v9 = vld [vmem:[#allocation9_spill] sm:$0xff] }
 0x1a6   : > { %5436 = vmatpush1.bf16.msra.mxu1 %v6918_v43  ;;  %5467 = vmatpush3.bf16.msra.mxu0 %v6920_v44  ;;  %6260 = vrcp.f32 %v1501_v62  ;;  %v7935_v62 = vld [vmem:[#allocation10_spill] sm:$0xff] }
 0x1a7   : > { %5438 = vmatprep.subr.bf16.mxu1 %v6927_v49  ;;  %5468 = vmatprep.subr.bf16.mxu0 %v7929_v59 }
 0x1a8   : > { %1771 = vmatprep.mubr.f32.mxu1 %v7930_v48  ;;  %4810 = vmatprep.mubr.msk.f32.mxu0 %vm6418_vm1, %v7930_v48 }
 0x1aa   : > { %5440 = vmatpush1.bf16.msra.mxu1 %v6948_v60  ;;  %5470 = vmatpush3.bf16.msra.mxu0 %v6950_v61 }
 0x1ab   : > { %5442 = vmatprep.subr.bf16.mxu1 %v6957_v0  ;;  %5471 = vmatprep.subr.bf16.mxu0 %v7929_v59 }
 0x1ae   : > { %5444 = vmatpush1.bf16.msra.mxu1 %v6979_v12  ;;  %5473 = vmatpush3.bf16.msra.mxu0 %v6981_v16 }
 0x1af   : > { %v6259_v22 = vpop.eup %6258  ;;  %5446 = vmatprep.subr.bf16.mxu1 %v6988_v19  ;;  %5474 = vmatprep.subr.bf16.mxu0 %v7929_v59 }
 0x1b0   : > { %v1511_v1 = vmul.f32 %v6259_v22, %v1510_v20  ;;  %v6261_v3 = vpop.eup %6260  ;;  %v7936_v20 = vld [vmem:[#allocation12_spill] sm:$0xff]  ;;  %v7937_v22 = vld [vmem:[#allocation14_spill] sm:$0xff] }
 0x1b1   : > { %v1514_v11 = vsub.f32 1.0, %v6261_v3  ;;  %v1516_v7 = vmul.f32 %v6261_v3, %v7121_v4  ;;  %v7931_v4 = vld [vmem:[#allocation8_spill] sm:$0xff] }
 0x1b2   : > { %v1512_v38 = vadd.f32 %v1511_v1, %v1023_v42  ;;  %5448 = vmatpush1.bf16.msra.mxu1 %v7007_v31  ;;  %5476 = vmatpush3.bf16.msra.mxu0 %v7009_v32  ;;  %v7938_v42 = vld [vmem:[#allocation13_spill] sm:$0xff]  ;;  %v7939_v1 = vld [vmem:[#allocation15_spill] sm:$0xff] }
 0x1b3   : > { %5450 = vmatprep.subr.bf16.mxu1 %v7016_v36  ;;  %5477 = vmatprep.subr.bf16.mxu0 %v7929_v59 }
 0x1b4   : > { %6262 = vtanh.f32 %v1512_v38 }
 0x1b6   : > { %5452 = vmatpush1.bf16.msra.mxu1 %v7035_v45  ;;  %5479 = vmatpush3.bf16.msra.mxu0 %v7037_v51 }
 0x1b7   : > { %5454 = vmatprep.subr.bf16.mxu1 %v7044_v53  ;;  %5480 = vmatprep.subr.bf16.mxu0 %v7929_v59 }
 0x1ba   : > { %5456 = vmatpush1.bf16.msra.mxu1 %v7063_v6  ;;  %5482 = vmatpush3.bf16.msra.mxu0 %v7065_v10 }
 0x1bb   : > { %5458 = vmatprep.subr.bf16.mxu1 %v7072_v18  ;;  %5483 = vmatprep.subr.bf16.mxu0 %v7929_v59 }
 0x1be   : > { %v6263_v26 = vpop.eup %6262  ;;  %5460 = vmatpush1.bf16.msra.mxu1 %v7091_v33  ;;  %5485 = vmatpush3.bf16.msra.mxu0 %v7093_v37 }
 0x1bf   : > { %5462 = vmatprep.subr.bf16.mxu1 %v7100_v40  ;;  %5486 = vmatprep.subr.bf16.mxu0 %v7929_v59  ;;  %v1515_v25 = vmul.f32 %v6263_v26, %v1514_v11  ;;  %v7940_v11 = vld [vmem:[#allocation34_spill] sm:$0xff] }
 0x1c1   : > { %v1517_v27 = vadd.f32 %v1516_v7, %v1515_v25 }
 0x1c2   : > { %5464 = vmatpush1.bf16.msra.mxu1 %v7113_v54  ;;  %5488 = vmatpush3.bf16.msra.mxu0 %v7115_v56 }
 0x1c3   : > { %4280 = vst [vmem:[%s6505_s15 + $0x38] sm:$0xff] %v1517_v27  ;;  %v7287_v41 = vmul.f32 %v1704_v15, %v1517_v27  ;;  %5490 = vmatprep.subr.bf16.mxu0 %v6616_v55  ;;  %5521 = vmatprep.subr.bf16.mxu1 %v7929_v59  ;;  %v7941_v15 = vld [vmem:[#allocation35_spill] sm:$0xff] }
 0x1c5   : > { %1772 = vmatmul.mubr.f32.vlgmr.msra.gmra.mrb[24].mxu1 %v7287_v41  ;;  %4811 = vmatmul.mubr.f32.vlgmr.msra.gmra.mrb[22].mxu0 %v7287_v41 }
 0x1c6   : > { %5492 = vmatpush1.bf16.msra.mxu0 %v6657_v5  ;;  %5523 = vmatpush3.bf16.msra.mxu1 %v6653_v2 }
 0x1c7   : > { %5494 = vmatprep.subr.bf16.mxu0 %v6665_v8  ;;  %5524 = vmatprep.subr.bf16.mxu1 %v7929_v59 }
 0x1c8   : > { %1950 = vmatprep.mubr.f32.mxu0 %v7930_v48  ;;  %4845 = vmatprep.mubr.msk.f32.mxu1 %vm6418_vm1, %v7930_v48 }
 0x1ca   : > { %5496 = vmatpush1.bf16.msra.mxu0 %v6686_v14  ;;  %5526 = vmatpush3.bf16.msra.mxu1 %v6682_v13 }
 0x1cb   : > { %5498 = vmatprep.subr.bf16.mxu0 %v6696_v17  ;;  %5527 = vmatprep.subr.bf16.mxu1 %v7929_v59 }
 0x1ce   : > { %5500 = vmatpush1.bf16.msra.mxu0 %v6719_v24  ;;  %5529 = vmatpush3.bf16.msra.mxu1 %v6715_v23 }
 0x1cf   : > { %5502 = vmatprep.subr.bf16.mxu0 %v6729_v28  ;;  %5530 = vmatprep.subr.bf16.mxu1 %v7929_v59 }
 0x1d2   : > { %5504 = vmatpush1.bf16.msra.mxu0 %v6753_v35  ;;  %5532 = vmatpush3.bf16.msra.mxu1 %v6749_v34 }
 0x1d3   : > { %5506 = vmatprep.subr.bf16.mxu0 %v6763_v39  ;;  %5533 = vmatprep.subr.bf16.mxu1 %v7929_v59 }
 0x1d6   : > { %5508 = vmatpush1.bf16.msra.mxu0 %v6788_v47  ;;  %5535 = vmatpush3.bf16.msra.mxu1 %v6784_v46 }
 0x1d7   : > { %5510 = vmatprep.subr.bf16.mxu0 %v6797_v50  ;;  %5536 = vmatprep.subr.bf16.mxu1 %v7929_v59  ;;  %v7942_v50 = vld [vmem:[#allocation20_spill] sm:$0xff] }
 0x1da   : > { %5512 = vmatpush1.bf16.msra.mxu0 %v7931_v4  ;;  %5538 = vmatpush3.bf16.msra.mxu1 %v7932_v30 }
 0x1db   : > { %5514 = vmatprep.subr.bf16.mxu0 %v7933_v9  ;;  %5539 = vmatprep.subr.bf16.mxu1 %v7929_v59 }
 0x1de   : > { %5516 = vmatpush1.bf16.msra.mxu0 %v7934_v52  ;;  %5541 = vmatpush3.bf16.msra.mxu1 %v7935_v62 }
 0x1df   : > { %5518 = vmatprep.subr.bf16.mxu0 %v7936_v20  ;;  %5542 = vmatprep.subr.bf16.mxu1 %v7929_v59 }
 0x1e2   : > { %5520 = vmatpush1.bf16.msra.mxu0 %v7937_v22  ;;  %5544 = vmatpush3.bf16.msra.mxu1 %v7938_v42 }
 0x1e3   : > { %5546 = vmatprep.subr.bf16.mxu1 %v7939_v1  ;;  %5577 = vmatprep.subr.bf16.mxu0 %v7929_v59 }
 0x278   : > { %v1594_v38 = vpop.f32.mrb[2].mxu0  ;;  %v1665_v3 = vpop.f32.mrb[30].mxu1 }
 0x279   : > { %v6167_v26 = vadd.f32 %v1594_v38, %v7940_v11  ;;  %v1596_v25 = vpop.f32.mrb[3].mxu0  ;;  %v4777_v7 = vpop.f32.mrb[31].mxu1  ;;  %v1689_v1 = vadd.f32 %v7229_v57, %v1665_v3 }
 0x27a   : > { %v6168_v62 = vadd.f32 %v1596_v25, %v7941_v15 }
 0x27b   : > { %v4282_v27 = vmul.f32 -1.442695, %v6167_v26 }
 0x27c   : > { %v4283_v20 = vmul.f32 -1.442695, %v6168_v62 }
 0x27d   : > { %6264 = vpow2.f32 %v4282_v27 }
 0x27e   : > { %6266 = vpow2.f32 %v4283_v20 }
 0x287   : > { %v6265_v52 = vpop.eup %6264 }
 0x288   : > { %v1679_v22 = vadd.f32 1.0, %v6265_v52  ;;  %v6267_v42 = vpop.eup %6266 }
 0x289   : > { %v1686_v9 = vadd.f32 1.0, %v6267_v42 }
 0x28a   : > { %6268 = vrcp.f32 %v1679_v22 }
 0x28b   : > { %6270 = vrcp.f32 %v1686_v9 }
 0x294   : > { %v6269_v30 = vpop.eup %6268 }
 0x295   : > { %v1690_v4 = vmul.f32 %v6269_v30, %v1689_v1  ;;  %v6271_v22 = vpop.eup %6270  ;;  %v1883_v1 = vpop.permute.xlu0 %1882 }
 0x296   : > { %v1693_v3 = vsub.f32 1.0, %v6271_v22 }
 0x297   : > { %v1691_v38 = vadd.f32 %v1690_v4, %v7942_v50  ;;  %v1695_v50 = vmul.f32 %v6271_v22, %v7240_v63 }
 0x298   : > { %v1773_v11 = vpop.f32.mrb[24].mxu1  ;;  %v1844_v7 = vpop.f32.mrb[22].mxu0 }
 0x299   : > { %6272 = vtanh.f32 %v1691_v38  ;;  %v6197_v26 = vadd.f32 %v1773_v11, %v7232_v29  ;;  %v1775_v25 = vpop.f32.mrb[25].mxu1  ;;  %v4812_v62 = vpop.f32.mrb[23].mxu0 }
 0x29a   : > { %v6198_v52 = vadd.f32 %v1775_v25, %v7234_v21  ;;  %v1868_v25 = vadd.f32 %v7256_v58, %v1844_v7 }
 0x29b   : > { %v4286_v20 = vmul.f32 -1.442695, %v6197_v26 }
 0x29c   : > { %v4287_v42 = vmul.f32 -1.442695, %v6198_v52  ;;  %v7943_v52 = vld [vmem:[#allocation33_spill] sm:$0xff] }
 0x29d   : > { %6274 = vpow2.f32 %v4286_v20 }
 0x29e   : > { %6276 = vpow2.f32 %v4287_v42 }
 0x2a3   : > { %v6273_v27 = vpop.eup %6272 }
 0x2a4   : > { %v1694_v30 = vmul.f32 %v6273_v27, %v1693_v3 }
 0x2a6   : > { %v1696_v4 = vadd.f32 %v1695_v50, %v1694_v30 }
 0x2a7   : > { %v6275_v9 = vpop.eup %6274 }
 0x2a8   : > { %v1858_v38 = vadd.f32 1.0, %v6275_v9  ;;  %4284 = vst [vmem:[%s6500_s11 + $0x8] sm:$0xff] %v1696_v4  ;;  %v7336_v11 = vmul.f32 %v1883_v1, %v1696_v4  ;;  %v6277_v63 = vpop.eup %6276  ;;  %v2062_v4 = vpop.permute.xlu1 %2061  ;;  %v7945_v1 = vld [vmem:[#allocation8_spill] sm:$0xff] }
 0x2a9   : > { %v1865_v26 = vadd.f32 1.0, %v6277_v63  ;;  %v7947_v63 = vld [vmem:[#allocation9_spill] sm:$0xff] }
 0x2aa   : > { %6278 = vrcp.f32 %v1858_v38  ;;  %1951 = vmatmul.mubr.f32.vlgmr.msra.gmra.mrb[4].mxu0 %v7336_v11  ;;  %4846 = vmatmul.mubr.f32.vlgmr.msra.gmra.mrb[32].mxu1 %v7336_v11  ;;  %v7946_v38 = vld [vmem:[#allocation7_spill] sm:$0xff] }
 0x2ab   : > { %5548 = vmatpush1.bf16.msra.mxu1 %v6918_v43  ;;  %5579 = vmatpush3.bf16.msra.mxu0 %v6920_v44  ;;  %6280 = vrcp.f32 %v1865_v26  ;;  %v7948_v26 = vld [vmem:[#allocation11_spill] sm:$0xff] }
 0x2ac   : > { %5550 = vmatprep.subr.bf16.mxu1 %v6927_v49  ;;  %5580 = vmatprep.subr.bf16.mxu0 %v7929_v59 }
 0x2ad   : > { %2129 = vmatprep.mubr.f32.mxu1 %v7930_v48  ;;  %4880 = vmatprep.mubr.msk.f32.mxu0 %vm6418_vm1, %v7930_v48 }
 0x2af   : > { %5552 = vmatpush1.bf16.msra.mxu1 %v6948_v60  ;;  %5582 = vmatpush3.bf16.msra.mxu0 %v6950_v61 }
 0x2b0   : > { %5554 = vmatprep.subr.bf16.mxu1 %v6957_v0  ;;  %5583 = vmatprep.subr.bf16.mxu0 %v7929_v59 }
 0x2b3   : > { %5556 = vmatpush1.bf16.msra.mxu1 %v6979_v12  ;;  %5585 = vmatpush3.bf16.msra.mxu0 %v6981_v16 }
 0x2b4   : > { %v6279_v62 = vpop.eup %6278  ;;  %5558 = vmatprep.subr.bf16.mxu1 %v6988_v19  ;;  %5586 = vmatprep.subr.bf16.mxu0 %v7929_v59 }
 0x2b5   : > { %v1869_v20 = vmul.f32 %v6279_v62, %v1868_v25  ;;  %v6281_v7 = vpop.eup %6280  ;;  %v7949_v25 = vld [vmem:[#allocation10_spill] sm:$0xff]  ;;  %v7950_v62 = vld [vmem:[#allocation12_spill] sm:$0xff] }
 0x2b6   : > { %v1872_v42 = vsub.f32 1.0, %v6281_v7  ;;  %v1874_v30 = vmul.f32 %v6281_v7, %v7287_v41  ;;  %v7944_v41 = vld [vmem:[#allocation6_spill] sm:$0xff] }
 0x2b7   : > { %v1870_v22 = vadd.f32 %v1869_v20, %v7943_v52  ;;  %5560 = vmatpush1.bf16.msra.mxu1 %v7007_v31  ;;  %5588 = vmatpush3.bf16.msra.mxu0 %v7009_v32  ;;  %v7951_v20 = vld [vmem:[#allocation14_spill] sm:$0xff]  ;;  %v7952_v52 = vld [vmem:[#allocation13_spill] sm:$0xff] }
 0x2b8   : > { %5562 = vmatprep.subr.bf16.mxu1 %v7016_v36  ;;  %5589 = vmatprep.subr.bf16.mxu0 %v7929_v59 }
 0x2b9   : > { %6282 = vtanh.f32 %v1870_v22  ;;  %v7953_v22 = vld [vmem:[#allocation15_spill] sm:$0xff] }
 0x2bb   : > { %5564 = vmatpush1.bf16.msra.mxu1 %v7035_v45  ;;  %5591 = vmatpush3.bf16.msra.mxu0 %v7037_v51 }
 0x2bc   : > { %5566 = vmatprep.subr.bf16.mxu1 %v7044_v53  ;;  %5592 = vmatprep.subr.bf16.mxu0 %v7929_v59 }
 0x2bf   : > { %5568 = vmatpush1.bf16.msra.mxu1 %v7063_v6  ;;  %5594 = vmatpush3.bf16.msra.mxu0 %v7065_v10 }
 0x2c0   : > { %5570 = vmatprep.subr.bf16.mxu1 %v7072_v18  ;;  %5595 = vmatprep.subr.bf16.mxu0 %v7929_v59 }
 0x2c3   : > { %v6283_v3 = vpop.eup %6282  ;;  %5572 = vmatpush1.bf16.msra.mxu1 %v7091_v33  ;;  %5597 = vmatpush3.bf16.msra.mxu0 %v7093_v37 }
 0x2c4   : > { %5574 = vmatprep.subr.bf16.mxu1 %v7100_v40  ;;  %5598 = vmatprep.subr.bf16.mxu0 %v7929_v59  ;;  %v1873_v27 = vmul.f32 %v6283_v3, %v1872_v42  ;;  %v7954_v3 = vld [vmem:[#allocation34_spill] sm:$0xff] }
 0x2c6   : > { %v1875_v50 = vadd.f32 %v1874_v30, %v1873_v27 }
 0x2c7   : > { %5576 = vmatpush1.bf16.msra.mxu1 %v7113_v54  ;;  %5600 = vmatpush3.bf16.msra.mxu0 %v7115_v56 }
 0x2c8   : > { %4288 = vst [vmem:[%s6505_s15 + $0x30] sm:$0xff] %v1875_v50  ;;  %v7377_v9 = vmul.f32 %v2062_v4, %v1875_v50  ;;  %5602 = vmatprep.subr.bf16.mxu0 %v6616_v55  ;;  %5633 = vmatprep.subr.bf16.mxu1 %v7929_v59 }
 0x2ca   : > { %2130 = vmatmul.mubr.f32.vlgmr.msra.gmra.mrb[22].mxu1 %v7377_v9  ;;  %4881 = vmatmul.mubr.f32.vlgmr.msra.gmra.mrb[24].mxu0 %v7377_v9 }
 0x2cb   : > { %5604 = vmatpush1.bf16.msra.mxu0 %v6657_v5  ;;  %5635 = vmatpush3.bf16.msra.mxu1 %v6653_v2 }
 0x2cc   : > { %5606 = vmatprep.subr.bf16.mxu0 %v6665_v8  ;;  %5636 = vmatprep.subr.bf16.mxu1 %v7929_v59 }
 0x2cd   : > { %2308 = vmatprep.mubr.f32.mxu0 %v7930_v48  ;;  %4915 = vmatprep.mubr.msk.f32.mxu1 %vm6418_vm1, %v7930_v48 }
 0x2cf   : > { %5608 = vmatpush1.bf16.msra.mxu0 %v6686_v14  ;;  %5638 = vmatpush3.bf16.msra.mxu1 %v6682_v13 }
 0x2d0   : > { %5610 = vmatprep.subr.bf16.mxu0 %v6696_v17  ;;  %5639 = vmatprep.subr.bf16.mxu1 %v7929_v59 }
 0x2d3   : > { %5612 = vmatpush1.bf16.msra.mxu0 %v6719_v24  ;;  %5641 = vmatpush3.bf16.msra.mxu1 %v6715_v23 }
 0x2d4   : > { %5614 = vmatprep.subr.bf16.mxu0 %v6729_v28  ;;  %5642 = vmatprep.subr.bf16.mxu1 %v7929_v59 }
 0x2d7   : > { %5616 = vmatpush1.bf16.msra.mxu0 %v6753_v35  ;;  %5644 = vmatpush3.bf16.msra.mxu1 %v6749_v34 }
 0x2d8   : > { %5618 = vmatprep.subr.bf16.mxu0 %v6763_v39  ;;  %5645 = vmatprep.subr.bf16.mxu1 %v7929_v59 }
 0x2db   : > { %5620 = vmatpush1.bf16.msra.mxu0 %v6788_v47  ;;  %5647 = vmatpush3.bf16.msra.mxu1 %v6784_v46 }
 0x2dc   : > { %5622 = vmatprep.subr.bf16.mxu0 %v7944_v41  ;;  %5648 = vmatprep.subr.bf16.mxu1 %v7929_v59  ;;  %v7955_v41 = vld [vmem:[#allocation22_spill] sm:$0xff] }
 0x2df   : > { %5624 = vmatpush1.bf16.msra.mxu0 %v7945_v1  ;;  %5650 = vmatpush3.bf16.msra.mxu1 %v7946_v38 }
 0x2e0   : > { %5626 = vmatprep.subr.bf16.mxu0 %v7947_v63  ;;  %5651 = vmatprep.subr.bf16.mxu1 %v7929_v59 }
 0x2e3   : > { %5628 = vmatpush1.bf16.msra.mxu0 %v7948_v26  ;;  %5653 = vmatpush3.bf16.msra.mxu1 %v7949_v25 }
 0x2e4   : > { %5630 = vmatprep.subr.bf16.mxu0 %v7950_v62  ;;  %5654 = vmatprep.subr.bf16.mxu1 %v7929_v59 }
 0x2e7   : > { %5632 = vmatpush1.bf16.msra.mxu0 %v7951_v20  ;;  %5656 = vmatpush3.bf16.msra.mxu1 %v7952_v52 }
 0x2e8   : > { %5658 = vmatprep.subr.bf16.mxu1 %v7953_v22  ;;  %5689 = vmatprep.subr.bf16.mxu0 %v7929_v59 }
 0x37d   : > { %v1952_v7 = vpop.f32.mrb[4].mxu0  ;;  %v2023_v42 = vpop.f32.mrb[32].mxu1 }
 0x37e   : > { %v6169_v27 = vadd.f32 %v1952_v7, %v7954_v3  ;;  %v1954_v30 = vpop.f32.mrb[5].mxu0  ;;  %v4847_v50 = vpop.f32.mrb[33].mxu1  ;;  %v2047_v22 = vadd.f32 %v7229_v57, %v2023_v42 }
 0x37f   : > { %v6170_v25 = vadd.f32 %v1954_v30, %v7941_v15 }
 0x380   : > { %v4290_v4 = vmul.f32 -1.442695, %v6169_v27 }
 0x381   : > { %v4291_v62 = vmul.f32 -1.442695, %v6170_v25 }
 0x382   : > { %6284 = vpow2.f32 %v4290_v4 }
 0x383   : > { %6286 = vpow2.f32 %v4291_v62 }
 0x38c   : > { %v6285_v26 = vpop.eup %6284 }
 0x38d   : > { %v2037_v20 = vadd.f32 1.0, %v6285_v26  ;;  %v6287_v52 = vpop.eup %6286 }
 0x38e   : > { %v2044_v63 = vadd.f32 1.0, %v6287_v52 }
 0x38f   : > { %6288 = vrcp.f32 %v2037_v20 }
 0x390   : > { %6290 = vrcp.f32 %v2044_v63 }
 0x399   : > { %v6289_v38 = vpop.eup %6288 }
 0x39a   : > { %v2048_v1 = vmul.f32 %v6289_v38, %v2047_v22  ;;  %v6291_v20 = vpop.eup %6290  ;;  %v2241_v22 = vpop.permute.xlu0 %2240 }
 0x39b   : > { %v2051_v42 = vsub.f32 1.0, %v6291_v20 }
 0x39c   : > { %v2049_v7 = vadd.f32 %v2048_v1, %v7955_v41  ;;  %v2053_v41 = vmul.f32 %v6291_v20, %v7336_v11 }
 0x39d   : > { %v2131_v3 = vpop.f32.mrb[22].mxu1  ;;  %v2202_v50 = vpop.f32.mrb[24].mxu0 }
 0x39e   : > { %6292 = vtanh.f32 %v2049_v7  ;;  %v6195_v27 = vadd.f32 %v2131_v3, %v7232_v29  ;;  %v2133_v30 = vpop.f32.mrb[23].mxu1  ;;  %v4882_v25 = vpop.f32.mrb[25].mxu0 }
 0x39f   : > { %v6196_v26 = vadd.f32 %v2133_v30, %v7234_v21  ;;  %v2226_v30 = vadd.f32 %v7256_v58, %v2202_v50 }
 0x3a0   : > { %v4294_v62 = vmul.f32 -1.442695, %v6195_v27 }
 0x3a1   : > { %v4295_v52 = vmul.f32 -1.442695, %v6196_v26  ;;  %v7956_v26 = vld [vmem:[#allocation31_spill] sm:$0xff] }
 0x3a2   : > { %6294 = vpow2.f32 %v4294_v62 }
 0x3a3   : > { %6296 = vpow2.f32 %v4295_v52 }
 0x3a8   : > { %v6293_v4 = vpop.eup %6292 }
 0x3a9   : > { %v2052_v38 = vmul.f32 %v6293_v4, %v2051_v42 }
 0x3ab   : > { %v2054_v1 = vadd.f32 %v2053_v41, %v2052_v38 }
 0x3ac   : > { %v6295_v63 = vpop.eup %6294 }
 0x3ad   : > { %v2216_v7 = vadd.f32 1.0, %v6295_v63  ;;  %4292 = vst [vmem:[%s6500_s11 + $0x10] sm:$0xff] %v2054_v1  ;;  %v7426_v3 = vmul.f32 %v2241_v22, %v2054_v1  ;;  %v6297_v11 = vpop.eup %6296  ;;  %v2420_v1 = vpop.permute.xlu1 %2419  ;;  %v7958_v22 = vld [vmem:[#allocation8_spill] sm:$0xff] }
 0x3ae   : > { %v2223_v27 = vadd.f32 1.0, %v6297_v11  ;;  %v7960_v11 = vld [vmem:[#allocation9_spill] sm:$0xff] }
 0x3af   : > { %6298 = vrcp.f32 %v2216_v7  ;;  %2309 = vmatmul.mubr.f32.vlgmr.msra.gmra.mrb[6].mxu0 %v7426_v3  ;;  %4916 = vmatmul.mubr.f32.vlgmr.msra.gmra.mrb[34].mxu1 %v7426_v3  ;;  %v7959_v7 = vld [vmem:[#allocation7_spill] sm:$0xff] }
 0x3b0   : > { %5660 = vmatpush1.bf16.msra.mxu1 %v6918_v43  ;;  %5691 = vmatpush3.bf16.msra.mxu0 %v6920_v44  ;;  %6300 = vrcp.f32 %v2223_v27  ;;  %v7961_v27 = vld [vmem:[#allocation11_spill] sm:$0xff] }
 0x3b1   : > { %5662 = vmatprep.subr.bf16.mxu1 %v6927_v49  ;;  %5692 = vmatprep.subr.bf16.mxu0 %v7929_v59 }
 0x3b2   : > { %2487 = vmatprep.mubr.f32.mxu1 %v7930_v48  ;;  %4950 = vmatprep.mubr.msk.f32.mxu0 %vm6418_vm1, %v7930_v48 }
 0x3b4   : > { %5664 = vmatpush1.bf16.msra.mxu1 %v6948_v60  ;;  %5694 = vmatpush3.bf16.msra.mxu0 %v6950_v61 }
 0x3b5   : > { %5666 = vmatprep.subr.bf16.mxu1 %v6957_v0  ;;  %5695 = vmatprep.subr.bf16.mxu0 %v7929_v59 }
 0x3b8   : > { %5668 = vmatpush1.bf16.msra.mxu1 %v6979_v12  ;;  %5697 = vmatpush3.bf16.msra.mxu0 %v6981_v16 }
 0x3b9   : > { %v6299_v25 = vpop.eup %6298  ;;  %5670 = vmatprep.subr.bf16.mxu1 %v6988_v19  ;;  %5698 = vmatprep.subr.bf16.mxu0 %v7929_v59 }
 0x3ba   : > { %v2227_v62 = vmul.f32 %v6299_v25, %v2226_v30  ;;  %v6301_v50 = vpop.eup %6300  ;;  %v7962_v30 = vld [vmem:[#allocation10_spill] sm:$0xff]  ;;  %v7963_v25 = vld [vmem:[#allocation12_spill] sm:$0xff] }
 0x3bb   : > { %v2230_v52 = vsub.f32 1.0, %v6301_v50  ;;  %v2232_v38 = vmul.f32 %v6301_v50, %v7377_v9  ;;  %v7957_v9 = vld [vmem:[#allocation6_spill] sm:$0xff] }
 0x3bc   : > { %v2228_v20 = vadd.f32 %v2227_v62, %v7956_v26  ;;  %5672 = vmatpush1.bf16.msra.mxu1 %v7007_v31  ;;  %5700 = vmatpush3.bf16.msra.mxu0 %v7009_v32  ;;  %v7964_v62 = vld [vmem:[#allocation14_spill] sm:$0xff]  ;;  %v7965_v26 = vld [vmem:[#allocation13_spill] sm:$0xff] }
 0x3bd   : > { %5674 = vmatprep.subr.bf16.mxu1 %v7016_v36  ;;  %5701 = vmatprep.subr.bf16.mxu0 %v7929_v59 }
 0x3be   : > { %6302 = vtanh.f32 %v2228_v20  ;;  %v7966_v20 = vld [vmem:[#allocation15_spill] sm:$0xff] }
 0x3c0   : > { %5676 = vmatpush1.bf16.msra.mxu1 %v7035_v45  ;;  %5703 = vmatpush3.bf16.msra.mxu0 %v7037_v51 }
 0x3c1   : > { %5678 = vmatprep.subr.bf16.mxu1 %v7044_v53  ;;  %5704 = vmatprep.subr.bf16.mxu0 %v7929_v59 }
 0x3c4   : > { %5680 = vmatpush1.bf16.msra.mxu1 %v7063_v6  ;;  %5706 = vmatpush3.bf16.msra.mxu0 %v7065_v10 }
 0x3c5   : > { %5682 = vmatprep.subr.bf16.mxu1 %v7072_v18  ;;  %5707 = vmatprep.subr.bf16.mxu0 %v7929_v59 }
 0x3c8   : > { %v6303_v42 = vpop.eup %6302  ;;  %5684 = vmatpush1.bf16.msra.mxu1 %v7091_v33  ;;  %5709 = vmatpush3.bf16.msra.mxu0 %v7093_v37 }
 0x3c9   : > { %5686 = vmatprep.subr.bf16.mxu1 %v7100_v40  ;;  %5710 = vmatprep.subr.bf16.mxu0 %v7929_v59  ;;  %v2231_v4 = vmul.f32 %v6303_v42, %v2230_v52  ;;  %v7967_v42 = vld [vmem:[#allocation34_spill] sm:$0xff] }
 0x3cb   : > { %v2233_v41 = vadd.f32 %v2232_v38, %v2231_v4 }
 0x3cc   : > { %5688 = vmatpush1.bf16.msra.mxu1 %v7113_v54  ;;  %5712 = vmatpush3.bf16.msra.mxu0 %v7115_v56 }
 0x3cd   : > { %4296 = vst [vmem:[%s6505_s15 + $0x28] sm:$0xff] %v2233_v41  ;;  %v7467_v63 = vmul.f32 %v2420_v1, %v2233_v41  ;;  %5714 = vmatprep.subr.bf16.mxu0 %v6616_v55  ;;  %5745 = vmatprep.subr.bf16.mxu1 %v7929_v59 }
 0x3cf   : > { %2488 = vmatmul.mubr.f32.vlgmr.msra.gmra.mrb[20].mxu1 %v7467_v63  ;;  %4951 = vmatmul.mubr.f32.vlgmr.msra.gmra.mrb[26].mxu0 %v7467_v63 }
 0x3d0   : > { %5716 = vmatpush1.bf16.msra.mxu0 %v6657_v5  ;;  %5747 = vmatpush3.bf16.msra.mxu1 %v6653_v2 }
 0x3d1   : > { %5718 = vmatprep.subr.bf16.mxu0 %v6665_v8  ;;  %5748 = vmatprep.subr.bf16.mxu1 %v7929_v59 }
 0x3d2   : > { %2666 = vmatprep.mubr.f32.mxu0 %v7930_v48  ;;  %4985 = vmatprep.mubr.msk.f32.mxu1 %vm6418_vm1, %v7930_v48 }
 0x3d4   : > { %5720 = vmatpush1.bf16.msra.mxu0 %v6686_v14  ;;  %5750 = vmatpush3.bf16.msra.mxu1 %v6682_v13 }
 0x3d5   : > { %5722 = vmatprep.subr.bf16.mxu0 %v6696_v17  ;;  %5751 = vmatprep.subr.bf16.mxu1 %v7929_v59 }
 0x3d8   : > { %5724 = vmatpush1.bf16.msra.mxu0 %v6719_v24  ;;  %5753 = vmatpush3.bf16.msra.mxu1 %v6715_v23 }
 0x3d9   : > { %5726 = vmatprep.subr.bf16.mxu0 %v6729_v28  ;;  %5754 = vmatprep.subr.bf16.mxu1 %v7929_v59 }
 0x3dc   : > { %5728 = vmatpush1.bf16.msra.mxu0 %v6753_v35  ;;  %5756 = vmatpush3.bf16.msra.mxu1 %v6749_v34 }
 0x3dd   : > { %5730 = vmatprep.subr.bf16.mxu0 %v6763_v39  ;;  %5757 = vmatprep.subr.bf16.mxu1 %v7929_v59 }
 0x3e0   : > { %5732 = vmatpush1.bf16.msra.mxu0 %v6788_v47  ;;  %5759 = vmatpush3.bf16.msra.mxu1 %v6784_v46 }
 0x3e1   : > { %5734 = vmatprep.subr.bf16.mxu0 %v7957_v9  ;;  %5760 = vmatprep.subr.bf16.mxu1 %v7929_v59  ;;  %v7968_v9 = vld [vmem:[#allocation21_spill] sm:$0xff] }
 0x3e4   : > { %5736 = vmatpush1.bf16.msra.mxu0 %v7958_v22  ;;  %5762 = vmatpush3.bf16.msra.mxu1 %v7959_v7 }
 0x3e5   : > { %5738 = vmatprep.subr.bf16.mxu0 %v7960_v11  ;;  %5763 = vmatprep.subr.bf16.mxu1 %v7929_v59 }
 0x3e8   : > { %5740 = vmatpush1.bf16.msra.mxu0 %v7961_v27  ;;  %5765 = vmatpush3.bf16.msra.mxu1 %v7962_v30 }
 0x3e9   : > { %5742 = vmatprep.subr.bf16.mxu0 %v7963_v25  ;;  %5766 = vmatprep.subr.bf16.mxu1 %v7929_v59 }
 0x3ec   : > { %5744 = vmatpush1.bf16.msra.mxu0 %v7964_v62  ;;  %5768 = vmatpush3.bf16.msra.mxu1 %v7965_v26 }
 0x3ed   : > { %5770 = vmatprep.subr.bf16.mxu1 %v7966_v20  ;;  %5801 = vmatprep.subr.bf16.mxu0 %v7929_v59 }
 0x482   : > { %v2310_v50 = vpop.f32.mrb[6].mxu0  ;;  %v2381_v52 = vpop.f32.mrb[34].mxu1 }
 0x483   : > { %v6171_v4 = vadd.f32 %v2310_v50, %v7967_v42  ;;  %v2312_v38 = vpop.f32.mrb[7].mxu0  ;;  %v4917_v41 = vpop.f32.mrb[35].mxu1  ;;  %v2405_v20 = vadd.f32 %v7229_v57, %v2381_v52 }
 0x484   : > { %v6172_v30 = vadd.f32 %v2312_v38, %v7941_v15 }
 0x485   : > { %v4298_v1 = vmul.f32 -1.442695, %v6171_v4 }
 0x486   : > { %v4299_v25 = vmul.f32 -1.442695, %v6172_v30 }
 0x487   : > { %6304 = vpow2.f32 %v4298_v1 }
 0x488   : > { %6306 = vpow2.f32 %v4299_v25 }
 0x491   : > { %v6305_v27 = vpop.eup %6304 }
 0x492   : > { %v2395_v62 = vadd.f32 1.0, %v6305_v27  ;;  %v6307_v26 = vpop.eup %6306 }
 0x493   : > { %v2402_v11 = vadd.f32 1.0, %v6307_v26 }
 0x494   : > { %6308 = vrcp.f32 %v2395_v62 }
 0x495   : > { %6310 = vrcp.f32 %v2402_v11 }
 0x49e   : > { %v6309_v7 = vpop.eup %6308 }
 0x49f   : > { %v2406_v22 = vmul.f32 %v6309_v7, %v2405_v20  ;;  %v6311_v62 = vpop.eup %6310  ;;  %v2599_v20 = vpop.permute.xlu0 %2598 }
 0x4a0   : > { %v2409_v57 = vsub.f32 1.0, %v6311_v62 }
 0x4a1   : > { %v2407_v50 = vadd.f32 %v2406_v22, %v7968_v9  ;;  %v2411_v9 = vmul.f32 %v6311_v62, %v7426_v3 }
 0x4a2   : > { %v2489_v42 = vpop.f32.mrb[20].mxu1  ;;  %v2560_v41 = vpop.f32.mrb[26].mxu0 }
 0x4a3   : > { %6312 = vtanh.f32 %v2407_v50  ;;  %v6193_v4 = vadd.f32 %v2489_v42, %v7232_v29  ;;  %v2491_v38 = vpop.f32.mrb[21].mxu1  ;;  %v4952_v30 = vpop.f32.mrb[27].mxu0 }
 0x4a4   : > { %v6194_v27 = vadd.f32 %v2491_v38, %v7234_v21 }
 0x4a5   : > { %v4302_v25 = vmul.f32 -1.442695, %v6193_v4  ;;  %v2584_v4 = vadd.f32 %v7256_v58, %v2560_v41 }
 0x4a6   : > { %v4303_v26 = vmul.f32 -1.442695, %v6194_v27 }
 0x4a7   : > { %6314 = vpow2.f32 %v4302_v25  ;;  %v7969_v25 = vld [vmem:[#allocation32_spill] sm:$0xff] }
 0x4a8   : > { %6316 = vpow2.f32 %v4303_v26 }
 0x4ad   : > { %v6313_v52 = vpop.eup %6312 }
 0x4ae   : > { %v2410_v7 = vmul.f32 %v6313_v52, %v2409_v57 }
 0x4b0   : > { %v2412_v22 = vadd.f32 %v2411_v9, %v2410_v7  ;;  %v2777_v7 = vpop.permute.xlu1 %2776 }
 0x4b1   : > { %v6315_v11 = vpop.eup %6314 }
 0x4b2   : > { %v2574_v1 = vadd.f32 1.0, %v6315_v11  ;;  %4300 = vst [vmem:[%s6500_s11 + $0x18] sm:$0xff] %v2412_v22  ;;  %v7516_v42 = vmul.f32 %v2599_v20, %v2412_v22  ;;  %v6317_v3 = vpop.eup %6316  ;;  %v7971_v22 = vld [vmem:[#allocation8_spill] sm:$0xff]  ;;  %v7972_v11 = vld [vmem:[#allocation7_spill] sm:$0xff]  ;;  %v7973_v20 = vld [vmem:[#allocation9_spill] sm:$0xff] }
 0x4b3   : > { %v2581_v50 = vadd.f32 1.0, %v6317_v3  ;;  %v7975_v3 = vld [vmem:[#allocation10_spill] sm:$0xff] }
 0x4b4   : > { %6318 = vrcp.f32 %v2574_v1  ;;  %2667 = vmatmul.mubr.f32.vlgmr.msra.gmra.mrb[8].mxu0 %v7516_v42  ;;  %4986 = vmatmul.mubr.f32.vlgmr.msra.gmra.mrb[36].mxu1 %v7516_v42  ;;  %v7974_v1 = vld [vmem:[#allocation11_spill] sm:$0xff] }
 0x4b5   : > { %5772 = vmatpush1.bf16.msra.mxu1 %v6918_v43  ;;  %5803 = vmatpush3.bf16.msra.mxu0 %v6920_v44  ;;  %6320 = vrcp.f32 %v2581_v50  ;;  %v7976_v50 = vld [vmem:[#allocation12_spill] sm:$0xff] }
 0x4b6   : > { %5774 = vmatprep.subr.bf16.mxu1 %v6927_v49  ;;  %5804 = vmatprep.subr.bf16.mxu0 %v7929_v59 }
 0x4b7   : > { %2844 = vmatprep.mubr.f32.mxu1 %v7930_v48  ;;  %5020 = vmatprep.mubr.msk.f32.mxu0 %vm6418_vm1, %v7930_v48 }
 0x4b9   : > { %5776 = vmatpush1.bf16.msra.mxu1 %v6948_v60  ;;  %5806 = vmatpush3.bf16.msra.mxu0 %v6950_v61 }
 0x4ba   : > { %5778 = vmatprep.subr.bf16.mxu1 %v6957_v0  ;;  %5807 = vmatprep.subr.bf16.mxu0 %v7929_v59 }
 0x4bd   : > { %5780 = vmatpush1.bf16.msra.mxu1 %v6979_v12  ;;  %5809 = vmatpush3.bf16.msra.mxu0 %v6981_v16 }
 0x4be   : > { %v6319_v38 = vpop.eup %6318  ;;  %5782 = vmatprep.subr.bf16.mxu1 %v6988_v19  ;;  %5810 = vmatprep.subr.bf16.mxu0 %v7929_v59 }
 0x4bf   : > { %v2585_v30 = vmul.f32 %v6319_v38, %v2584_v4  ;;  %v6321_v58 = vpop.eup %6320  ;;  %v7977_v4 = vld [vmem:[#allocation14_spill] sm:$0xff]  ;;  %v7978_v38 = vld [vmem:[#allocation13_spill] sm:$0xff] }
 0x4c0   : > { %v2588_v41 = vsub.f32 1.0, %v6321_v58  ;;  %v2590_v57 = vmul.f32 %v6321_v58, %v7467_v63  ;;  %v7970_v63 = vld [vmem:[#allocation6_spill] sm:$0xff] }
 0x4c1   : > { %v2586_v27 = vadd.f32 %v2585_v30, %v7969_v25  ;;  %5784 = vmatpush1.bf16.msra.mxu1 %v7007_v31  ;;  %5812 = vmatpush3.bf16.msra.mxu0 %v7009_v32  ;;  %v7979_v30 = vld [vmem:[#allocation15_spill] sm:$0xff]  ;;  %v7980_v58 = vld [vmem:[#allocation34_spill] sm:$0xff] }
 0x4c2   : > { %5786 = vmatprep.subr.bf16.mxu1 %v7016_v36  ;;  %5813 = vmatprep.subr.bf16.mxu0 %v7929_v59 }
 0x4c3   : > { %6322 = vtanh.f32 %v2586_v27 }
 0x4c5   : > { %5788 = vmatpush1.bf16.msra.mxu1 %v7035_v45  ;;  %5815 = vmatpush3.bf16.msra.mxu0 %v7037_v51 }
 0x4c6   : > { %5790 = vmatprep.subr.bf16.mxu1 %v7044_v53  ;;  %5816 = vmatprep.subr.bf16.mxu0 %v7929_v59 }
 0x4c9   : > { %5792 = vmatpush1.bf16.msra.mxu1 %v7063_v6  ;;  %5818 = vmatpush3.bf16.msra.mxu0 %v7065_v10 }
 0x4ca   : > { %5794 = vmatprep.subr.bf16.mxu1 %v7072_v18  ;;  %5819 = vmatprep.subr.bf16.mxu0 %v7929_v59 }
 0x4cd   : > { %v6323_v62 = vpop.eup %6322  ;;  %5796 = vmatpush1.bf16.msra.mxu1 %v7091_v33  ;;  %5821 = vmatpush3.bf16.msra.mxu0 %v7093_v37 }
 0x4ce   : > { %5798 = vmatprep.subr.bf16.mxu1 %v7100_v40  ;;  %5822 = vmatprep.subr.bf16.mxu0 %v7929_v59  ;;  %v2589_v26 = vmul.f32 %v6323_v62, %v2588_v41 }
 0x4d0   : > { %v2591_v52 = vadd.f32 %v2590_v57, %v2589_v26 }
 0x4d1   : > { %5800 = vmatpush1.bf16.msra.mxu1 %v7113_v54  ;;  %5824 = vmatpush3.bf16.msra.mxu0 %v7115_v56 }
 0x4d2   : > { %4304 = vst [vmem:[%s6505_s15 + $0x20] sm:$0xff] %v2591_v52  ;;  %v7557_v9 = vmul.f32 %v2777_v7, %v2591_v52  ;;  %5826 = vmatprep.subr.bf16.mxu0 %v6616_v55  ;;  %5857 = vmatprep.subr.bf16.mxu1 %v7929_v59 }
 0x4d4   : > { %2845 = vmatmul.mubr.f32.vlgmr.msra.gmra.mrb[18].mxu1 %v7557_v9  ;;  %5021 = vmatmul.mubr.f32.vlgmr.msra.gmra.mrb[28].mxu0 %v7557_v9 }
 0x4d5   : > { %5828 = vmatpush1.bf16.msra.mxu0 %v6657_v5  ;;  %5859 = vmatpush3.bf16.msra.mxu1 %v6653_v2 }
 0x4d6   : > { %5830 = vmatprep.subr.bf16.mxu0 %v6665_v8  ;;  %5860 = vmatprep.subr.bf16.mxu1 %v7929_v59 }
 0x4d7   : > { %3022 = vmatprep.mubr.f32.mxu0 %v7930_v48  ;;  %5055 = vmatprep.mubr.msk.f32.mxu1 %vm6418_vm1, %v7930_v48 }
 0x4d9   : > { %5832 = vmatpush1.bf16.msra.mxu0 %v6686_v14  ;;  %5862 = vmatpush3.bf16.msra.mxu1 %v6682_v13 }
 0x4da   : > { %5834 = vmatprep.subr.bf16.mxu0 %v6696_v17  ;;  %5863 = vmatprep.subr.bf16.mxu1 %v7929_v59 }
 0x4dd   : > { %5836 = vmatpush1.bf16.msra.mxu0 %v6719_v24  ;;  %5865 = vmatpush3.bf16.msra.mxu1 %v6715_v23 }
 0x4de   : > { %5838 = vmatprep.subr.bf16.mxu0 %v6729_v28  ;;  %5866 = vmatprep.subr.bf16.mxu1 %v7929_v59 }
 0x4e1   : > { %5840 = vmatpush1.bf16.msra.mxu0 %v6753_v35  ;;  %5868 = vmatpush3.bf16.msra.mxu1 %v6749_v34 }
 0x4e2   : > { %5842 = vmatprep.subr.bf16.mxu0 %v6763_v39  ;;  %5869 = vmatprep.subr.bf16.mxu1 %v7929_v59 }
 0x4e5   : > { %5844 = vmatpush1.bf16.msra.mxu0 %v6788_v47  ;;  %5871 = vmatpush3.bf16.msra.mxu1 %v6784_v46 }
 0x4e6   : > { %5846 = vmatprep.subr.bf16.mxu0 %v7970_v63  ;;  %5872 = vmatprep.subr.bf16.mxu1 %v7929_v59 }
 0x4e9   : > { %5848 = vmatpush1.bf16.msra.mxu0 %v7971_v22  ;;  %5874 = vmatpush3.bf16.msra.mxu1 %v7972_v11 }
 0x4ea   : > { %5850 = vmatprep.subr.bf16.mxu0 %v7973_v20  ;;  %5875 = vmatprep.subr.bf16.mxu1 %v7929_v59 }
 0x4ed   : > { %5852 = vmatpush1.bf16.msra.mxu0 %v7974_v1  ;;  %5877 = vmatpush3.bf16.msra.mxu1 %v7975_v3 }
 0x4ee   : > { %5854 = vmatprep.subr.bf16.mxu0 %v7976_v50  ;;  %5878 = vmatprep.subr.bf16.mxu1 %v7929_v59 }
 0x4f1   : > { %5856 = vmatpush1.bf16.msra.mxu0 %v7977_v4  ;;  %5880 = vmatpush3.bf16.msra.mxu1 %v7978_v38 }
 0x4f2   : > { %5882 = vmatprep.subr.bf16.mxu1 %v7979_v30  ;;  %5913 = vmatprep.subr.bf16.mxu0 %v7929_v59  ;;  %v7603_v30 = vld [vmem:[%s7862_s7] ss:$0 sm:$0xff] }
 0x4f3   : > { %7981 = vst [vmem:[#allocation20_spill] sm:$0xff] %v7603_v30 }
 0x587   : > { %v2668_v25 = vpop.f32.mrb[8].mxu0  ;;  %v2739_v27 = vpop.f32.mrb[36].mxu1 }
 0x588   : > { %v6173_v41 = vadd.f32 %v2668_v25, %v7980_v58  ;;  %v2670_v62 = vpop.f32.mrb[9].mxu0  ;;  %v4987_v26 = vpop.f32.mrb[37].mxu1  ;;  %v2762_v25 = vadd.f32 %v7603_v30, %v2739_v27 }
 0x589   : > { %v6174_v52 = vadd.f32 %v2670_v62, %v7941_v15 }
 0x58a   : > { %v4306_v57 = vmul.f32 -1.442695, %v6173_v41  ;;  %v7982_v41 = vld [vmem:[#allocation24_spill] sm:$0xff] }
 0x58b   : > { %v4307_v7 = vmul.f32 -1.442695, %v6174_v52 }
 0x58c   : > { %6324 = vpow2.f32 %v4306_v57 }
 0x58d   : > { %6326 = vpow2.f32 %v4307_v7 }
 0x596   : > { %v6325_v50 = vpop.eup %6324 }
 0x597   : > { %v2752_v4 = vadd.f32 1.0, %v6325_v50  ;;  %v6327_v38 = vpop.eup %6326 }
 0x598   : > { %v2759_v3 = vadd.f32 1.0, %v6327_v38 }
 0x599   : > { %6328 = vrcp.f32 %v2752_v4 }
 0x59a   : > { %6330 = vrcp.f32 %v2759_v3 }
 0x5a3   : > { %v6329_v58 = vpop.eup %6328 }
 0x5a4   : > { %v2763_v26 = vmul.f32 %v6329_v58, %v2762_v25  ;;  %v6331_v1 = vpop.eup %6330 }
 0x5a5   : > { %v2766_v27 = vsub.f32 1.0, %v6331_v1  ;;  %v2768_v58 = vmul.f32 %v6331_v1, %v7516_v42 }
 0x5a6   : > { %v2764_v62 = vadd.f32 %v2763_v26, %v7982_v41  ;;  %v2955_v41 = vpop.permute.xlu0 %2954 }
 0x5a7   : > { %v2846_v57 = vpop.f32.mrb[18].mxu1  ;;  %v2917_v52 = vpop.f32.mrb[28].mxu0 }
 0x5a8   : > { %6332 = vtanh.f32 %v2764_v62  ;;  %v6191_v50 = vadd.f32 %v2846_v57, %v7232_v29  ;;  %v2848_v4 = vpop.f32.mrb[19].mxu1  ;;  %v5022_v38 = vpop.f32.mrb[29].mxu0 }
 0x5a9   : > { %v6192_v15 = vadd.f32 %v2848_v4, %v7234_v21  ;;  %v7983_v4 = vld [vmem:[#allocation29_spill] sm:$0xff] }
 0x5aa   : > { %v4310_v7 = vmul.f32 -1.442695, %v6191_v50 }
 0x5ab   : > { %v4311_v20 = vmul.f32 -1.442695, %v6192_v15 }
 0x5ac   : > { %6334 = vpow2.f32 %v4310_v7 }
 0x5ad   : > { %6336 = vpow2.f32 %v4311_v20  ;;  %v7629_v20 = vld [vmem:[%s7862_s7 + $0x1] ss:$0 sm:$0xff] }
 0x5ae   : > { %v2940_v1 = vadd.f32 %v7629_v20, %v2917_v52 }
 0x5b2   : > { %v6333_v30 = vpop.eup %6332 }
 0x5b3   : > { %v2767_v3 = vmul.f32 %v6333_v30, %v2766_v27 }
 0x5b5   : > { %v2769_v25 = vadd.f32 %v2768_v58, %v2767_v3 }
 0x5b6   : > { %v6335_v26 = vpop.eup %6334 }
 0x5b7   : > { %v2930_v62 = vadd.f32 1.0, %v6335_v26  ;;  %4308 = vst [vmem:[%s6500_s11 + $0x20] sm:$0xff] %v2769_v25  ;;  %v7611_v57 = vmul.f32 %v2955_v41, %v2769_v25  ;;  %v6337_v15 = vpop.eup %6336  ;;  %v3133_v26 = vpop.permute.xlu1 %3132 }
 0x5b8   : > { %v2937_v42 = vadd.f32 1.0, %v6337_v15  ;;  %v7986_v15 = vld [vmem:[#allocation10_spill] sm:$0xff] }
 0x5b9   : > { %6338 = vrcp.f32 %v2930_v62  ;;  %3023 = vmatmul.mubr.f32.vlgmr.msra.gmra.mrb[10].mxu0 %v7611_v57  ;;  %5056 = vmatmul.mubr.f32.vlgmr.msra.gmra.mrb[38].mxu1 %v7611_v57  ;;  %v7985_v62 = vld [vmem:[#allocation11_spill] sm:$0xff] }
 0x5ba   : > { %5884 = vmatpush1.bf16.msra.mxu1 %v6918_v43  ;;  %5915 = vmatpush3.bf16.msra.mxu0 %v6920_v44  ;;  %6340 = vrcp.f32 %v2937_v42  ;;  %v7987_v42 = vld [vmem:[#allocation12_spill] sm:$0xff] }
 0x5bb   : > { %5886 = vmatprep.subr.bf16.mxu1 %v6927_v49  ;;  %5916 = vmatprep.subr.bf16.mxu0 %v7929_v59 }
 0x5bc   : > { %3200 = vmatprep.mubr.f32.mxu1 %v7930_v48  ;;  %5090 = vmatprep.mubr.msk.f32.mxu0 %vm6418_vm1, %v7930_v48 }
 0x5be   : > { %5888 = vmatpush1.bf16.msra.mxu1 %v6948_v60  ;;  %5918 = vmatpush3.bf16.msra.mxu0 %v6950_v61 }
 0x5bf   : > { %5890 = vmatprep.subr.bf16.mxu1 %v6957_v0  ;;  %5919 = vmatprep.subr.bf16.mxu0 %v7929_v59 }
 0x5c2   : > { %5892 = vmatpush1.bf16.msra.mxu1 %v6979_v12  ;;  %5921 = vmatpush3.bf16.msra.mxu0 %v6981_v16 }
 0x5c3   : > { %v6339_v30 = vpop.eup %6338  ;;  %5894 = vmatprep.subr.bf16.mxu1 %v6988_v19  ;;  %5922 = vmatprep.subr.bf16.mxu0 %v7929_v59 }
 0x5c4   : > { %v2941_v50 = vmul.f32 %v6339_v30, %v2940_v1  ;;  %v6341_v52 = vpop.eup %6340  ;;  %v7988_v1 = vld [vmem:[#allocation14_spill] sm:$0xff]  ;;  %v7989_v30 = vld [vmem:[#allocation13_spill] sm:$0xff] }
 0x5c5   : > { %v2944_v7 = vsub.f32 1.0, %v6341_v52  ;;  %v2946_v58 = vmul.f32 %v6341_v52, %v7557_v9  ;;  %v7984_v9 = vld [vmem:[#allocation9_spill] sm:$0xff]  ;;  %v7991_v52 = vld [vmem:[#allocation34_spill] sm:$0xff] }
 0x5c6   : > { %v2942_v38 = vadd.f32 %v2941_v50, %v7983_v4  ;;  %5896 = vmatpush1.bf16.msra.mxu1 %v7007_v31  ;;  %5924 = vmatpush3.bf16.msra.mxu0 %v7009_v32  ;;  %v7990_v50 = vld [vmem:[#allocation15_spill] sm:$0xff] }
 0x5c7   : > { %5898 = vmatprep.subr.bf16.mxu1 %v7016_v36  ;;  %5925 = vmatprep.subr.bf16.mxu0 %v7929_v59 }
 0x5c8   : > { %6342 = vtanh.f32 %v2942_v38 }
 0x5ca   : > { %5900 = vmatpush1.bf16.msra.mxu1 %v7035_v45  ;;  %5927 = vmatpush3.bf16.msra.mxu0 %v7037_v51 }
 0x5cb   : > { %5902 = vmatprep.subr.bf16.mxu1 %v7044_v53  ;;  %5928 = vmatprep.subr.bf16.mxu0 %v7929_v59 }
 0x5ce   : > { %5904 = vmatpush1.bf16.msra.mxu1 %v7063_v6  ;;  %5930 = vmatpush3.bf16.msra.mxu0 %v7065_v10 }
 0x5cf   : > { %5906 = vmatprep.subr.bf16.mxu1 %v7072_v18  ;;  %5931 = vmatprep.subr.bf16.mxu0 %v7929_v59 }
 0x5d2   : > { %v6343_v27 = vpop.eup %6342  ;;  %5908 = vmatpush1.bf16.msra.mxu1 %v7091_v33  ;;  %5933 = vmatpush3.bf16.msra.mxu0 %v7093_v37 }
 0x5d3   : > { %5910 = vmatprep.subr.bf16.mxu1 %v7100_v40  ;;  %5934 = vmatprep.subr.bf16.mxu0 %v7929_v59  ;;  %v2945_v3 = vmul.f32 %v6343_v27, %v2944_v7 }
 0x5d5   : > { %v2947_v25 = vadd.f32 %v2946_v58, %v2945_v3 }
 0x5d6   : > { %5912 = vmatpush1.bf16.msra.mxu1 %v7113_v54  ;;  %5936 = vmatpush3.bf16.msra.mxu0 %v7115_v56 }
 0x5d7   : > { %4312 = vst [vmem:[%s6505_s15 + $0x18] sm:$0xff] %v2947_v25  ;;  %v7657_v41 = vmul.f32 %v3133_v26, %v2947_v25  ;;  %5938 = vmatprep.subr.bf16.mxu0 %v6616_v55  ;;  %5969 = vmatprep.subr.bf16.mxu1 %v7929_v59  ;;  %v7992_v25 = vld [vmem:[#allocation35_spill] sm:$0xff] }
 0x5d9   : > { %3201 = vmatmul.mubr.f32.vlgmr.msra.gmra.mrb[16].mxu1 %v7657_v41  ;;  %5091 = vmatmul.mubr.f32.vlgmr.msra.gmra.mrb[30].mxu0 %v7657_v41 }
 0x5da   : > { %5940 = vmatpush1.bf16.msra.mxu0 %v6657_v5  ;;  %5971 = vmatpush3.bf16.msra.mxu1 %v6653_v2 }
 0x5db   : > { %5942 = vmatprep.subr.bf16.mxu0 %v6665_v8  ;;  %5972 = vmatprep.subr.bf16.mxu1 %v7929_v59 }
 0x5dc   : > { %3378 = vmatprep.mubr.f32.mxu0 %v7930_v48  ;;  %5125 = vmatprep.mubr.msk.f32.mxu1 %vm6418_vm1, %v7930_v48 }
 0x5de   : > { %5944 = vmatpush1.bf16.msra.mxu0 %v6686_v14  ;;  %5974 = vmatpush3.bf16.msra.mxu1 %v6682_v13 }
 0x5df   : > { %5946 = vmatprep.subr.bf16.mxu0 %v6696_v17  ;;  %5975 = vmatprep.subr.bf16.mxu1 %v7929_v59 }
 0x5e2   : > { %5948 = vmatpush1.bf16.msra.mxu0 %v6719_v24  ;;  %5977 = vmatpush3.bf16.msra.mxu1 %v6715_v23 }
 0x5e3   : > { %5950 = vmatprep.subr.bf16.mxu0 %v6729_v28  ;;  %5978 = vmatprep.subr.bf16.mxu1 %v7929_v59 }
 0x5e6   : > { %5952 = vmatpush1.bf16.msra.mxu0 %v6753_v35  ;;  %5980 = vmatpush3.bf16.msra.mxu1 %v6749_v34 }
 0x5e7   : > { %5954 = vmatprep.subr.bf16.mxu0 %v6763_v39  ;;  %5981 = vmatprep.subr.bf16.mxu1 %v7929_v59 }
 0x5ea   : > { %5956 = vmatpush1.bf16.msra.mxu0 %v6788_v47  ;;  %5983 = vmatpush3.bf16.msra.mxu1 %v6784_v46 }
 0x5eb   : > { %5958 = vmatprep.subr.bf16.mxu0 %v7970_v63  ;;  %5984 = vmatprep.subr.bf16.mxu1 %v7929_v59  ;;  %v7994_v63 = vld [vmem:[#allocation23_spill] sm:$0xff] }
 0x5ee   : > { %5960 = vmatpush1.bf16.msra.mxu0 %v7971_v22  ;;  %5986 = vmatpush3.bf16.msra.mxu1 %v7972_v11 }
 0x5ef   : > { %5962 = vmatprep.subr.bf16.mxu0 %v7984_v9  ;;  %5987 = vmatprep.subr.bf16.mxu1 %v7929_v59 }
 0x5f2   : > { %5964 = vmatpush1.bf16.msra.mxu0 %v7985_v62  ;;  %5989 = vmatpush3.bf16.msra.mxu1 %v7986_v15 }
 0x5f3   : > { %5966 = vmatprep.subr.bf16.mxu0 %v7987_v42  ;;  %5990 = vmatprep.subr.bf16.mxu1 %v7929_v59 }
 0x5f6   : > { %5968 = vmatpush1.bf16.msra.mxu0 %v7988_v1  ;;  %5992 = vmatpush3.bf16.msra.mxu1 %v7989_v30 }
 0x5f7   : > { %5994 = vmatprep.subr.bf16.mxu1 %v7990_v50  ;;  %6025 = vmatprep.subr.bf16.mxu0 %v7929_v59  ;;  %v7993_v50 = vld [vmem:[#allocation20_spill] sm:$0xff] }
 0x68c   : > { %v3024_v4 = vpop.f32.mrb[10].mxu0  ;;  %v3095_v38 = vpop.f32.mrb[38].mxu1 }
 0x68d   : > { %v6175_v7 = vadd.f32 %v3024_v4, %v7991_v52  ;;  %v3026_v27 = vpop.f32.mrb[11].mxu0  ;;  %v5057_v3 = vpop.f32.mrb[39].mxu1  ;;  %v3118_v9 = vadd.f32 %v7993_v50, %v3095_v38 }
 0x68e   : > { %v6176_v26 = vadd.f32 %v3026_v27, %v7992_v25 }
 0x68f   : > { %v4314_v58 = vmul.f32 -1.442695, %v6175_v7 }
 0x690   : > { %v4315_v42 = vmul.f32 -1.442695, %v6176_v26 }
 0x691   : > { %6344 = vpow2.f32 %v4314_v58 }
 0x692   : > { %6346 = vpow2.f32 %v4315_v42 }
 0x69b   : > { %v6345_v15 = vpop.eup %6344 }
 0x69c   : > { %v3108_v1 = vadd.f32 1.0, %v6345_v15  ;;  %v6347_v30 = vpop.eup %6346 }
 0x69d   : > { %v3115_v62 = vadd.f32 1.0, %v6347_v30 }
 0x69e   : > { %6348 = vrcp.f32 %v3108_v1 }
 0x69f   : > { %6350 = vrcp.f32 %v3115_v62  ;;  %v3311_v62 = vpop.permute.xlu0 %3310 }
 0x6a8   : > { %v6349_v11 = vpop.eup %6348 }
 0x6a9   : > { %v3119_v22 = vmul.f32 %v6349_v11, %v3118_v9  ;;  %v6351_v1 = vpop.eup %6350 }
 0x6aa   : > { %v3122_v38 = vsub.f32 1.0, %v6351_v1 }
 0x6ab   : > { %v3120_v4 = vadd.f32 %v3119_v22, %v7994_v63  ;;  %v3124_v63 = vmul.f32 %v6351_v1, %v7611_v57 }
 0x6ac   : > { %v3202_v52 = vpop.f32.mrb[16].mxu1  ;;  %v3273_v3 = vpop.f32.mrb[30].mxu0 }
 0x6ad   : > { %6352 = vtanh.f32 %v3120_v4  ;;  %v6189_v7 = vadd.f32 %v3202_v52, %v7232_v29  ;;  %v3204_v27 = vpop.f32.mrb[17].mxu1  ;;  %v5092_v42 = vpop.f32.mrb[31].mxu0 }
 0x6ae   : > { %v6190_v15 = vadd.f32 %v3204_v27, %v7234_v21  ;;  %v3296_v27 = vadd.f32 %v7629_v20, %v3273_v3 }
 0x6af   : > { %v4318_v58 = vmul.f32 -1.442695, %v6189_v7 }
 0x6b0   : > { %v4319_v30 = vmul.f32 -1.442695, %v6190_v15  ;;  %v7995_v15 = vld [vmem:[#allocation30_spill] sm:$0xff] }
 0x6b1   : > { %6354 = vpow2.f32 %v4318_v58 }
 0x6b2   : > { %6356 = vpow2.f32 %v4319_v30 }
 0x6b7   : > { %v6353_v26 = vpop.eup %6352 }
 0x6b8   : > { %v3123_v11 = vmul.f32 %v6353_v26, %v3122_v38 }
 0x6ba   : > { %v3125_v22 = vadd.f32 %v3124_v63, %v3123_v11 }
 0x6bb   : > { %v6355_v9 = vpop.eup %6354 }
 0x6bc   : > { %v3286_v4 = vadd.f32 1.0, %v6355_v9  ;;  %4316 = vst [vmem:[%s6500_s11 + $0x28] sm:$0xff] %v3125_v22  ;;  %v7706_v52 = vmul.f32 %v3311_v62, %v3125_v22  ;;  %v6357_v57 = vpop.eup %6356  ;;  %v3489_v22 = vpop.permute.xlu1 %3488 }
 0x6bd   : > { %v3293_v7 = vadd.f32 1.0, %v6357_v57 }
 0x6be   : > { %6358 = vrcp.f32 %v3286_v4  ;;  %3379 = vmatmul.mubr.f32.vlgmr.msra.gmra.mrb[32].mxu0 %v7706_v52  ;;  %5126 = vmatmul.mubr.f32.vlgmr.msra.gmra.mrb[40].mxu1 %v7706_v52 }
 0x6bf   : > { %5996 = vmatpush1.bf16.msra.mxu1 %v6918_v43  ;;  %6027 = vmatpush3.bf16.msra.mxu0 %v6920_v44  ;;  %6360 = vrcp.f32 %v3293_v7 }
 0x6c0   : > { %5998 = vmatprep.subr.bf16.mxu1 %v6927_v49  ;;  %6028 = vmatprep.subr.bf16.mxu0 %v7929_v59 }
 0x6c1   : > { %3556 = vmatprep.mubr.f32.mxu1 %v7930_v48  ;;  %5160 = vmatprep.mubr.msk.f32.mxu0 %vm6418_vm1, %v7930_v48 }
 0x6c3   : > { %6000 = vmatpush1.bf16.msra.mxu1 %v6948_v60  ;;  %6030 = vmatpush3.bf16.msra.mxu0 %v6950_v61 }
 0x6c4   : > { %6002 = vmatprep.subr.bf16.mxu1 %v6957_v0  ;;  %6031 = vmatprep.subr.bf16.mxu0 %v7929_v59 }
 0x6c7   : > { %6004 = vmatpush1.bf16.msra.mxu1 %v6979_v12  ;;  %6033 = vmatpush3.bf16.msra.mxu0 %v6981_v16 }
 0x6c8   : > { %v6359_v42 = vpop.eup %6358  ;;  %6006 = vmatprep.subr.bf16.mxu1 %v6988_v19  ;;  %6034 = vmatprep.subr.bf16.mxu0 %v7929_v59 }
 0x6c9   : > { %v3297_v58 = vmul.f32 %v6359_v42, %v3296_v27  ;;  %v6361_v3 = vpop.eup %6360 }
 0x6ca   : > { %v3300_v30 = vsub.f32 1.0, %v6361_v3  ;;  %v3302_v11 = vmul.f32 %v6361_v3, %v7657_v41 }
 0x6cb   : > { %v3298_v1 = vadd.f32 %v3297_v58, %v7995_v15  ;;  %6008 = vmatpush1.bf16.msra.mxu1 %v7007_v31  ;;  %6036 = vmatpush3.bf16.msra.mxu0 %v7009_v32 }
 0x6cc   : > { %6010 = vmatprep.subr.bf16.mxu1 %v7016_v36  ;;  %6037 = vmatprep.subr.bf16.mxu0 %v7929_v59 }
 0x6cd   : > { %6362 = vtanh.f32 %v3298_v1 }
 0x6cf   : > { %6012 = vmatpush1.bf16.msra.mxu1 %v7035_v45  ;;  %6039 = vmatpush3.bf16.msra.mxu0 %v7037_v51 }
 0x6d0   : > { %6014 = vmatprep.subr.bf16.mxu1 %v7044_v53  ;;  %6040 = vmatprep.subr.bf16.mxu0 %v7929_v59 }
 0x6d3   : > { %6016 = vmatpush1.bf16.msra.mxu1 %v7063_v6  ;;  %6042 = vmatpush3.bf16.msra.mxu0 %v7065_v10 }
 0x6d4   : > { %6018 = vmatprep.subr.bf16.mxu1 %v7072_v18  ;;  %6043 = vmatprep.subr.bf16.mxu0 %v7929_v59 }
 0x6d7   : > { %v6363_v38 = vpop.eup %6362  ;;  %6020 = vmatpush1.bf16.msra.mxu1 %v7091_v33  ;;  %6045 = vmatpush3.bf16.msra.mxu0 %v7093_v37 }
 0x6d8   : > { %6022 = vmatprep.subr.bf16.mxu1 %v7100_v40  ;;  %6046 = vmatprep.subr.bf16.mxu0 %v7929_v59  ;;  %v3301_v26 = vmul.f32 %v6363_v38, %v3300_v30 }
 0x6da   : > { %v3303_v63 = vadd.f32 %v3302_v11, %v3301_v26 }
 0x6db   : > { %6024 = vmatpush1.bf16.msra.mxu1 %v7113_v54  ;;  %6048 = vmatpush3.bf16.msra.mxu0 %v7115_v56 }
 0x6dc   : > { %4320 = vst [vmem:[%s6505_s15 + $0x10] sm:$0xff] %v3303_v63  ;;  %v7747_v9 = vmul.f32 %v3489_v22, %v3303_v63  ;;  %6050 = vmatprep.subr.bf16.mxu0 %v6616_v55  ;;  %6081 = vmatprep.subr.bf16.mxu1 %v7929_v59  ;;  %v7996_v55 = vld [vmem:[#allocation6_spill] sm:$0xff] }
 0x6dd   : > { %v8009_v63 = vld [vmem:[#allocation26_spill] sm:$0xff] }
 0x6de   : > { %3557 = vmatmul.mubr.f32.vlgmr.msra.gmra.mrb[14].mxu1 %v7747_v9  ;;  %5161 = vmatmul.mubr.f32.vlgmr.msra.gmra.mrb[34].mxu0 %v7747_v9 }
 0x6df   : > { %6052 = vmatpush1.bf16.msra.mxu0 %v6657_v5  ;;  %6083 = vmatpush3.bf16.msra.mxu1 %v6653_v2  ;;  %v7997_v2 = vld [vmem:[#allocation8_spill] sm:$0xff]  ;;  %v7998_v5 = vld [vmem:[#allocation7_spill] sm:$0xff] }
 0x6e0   : > { %6054 = vmatprep.subr.bf16.mxu0 %v6665_v8  ;;  %6084 = vmatprep.subr.bf16.mxu1 %v7929_v59  ;;  %v7999_v8 = vld [vmem:[#allocation9_spill] sm:$0xff] }
 0x6e1   : > { %3734 = vmatprep.mubr.f32.mxu0 %v7930_v48  ;;  %5195 = vmatprep.mubr.msk.f32.mxu1 %vm6418_vm1, %v7930_v48 }
 0x6e3   : > { %6056 = vmatpush1.bf16.msra.mxu0 %v6686_v14  ;;  %6086 = vmatpush3.bf16.msra.mxu1 %v6682_v13  ;;  %v8000_v13 = vld [vmem:[#allocation11_spill] sm:$0xff]  ;;  %v8001_v14 = vld [vmem:[#allocation10_spill] sm:$0xff] }
 0x6e4   : > { %6058 = vmatprep.subr.bf16.mxu0 %v6696_v17  ;;  %6087 = vmatprep.subr.bf16.mxu1 %v7929_v59  ;;  %v8002_v17 = vld [vmem:[#allocation12_spill] sm:$0xff] }
 0x6e7   : > { %6060 = vmatpush1.bf16.msra.mxu0 %v6719_v24  ;;  %6089 = vmatpush3.bf16.msra.mxu1 %v6715_v23  ;;  %v8003_v23 = vld [vmem:[#allocation14_spill] sm:$0xff]  ;;  %v8004_v24 = vld [vmem:[#allocation13_spill] sm:$0xff] }
 0x6e8   : > { %6062 = vmatprep.subr.bf16.mxu0 %v6729_v28  ;;  %6090 = vmatprep.subr.bf16.mxu1 %v7929_v59  ;;  %v8005_v28 = vld [vmem:[#allocation15_spill] sm:$0xff] }
 0x6eb   : > { %6064 = vmatpush1.bf16.msra.mxu0 %v6753_v35  ;;  %6092 = vmatpush3.bf16.msra.mxu1 %v6749_v34  ;;  %v8006_v34 = vld [vmem:[#allocation34_spill] sm:$0xff]  ;;  %v8007_v35 = vld [vmem:[#allocation16_spill] sm:$0xff] }
 0x6ec   : > { %6066 = vmatprep.subr.bf16.mxu0 %v6763_v39  ;;  %6093 = vmatprep.subr.bf16.mxu1 %v7929_v59  ;;  %v606_v39 = vadd.f32 %v8007_v35, %v8006_v34 }
 0x6ef   : > { %6068 = vmatpush1.bf16.msra.mxu0 %v6788_v47  ;;  %6095 = vmatpush3.bf16.msra.mxu1 %v6784_v46  ;;  %v8008_v46 = vld [vmem:[#allocation17_spill] sm:$0xff] }
 0x6f0   : > { %6070 = vmatprep.subr.bf16.mxu0 %v7996_v55  ;;  %6096 = vmatprep.subr.bf16.mxu1 %v7929_v59  ;;  %v608_v47 = vadd.f32 %v8008_v46, %v7992_v25 }
 0x6f3   : > { %6072 = vmatpush1.bf16.msra.mxu0 %v7997_v2  ;;  %6098 = vmatpush3.bf16.msra.mxu1 %v7998_v5 }
 0x6f4   : > { %6074 = vmatprep.subr.bf16.mxu0 %v7999_v8  ;;  %6099 = vmatprep.subr.bf16.mxu1 %v7929_v59 }
 0x6f7   : > { %6076 = vmatpush1.bf16.msra.mxu0 %v8000_v13  ;;  %6101 = vmatpush3.bf16.msra.mxu1 %v8001_v14 }
 0x6f8   : > { %6078 = vmatprep.subr.bf16.mxu0 %v8002_v17  ;;  %6102 = vmatprep.subr.bf16.mxu1 %v7929_v59 }
 0x6fb   : > { %6080 = vmatpush1.bf16.msra.mxu0 %v8003_v23  ;;  %6104 = vmatpush3.bf16.msra.mxu1 %v8004_v24 }
 0x6fc   : > { %6106 = vmatprep.subr.bf16.mxu1 %v8005_v28  ;;  %6137 = vmatprep.subr.bf16.mxu0 %v7929_v59 }
 0x791   : > { %v3380_v41 = vpop.f32.mrb[32].mxu0  ;;  %v3451_v62 = vpop.f32.mrb[40].mxu1 }
 0x792   : > { %v3460_v4 = vadd.f32 %v3380_v41, %v606_v39  ;;  %v3382_v57 = vpop.f32.mrb[33].mxu0  ;;  %v5127_v7 = vpop.f32.mrb[41].mxu1  ;;  %v3474_v38 = vadd.f32 %v7993_v50, %v3451_v62 }
 0x793   : > { %v3467_v27 = vadd.f32 %v3382_v57, %v608_v47  ;;  %v3667_v62 = vpop.permute.xlu0 %3666 }
 0x794   : > { %v4322_v42 = vmul.f32 -1.442695, %v3460_v4 }
 0x795   : > { %v4323_v58 = vmul.f32 -1.442695, %v3467_v27 }
 0x796   : > { %6364 = vpow2.f32 %v4322_v42 }
 0x797   : > { %6366 = vpow2.f32 %v4323_v58 }
 0x7a0   : > { %v6365_v15 = vpop.eup %6364 }
 0x7a1   : > { %v3464_v1 = vadd.f32 1.0, %v6365_v15  ;;  %v6367_v3 = vpop.eup %6366 }
 0x7a2   : > { %v3471_v30 = vadd.f32 1.0, %v6367_v3 }
 0x7a3   : > { %6368 = vrcp.f32 %v3464_v1 }
 0x7a4   : > { %6370 = vrcp.f32 %v3471_v30 }
 0x7ad   : > { %v6369_v26 = vpop.eup %6368 }
 0x7ae   : > { %v3475_v11 = vmul.f32 %v6369_v26, %v3474_v38  ;;  %v6371_v23 = vpop.eup %6370 }
 0x7af   : > { %v3478_v28 = vsub.f32 1.0, %v6371_v23  ;;  %v3480_v46 = vmul.f32 %v6371_v23, %v7706_v52 }
 0x7b0   : > { %v3476_v22 = vadd.f32 %v3475_v11, %v8009_v63 }
 0x7b1   : > { %v3558_v55 = vpop.f32.mrb[14].mxu1  ;;  %v3629_v2 = vpop.f32.mrb[34].mxu0 }
 0x7b2   : > { %6372 = vtanh.f32 %v3476_v22  ;;  %v6187_v5 = vadd.f32 %v3558_v55, %v7232_v29  ;;  %v3560_v8 = vpop.f32.mrb[15].mxu1  ;;  %v5162_v13 = vpop.f32.mrb[35].mxu0 }
 0x7b3   : > { %v6188_v17 = vadd.f32 %v3560_v8, %v7234_v21 }
 0x7b4   : > { %v4326_v14 = vmul.f32 -1.442695, %v6187_v5 }
 0x7b5   : > { %v4327_v24 = vmul.f32 -1.442695, %v6188_v17 }
 0x7b6   : > { %6374 = vpow2.f32 %v4326_v14 }
 0x7b7   : > { %6376 = vpow2.f32 %v4327_v24 }
 0x7bc   : > { %v6373_v35 = vpop.eup %6372 }
 0x7bd   : > { %v3479_v39 = vmul.f32 %v6373_v35, %v3478_v28 }
 0x7bf   : > { %v3481_v47 = vadd.f32 %v3480_v46, %v3479_v39  ;;  %v8014_v46 = vld [vmem:[#allocation28_spill] sm:$0xff] }
 0x7c0   : > { %v6375_v41 = vpop.eup %6374 }
 0x7c1   : > { %v3642_v4 = vadd.f32 1.0, %v6375_v41  ;;  %4324 = vst [vmem:[%s6500_s11 + $0x30] sm:$0xff] %v3481_v47  ;;  %v7798_v57 = vmul.f32 %v3667_v62, %v3481_v47  ;;  %v6377_v52 = vpop.eup %6376 }
 0x7c3   : > { %6378 = vrcp.f32 %v3642_v4  ;;  %3735 = vmatmul.mubr.f32.vlgmr.msra.gmra.mrb[36].mxu0 %v7798_v57  ;;  %5196 = vmatmul.mubr.f32.vlgmr.msra.gmra.mrb[42].mxu1 %v7798_v57 }
 0x7c4   : > { %6108 = vmatpush1.bf16.msra.mxu1 %v6918_v43  ;;  %6139 = vmatpush3.bf16.msra.mxu0 %v6920_v44  ;;  %v3649_v43 = vadd.f32 1.0, %v6377_v52  ;;  %v3652_v44 = vadd.f32 %v7629_v20, %v3629_v2 }
 0x7c5   : > { %6110 = vmatprep.subr.bf16.mxu1 %v6927_v49  ;;  %6140 = vmatprep.subr.bf16.mxu0 %v7929_v59 }
 0x7c6   : > { %3911 = vmatprep.mubr.f32.mxu1 %v7930_v48  ;;  %5230 = vmatprep.mubr.msk.f32.mxu0 %vm6418_vm1, %v7930_v48  ;;  %6380 = vrcp.f32 %v3649_v43 }
 0x7c8   : > { %6112 = vmatpush1.bf16.msra.mxu1 %v6948_v60  ;;  %6142 = vmatpush3.bf16.msra.mxu0 %v6950_v61  ;;  %v8010_v60 = vld [vmem:[#allocation27_spill] sm:$0xff] }
 0x7c9   : > { %6114 = vmatprep.subr.bf16.mxu1 %v6957_v0  ;;  %6143 = vmatprep.subr.bf16.mxu0 %v7929_v59 }
 0x7cc   : > { %6116 = vmatpush1.bf16.msra.mxu1 %v6979_v12  ;;  %6145 = vmatpush3.bf16.msra.mxu0 %v6981_v16 }
 0x7cd   : > { %v6379_v49 = vpop.eup %6378  ;;  %6118 = vmatprep.subr.bf16.mxu1 %v6988_v19  ;;  %6146 = vmatprep.subr.bf16.mxu0 %v7929_v59 }
 0x7ce   : > { %v3653_v48 = vmul.f32 %v6379_v49, %v3652_v44 }
 0x7d0   : > { %v3654_v61 = vadd.f32 %v3653_v48, %v8010_v60  ;;  %6120 = vmatpush1.bf16.msra.mxu1 %v7007_v31  ;;  %6148 = vmatpush3.bf16.msra.mxu0 %v7009_v32  ;;  %v6381_v0 = vpop.eup %6380 }
 0x7d1   : > { %6122 = vmatprep.subr.bf16.mxu1 %v7016_v36  ;;  %6149 = vmatprep.subr.bf16.mxu0 %v7929_v59  ;;  %v3656_v12 = vsub.f32 1.0, %v6381_v0  ;;  %v3658_v31 = vmul.f32 %v6381_v0, %v7747_v9  ;;  %v3844_v36 = vpop.permute.xlu1 %3843 }
 0x7d2   : > { %6382 = vtanh.f32 %v3654_v61 }
 0x7d4   : > { %6124 = vmatpush1.bf16.msra.mxu1 %v7035_v45  ;;  %6151 = vmatpush3.bf16.msra.mxu0 %v7037_v51  ;;  %v8011_v51 = vld [vmem:[#allocation18_spill] sm:$0xff] }
 0x7d5   : > { %6126 = vmatprep.subr.bf16.mxu1 %v7044_v53  ;;  %6152 = vmatprep.subr.bf16.mxu0 %v7929_v59  ;;  %v612_v53 = vadd.f32 %v8011_v51, %v8006_v34 }
 0x7d8   : > { %6128 = vmatpush1.bf16.msra.mxu1 %v7063_v6  ;;  %6154 = vmatpush3.bf16.msra.mxu0 %v7065_v10  ;;  %v8012_v6 = vld [vmem:[#allocation19_spill] sm:$0xff] }
 0x7d9   : > { %6130 = vmatprep.subr.bf16.mxu1 %v7072_v18  ;;  %6155 = vmatprep.subr.bf16.mxu0 %v7929_v59  ;;  %v614_v10 = vadd.f32 %v8012_v6, %v7992_v25  ;;  %v8013_v25 = vld [vmem:[#allocation25_spill] sm:$0xff] }
 0x7dc   : > { %v6383_v16 = vpop.eup %6382  ;;  %6132 = vmatpush1.bf16.msra.mxu1 %v7091_v33  ;;  %6157 = vmatpush3.bf16.msra.mxu0 %v7093_v37 }
 0x7dd   : > { %6134 = vmatprep.subr.bf16.mxu1 %v7100_v40  ;;  %6158 = vmatprep.subr.bf16.mxu0 %v7929_v59  ;;  %v3657_v19 = vmul.f32 %v6383_v16, %v3656_v12 }
 0x7df   : > { %v3659_v32 = vadd.f32 %v3658_v31, %v3657_v19 }
 0x7e0   : > { %6136 = vmatpush1.bf16.msra.mxu1 %v7113_v54  ;;  %6160 = vmatpush3.bf16.msra.mxu0 %v7115_v56 }
 0x7e1   : > { %4328 = vst [vmem:[%s6505_s15 + $0x8] sm:$0xff] %v3659_v32  ;;  %v3846_v45 = vmul.f32 %v3844_v36, %v3659_v32 }
 0x7e3   : > { %3912 = vmatmul.mubr.f32.vlgmr.msra.gmra.mrb[12].mxu1 %v3846_v45  ;;  %5231 = vmatmul.mubr.f32.vlgmr.msra.gmra.mrb[38].mxu0 %v3846_v45 }
 0x896   : > { %v3736_v18 = vpop.f32.mrb[36].mxu0  ;;  %v3807_v33 = vpop.f32.mrb[42].mxu1 }
 0x897   : > { %v3816_v37 = vadd.f32 %v3736_v18, %v612_v53  ;;  %v3738_v40 = vpop.f32.mrb[37].mxu0  ;;  %v5197_v59 = vpop.f32.mrb[43].mxu1  ;;  %v3830_v34 = vadd.f32 %v7993_v50, %v3807_v33 }
 0x898   : > { %v3823_v9 = vadd.f32 %v3738_v40, %v614_v10 }
 0x899   : > { %v4330_v7 = vmul.f32 -1.442695, %v3816_v37 }
 0x89a   : > { %v4331_v54 = vmul.f32 -1.442695, %v3823_v9 }
 0x89b   : > { %6384 = vpow2.f32 %v4330_v7 }
 0x89c   : > { %6386 = vpow2.f32 %v4331_v54 }
 0x8a5   : > { %v6385_v56 = vpop.eup %6384 }
 0x8a6   : > { %v3820_v27 = vadd.f32 1.0, %v6385_v56  ;;  %v6387_v42 = vpop.eup %6386 }
 0x8a7   : > { %v3827_v58 = vadd.f32 1.0, %v6387_v42 }
 0x8a8   : > { %6388 = vrcp.f32 %v3820_v27 }
 0x8a9   : > { %6390 = vrcp.f32 %v3827_v58 }
 0x8b2   : > { %v6389_v15 = vpop.eup %6388 }
 0x8b3   : > { %v3831_v1 = vmul.f32 %v6389_v15, %v3830_v34  ;;  %v6391_v2 = vpop.eup %6390 }
 0x8b4   : > { %v3834_v50 = vsub.f32 1.0, %v6391_v2  ;;  %v3836_v14 = vmul.f32 %v6391_v2, %v7798_v57 }
 0x8b5   : > { %v3832_v3 = vadd.f32 %v3831_v1, %v8013_v25 }
 0x8b6   : > { %v3913_v30 = vpop.f32.mrb[12].mxu1  ;;  %v3984_v38 = vpop.f32.mrb[38].mxu0 }
 0x8b7   : > { %6392 = vtanh.f32 %v3832_v3  ;;  %v6185_v26 = vadd.f32 %v3913_v30, %v7232_v29  ;;  %v3915_v11 = vpop.f32.mrb[13].mxu1  ;;  %v5232_v63 = vpop.f32.mrb[39].mxu0 }
 0x8b8   : > { %v6186_v55 = vadd.f32 %v3915_v11, %v7234_v21  ;;  %v4007_v21 = vadd.f32 %v7629_v20, %v3984_v38 }
 0x8b9   : > { %v4333_v22 = vmul.f32 -1.442695, %v6185_v26 }
 0x8ba   : > { %v4334_v5 = vmul.f32 -1.442695, %v6186_v55 }
 0x8bb   : > { %6394 = vpow2.f32 %v4333_v22 }
 0x8bc   : > { %6396 = vpow2.f32 %v4334_v5 }
 0x8c1   : > { %v6393_v8 = vpop.eup %6392 }
 0x8c2   : > { %v3835_v13 = vmul.f32 %v6393_v8, %v3834_v50 }
 0x8c4   : > { %v3837_v17 = vadd.f32 %v3836_v14, %v3835_v13 }
 0x8c5   : > { %v6395_v23 = vpop.eup %6394 }
 0x8c6   : > { %4332 = vst [vmem:[%s6500_s11 + $0x38] sm:$0xff] %v3837_v17  ;;  %4016 = vst [vmem:[#allocation2] sm:$0xff] %v3837_v17  ;;  %v3997_v24 = vadd.f32 1.0, %v6395_v23  ;;  %v6397_v29 = vpop.eup %6396 }
 0x8c7   : > { %v4004_v28 = vadd.f32 1.0, %v6397_v29 }
 0x8c8   : > { %6398 = vrcp.f32 %v3997_v24 }
 0x8c9   : > { %6400 = vrcp.f32 %v4004_v28 }
 0x8d2   : > { %v6399_v35 = vpop.eup %6398 }
 0x8d3   : > { %v4008_v39 = vmul.f32 %v6399_v35, %v4007_v21  ;;  %v6401_v41 = vpop.eup %6400 }
 0x8d4   : > { %v4011_v62 = vsub.f32 1.0, %v6401_v41  ;;  %v4013_v52 = vmul.f32 %v6401_v41, %v3846_v45 }
 0x8d5   : > { %v4009_v47 = vadd.f32 %v4008_v39, %v8014_v46 }
 0x8d7   : > { %6402 = vtanh.f32 %v4009_v47 }
 0x8e1   : > { %v6403_v4 = vpop.eup %6402 }
 0x8e2   : > { %v4012_v57 = vmul.f32 %v6403_v4, %v4011_v62 }
 0x8e4   : > { %v4014_v43 = vadd.f32 %v4013_v52, %v4012_v57 }
 0x8e6   : > { %4015 = vst [vmem:[%s6505_s15] sm:$0xff] %v4014_v43  ;;  %4017 = vst [vmem:[#allocation3] sm:$0xff] %v4014_v43 }
 0x8e7 PF: > { %s20_s30 = sadd.s32 1, %s6412_s30  }
 0x8e8   : > { %p17_p6 = scmp.ge.s32.totalorder %s20_s30, 4  }
 0x8ea   :  { %19 = sbr.rel (!%p17_p6) target bundleno = 1 (0x1), region = 155 }

</bundles_post_ra>
